<compile_context>
chip_gen: v7x
topology: tpu7x:2x2x1
jax: 0.10.0
libtpu: 0.0.40
codegen_flags: <defaults>
</compile_context>

<pallas_src>
import functools

import jax
import jax.numpy as jnp
from jax.experimental import pallas as pl
from jax.experimental.pallas import tpu as pltpu


def _erf_poly(x):
    # Abramowitz & Stegun 7.1.26, |error| <= 1.5e-7.  (f32 math, VPU/EUP.)
    a1, a2, a3, a4, a5 = (0.254829592, -0.284496736, 1.421413741,
                          -1.453152027, 1.061405429)
    p = 0.3275911
    sgn = jnp.where(x >= 0.0, 1.0, -1.0)
    ax = jnp.abs(x)
    t = 1.0 / (1.0 + p * ax)          # exact divide (keeps GELU at f32 accuracy)
    poly = t * (a1 + t * (a2 + t * (a3 + t * (a4 + t * a5))))
    return sgn * (1.0 - poly * jnp.exp(-ax * ax))


def _gelu_exact(x):
    # 0.5 * x * (1 + erf(x / sqrt(2)))  -- matches torch nn.GELU() (exact).
    return 0.5 * x * (1.0 + _erf_poly(x * 0.7071067811865476))


def ffn_kernel(x_ref, kbd_ref, vbd_ref, w_ref, b_ref, o_ref, *, num_groups, hidden):
    """One tile of tokens: block-diag score -> GELU -> grouped softmax -> value mix -> proj."""
    G, L = num_groups, hidden
    tm = x_ref.shape[0]

    x = x_ref[...]                                                   # (TM, C) bf16
    # Scores for all groups at once (one big MXU matmul, f32 accumulation).
    s = jnp.dot(x, kbd_ref[...], preferred_element_type=jnp.float32)  # (TM, G*L)
    s = _gelu_exact(s)                                               # full-width f32

    # Grouped softmax over the hidden (L) axis: per-group max / sum reductions
    # on 32-lane slices, but the exp runs on the full lane-dense tensor.
    m_full = jnp.concatenate(
        [jnp.broadcast_to(
            jnp.max(s[:, g * L:(g + 1) * L], axis=-1, keepdims=True), (tm, L))
         for g in range(G)], axis=-1)                                # (TM, G*L)
    e = jnp.exp(s - m_full)                                          # full-width EUP exp
    inv_full = jnp.concatenate(
        [jnp.broadcast_to(
            pl.reciprocal(jnp.sum(e[:, g * L:(g + 1) * L], axis=-1, keepdims=True),
                          approx=True), (tm, L))
         for g in range(G)], axis=-1)                                # (TM, G*L)
    attn = e * inv_full                                              # f32

    # Value mix + projection (bf16 MXU matmuls, f32 accumulation).
    y = jnp.dot(attn.astype(vbd_ref.dtype), vbd_ref[...],
                preferred_element_type=jnp.float32)                  # (TM, C)
    out = jnp.dot(y.astype(w_ref.dtype), w_ref[...],
                  preferred_element_type=jnp.float32) + b_ref[...]   # (TM, OUT)
    o_ref[...] = out.astype(o_ref.dtype)


def ffn_forward(x, k, v, w, b, num_groups, *, tm=256):
    """x: (B, N, C); k, v: (C//G, G, L); w: (out, C); b: (out,)."""
    B, N, C = x.shape
    G = num_groups
    assert C % G == 0
    D = C // G
    L = k.shape[-1]
    GL = G * L
    OUT = w.shape[0]
    M = B * N
    # TODO(synk): add a masked tail tile for token counts not divisible by tm.
    assert M % tm == 0, "token count must be divisible by the tile size"

    # Block-diagonal parameter layouts (exact: off-diagonal blocks are zero):
    #   K_bd[g*D + d, g*L + l] = k[d, g, l]      (C,  G*L)
    #   V_bd[g*L + l, g*D + d] = v[d, g, l]      (G*L, C)
    eye_g = jnp.eye(G, dtype=jnp.float32)
    kbd = jnp.einsum('dgl,gh->gdhl', k.astype(jnp.float32), eye_g).reshape(C, GL)
    vbd = jnp.einsum('dgl,gh->glhd', v.astype(jnp.float32), eye_g).reshape(GL, C)

    # bf16 matmul operands (f32 accumulation inside the kernel).
    xf = x.reshape(M, C).astype(jnp.bfloat16)
    kbd = kbd.astype(jnp.bfloat16)
    vbd = vbd.astype(jnp.bfloat16)
    wt = jnp.transpose(w).astype(jnp.bfloat16)      # (C, OUT)
    bt = b.reshape(1, OUT).astype(jnp.float32)

    kernel = functools.partial(ffn_kernel, num_groups=G, hidden=L)
    out = pl.pallas_call(
        kernel,
        out_shape=jax.ShapeDtypeStruct((M, OUT), x.dtype),
        grid_spec=pltpu.PrefetchScalarGridSpec(
            num_scalar_prefetch=0,
            grid=(M // tm,),
            in_specs=[
                pl.BlockSpec((tm, C), lambda i: (i, 0)),
                pl.BlockSpec((C, GL), lambda i: (0, 0)),
                pl.BlockSpec((GL, C), lambda i: (0, 0)),
                pl.BlockSpec((C, OUT), lambda i: (0, 0)),
                pl.BlockSpec((1, OUT), lambda i: (0, 0)),
            ],
            out_specs=pl.BlockSpec((tm, OUT), lambda i: (i, 0)),
        ),
        compiler_params=pltpu.CompilerParams(
            dimension_semantics=("parallel",)),
    )(xf, kbd, vbd, wt, bt)
    return out.reshape(B, N, OUT)


def ffn_reference(x, k, v, w, b, num_groups):
    """Pure-JAX reference of the intended torch forward pass (f32)."""
    B, N, C = x.shape
    D = C // num_groups
    q = x.reshape(B, N, num_groups, D)
    score = jax.nn.gelu(jnp.einsum('bngd,dgl->bngl', q, k), approximate=False)
    attn = jax.nn.softmax(score, axis=-1)
    y = jnp.einsum('bngl,dgl->bngd', attn, v).reshape(B, N, C)
    return y @ w.T + b


if __name__ == "__main__":
    # Small but lane-dense problem: C = OUT = 128 (output last dim multiple of
    # 128 -> unmasked stores), G = 4 (D = 32), hidden L = 32 (G*L = 128),
    # M = B*N = 512 tokens -> 2 "parallel" grid steps of tm = 256 (keeps both
    # v7x TensorCores busy; near-zero effect on v5e/v6e).
    B, N, C = 2, 256, 128
    G, L = 4, 32
    OUT = C
    D = C // G

    key = jax.random.PRNGKey(0)
    kx, kk, kv, kw, kb = jax.random.split(key, 5)
    x = jax.random.normal(kx, (B, N, C), dtype=jnp.float32)
    k_param = jax.random.normal(kk, (D, G, L), dtype=jnp.float32)       # torch.randn
    v_param = jax.random.normal(kv, (D, G, L), dtype=jnp.float32)       # torch.randn
    w_proj = 0.05 * jax.random.normal(kw, (OUT, C), dtype=jnp.float32)  # nn.Linear weight
    b_proj = 0.05 * jax.random.normal(kb, (OUT,), dtype=jnp.float32)    # nn.Linear bias

    out = ffn_forward(x, k_param, v_param, w_proj, b_proj, G, tm=256)
    out = jax.block_until_ready(out)
    assert out.shape == (B, N, OUT)

    # Compare against the f32 reference evaluated on bf16-rounded operands
    # (isolates the intentional bf16-matmul rounding from any kernel bug).
    r32 = lambda a: a.astype(jnp.bfloat16).astype(jnp.float32)
    ref = ffn_reference(r32(x), r32(k_param), r32(v_param), r32(w_proj), b_proj, G)
    max_err = float(jnp.max(jnp.abs(out - ref)))
    assert jnp.allclose(out, ref, atol=2e-2, rtol=2e-2), max_err

    print("KERNEL_OK")
</pallas_src>

<mosaic_0001>
module attributes {stable_mosaic.version = 11 : i64} {
  func.func @ffn_kernel(%arg0: i32, %arg1: memref<256x128xbf16, #tpu.memory_space<vmem>>, %arg2: memref<128x128xbf16, #tpu.memory_space<vmem>>, %arg3: memref<128x128xbf16, #tpu.memory_space<vmem>>, %arg4: memref<128x128xbf16, #tpu.memory_space<vmem>>, %arg5: memref<1x128xf32, #tpu.memory_space<vmem>>, %arg6: memref<256x128xf32, #tpu.memory_space<vmem>>) attributes {dimension_semantics = [#tpu.dimension_semantics<parallel>], iteration_bounds = array<i64: 2>, scalar_prefetch = 0 : i64, scratch_operands = 0 : i64, tpu.core_type = #tpu.core_type<tc>, window_params = [{transform_indices = @transform_0, window_bounds = array<i64: 256, 128>}, {pipeline_mode = #tpu.pipeline_mode<synchronous>, transform_indices = @transform_1, window_bounds = array<i64: 128, 128>}, {pipeline_mode = #tpu.pipeline_mode<synchronous>, transform_indices = @transform_2, window_bounds = array<i64: 128, 128>}, {pipeline_mode = #tpu.pipeline_mode<synchronous>, transform_indices = @transform_3, window_bounds = array<i64: 128, 128>}, {pipeline_mode = #tpu.pipeline_mode<synchronous>, transform_indices = @transform_4, window_bounds = array<i64: 1, 128>}, {transform_indices = @transform_5, window_bounds = array<i64: 256, 128>}]} {
    %c0 = arith.constant 0 : index
    %c0_0 = arith.constant 0 : index
    %0 = vector.load %arg1[%c0, %c0_0] : memref<256x128xbf16, #tpu.memory_space<vmem>>, vector<256x128xbf16>
    %c0_1 = arith.constant 0 : index
    %c0_2 = arith.constant 0 : index
    %1 = vector.load %arg2[%c0_1, %c0_2] : memref<128x128xbf16, #tpu.memory_space<vmem>>, vector<128x128xbf16>
    %cst = arith.constant dense<0.000000e+00> : vector<256x128xf32>
    %2 = tpu.matmul %0, %1, %cst {dimension_numbers = #tpu.dot_dimension_numbers<[1], [0], [0], [1], [0, 0, 1, 1], [], []>} : vector<256x128xbf16>, vector<128x128xbf16>, vector<256x128xf32> -> vector<256x128xf32>
    %cst_3 = arith.constant 5.000000e-01 : f32
    %3 = vector.broadcast %cst_3 : f32 to vector<256x128xf32>
    %4 = arith.mulf %3, %2 : vector<256x128xf32>
    %cst_4 = arith.constant 0.707106769 : f32
    %5 = vector.broadcast %cst_4 : f32 to vector<256x128xf32>
    %6 = arith.mulf %2, %5 : vector<256x128xf32>
    %cst_5 = arith.constant 0.000000e+00 : f32
    %7 = vector.broadcast %cst_5 : f32 to vector<256x128xf32>
    %8 = arith.cmpf oge, %6, %7 : vector<256x128xf32>
    %cst_6 = arith.constant 1.000000e+00 : f32
    %cst_7 = arith.constant -1.000000e+00 : f32
    %9 = vector.broadcast %cst_6 : f32 to vector<256x128xf32>
    %10 = vector.broadcast %cst_7 : f32 to vector<256x128xf32>
    %11 = arith.select %8, %9, %10 : vector<256x128xi1>, vector<256x128xf32>
    %12 = math.absf %6 : vector<256x128xf32>
    %cst_8 = arith.constant 0.327591091 : f32
    %13 = vector.broadcast %cst_8 : f32 to vector<256x128xf32>
    %14 = arith.mulf %13, %12 : vector<256x128xf32>
    %cst_9 = arith.constant 1.000000e+00 : f32
    %15 = vector.broadcast %cst_9 : f32 to vector<256x128xf32>
    %16 = arith.addf %15, %14 : vector<256x128xf32>
    %cst_10 = arith.constant 1.000000e+00 : f32
    %17 = vector.broadcast %cst_10 : f32 to vector<256x128xf32>
    %18 = arith.divf %17, %16 : vector<256x128xf32>
    %cst_11 = arith.constant 1.06140542 : f32
    %19 = vector.broadcast %cst_11 : f32 to vector<256x128xf32>
    %20 = arith.mulf %18, %19 : vector<256x128xf32>
    %cst_12 = arith.constant -1.45315206 : f32
    %21 = vector.broadcast %cst_12 : f32 to vector<256x128xf32>
    %22 = arith.addf %21, %20 : vector<256x128xf32>
    %23 = arith.mulf %18, %22 : vector<256x128xf32>
    %cst_13 = arith.constant 1.42141378 : f32
    %24 = vector.broadcast %cst_13 : f32 to vector<256x128xf32>
    %25 = arith.addf %24, %23 : vector<256x128xf32>
    %26 = arith.mulf %18, %25 : vector<256x128xf32>
    %cst_14 = arith.constant -0.284496725 : f32
    %27 = vector.broadcast %cst_14 : f32 to vector<256x128xf32>
    %28 = arith.addf %27, %26 : vector<256x128xf32>
    %29 = arith.mulf %18, %28 : vector<256x128xf32>
    %cst_15 = arith.constant 0.254829586 : f32
    %30 = vector.broadcast %cst_15 : f32 to vector<256x128xf32>
    %31 = arith.addf %30, %29 : vector<256x128xf32>
    %32 = arith.mulf %18, %31 : vector<256x128xf32>
    %cst_16 = arith.constant 0.000000e+00 : f32
    %33 = vector.broadcast %cst_16 : f32 to vector<256x128xf32>
    %34 = arith.subf %33, %12 : vector<256x128xf32>
    %35 = arith.mulf %34, %12 : vector<256x128xf32>
    %36 = math.exp %35 : vector<256x128xf32>
    %37 = arith.mulf %32, %36 : vector<256x128xf32>
    %cst_17 = arith.constant 1.000000e+00 : f32
    %38 = vector.broadcast %cst_17 : f32 to vector<256x128xf32>
    %39 = arith.subf %38, %37 : vector<256x128xf32>
    %40 = arith.mulf %11, %39 : vector<256x128xf32>
    %cst_18 = arith.constant 1.000000e+00 : f32
    %41 = vector.broadcast %cst_18 : f32 to vector<256x128xf32>
    %42 = arith.addf %41, %40 : vector<256x128xf32>
    %43 = arith.mulf %4, %42 : vector<256x128xf32>
    %44 = vector.extract_strided_slice %43 {offsets = [0, 0], sizes = [256, 32], strides = [1, 1]} : vector<256x128xf32> to vector<256x32xf32>
    %cst_19 = arith.constant dense<0xFF800000> : vector<256xf32>
    %45 = vector.multi_reduction <maximumf>, %44, %cst_19 [1] : vector<256x32xf32> to vector<256xf32>
    %46 = vector.shape_cast %45 : vector<256xf32> to vector<256x1xf32>
    %47 = vector.shape_cast %46 : vector<256x1xf32> to vector<256x1xf32>
    %48 = vector.broadcast %47 : vector<256x1xf32> to vector<256x32xf32>
    %49 = vector.extract_strided_slice %43 {offsets = [0, 32], sizes = [256, 32], strides = [1, 1]} : vector<256x128xf32> to vector<256x32xf32>
    %cst_20 = arith.constant dense<0xFF800000> : vector<256xf32>
    %50 = vector.multi_reduction <maximumf>, %49, %cst_20 [1] : vector<256x32xf32> to vector<256xf32>
    %51 = vector.shape_cast %50 : vector<256xf32> to vector<256x1xf32>
    %52 = vector.shape_cast %51 : vector<256x1xf32> to vector<256x1xf32>
    %53 = vector.broadcast %52 : vector<256x1xf32> to vector<256x32xf32>
    %54 = vector.extract_strided_slice %43 {offsets = [0, 64], sizes = [256, 32], strides = [1, 1]} : vector<256x128xf32> to vector<256x32xf32>
    %cst_21 = arith.constant dense<0xFF800000> : vector<256xf32>
    %55 = vector.multi_reduction <maximumf>, %54, %cst_21 [1] : vector<256x32xf32> to vector<256xf32>
    %56 = vector.shape_cast %55 : vector<256xf32> to vector<256x1xf32>
    %57 = vector.shape_cast %56 : vector<256x1xf32> to vector<256x1xf32>
    %58 = vector.broadcast %57 : vector<256x1xf32> to vector<256x32xf32>
    %59 = vector.extract_strided_slice %43 {offsets = [0, 96], sizes = [256, 32], strides = [1, 1]} : vector<256x128xf32> to vector<256x32xf32>
    %cst_22 = arith.constant dense<0xFF800000> : vector<256xf32>
    %60 = vector.multi_reduction <maximumf>, %59, %cst_22 [1] : vector<256x32xf32> to vector<256xf32>
    %61 = vector.shape_cast %60 : vector<256xf32> to vector<256x1xf32>
    %62 = vector.shape_cast %61 : vector<256x1xf32> to vector<256x1xf32>
    %63 = vector.broadcast %62 : vector<256x1xf32> to vector<256x32xf32>
    %64 = tpu.concatenate %48, %53, %58, %63 in 1 : vector<256x32xf32>, vector<256x32xf32>, vector<256x32xf32>, vector<256x32xf32> -> vector<256x128xf32>
    %65 = arith.subf %43, %64 : vector<256x128xf32>
    %66 = math.exp %65 : vector<256x128xf32>
    %67 = vector.extract_strided_slice %66 {offsets = [0, 0], sizes = [256, 32], strides = [1, 1]} : vector<256x128xf32> to vector<256x32xf32>
    %cst_23 = arith.constant dense<0.000000e+00> : vector<256xf32>
    %68 = vector.multi_reduction <add>, %67, %cst_23 [1] : vector<256x32xf32> to vector<256xf32>
    %69 = vector.shape_cast %68 : vector<256xf32> to vector<256x1xf32>
    %70 = tpu.reciprocal %69 {approx = true} : vector<256x1xf32> -> vector<256x1xf32>
    %71 = vector.shape_cast %70 : vector<256x1xf32> to vector<256x1xf32>
    %72 = vector.broadcast %71 : vector<256x1xf32> to vector<256x32xf32>
    %73 = vector.extract_strided_slice %66 {offsets = [0, 32], sizes = [256, 32], strides = [1, 1]} : vector<256x128xf32> to vector<256x32xf32>
    %cst_24 = arith.constant dense<0.000000e+00> : vector<256xf32>
    %74 = vector.multi_reduction <add>, %73, %cst_24 [1] : vector<256x32xf32> to vector<256xf32>
    %75 = vector.shape_cast %74 : vector<256xf32> to vector<256x1xf32>
    %76 = tpu.reciprocal %75 {approx = true} : vector<256x1xf32> -> vector<256x1xf32>
    %77 = vector.shape_cast %76 : vector<256x1xf32> to vector<256x1xf32>
    %78 = vector.broadcast %77 : vector<256x1xf32> to vector<256x32xf32>
    %79 = vector.extract_strided_slice %66 {offsets = [0, 64], sizes = [256, 32], strides = [1, 1]} : vector<256x128xf32> to vector<256x32xf32>
    %cst_25 = arith.constant dense<0.000000e+00> : vector<256xf32>
    %80 = vector.multi_reduction <add>, %79, %cst_25 [1] : vector<256x32xf32> to vector<256xf32>
    %81 = vector.shape_cast %80 : vector<256xf32> to vector<256x1xf32>
    %82 = tpu.reciprocal %81 {approx = true} : vector<256x1xf32> -> vector<256x1xf32>
    %83 = vector.shape_cast %82 : vector<256x1xf32> to vector<256x1xf32>
    %84 = vector.broadcast %83 : vector<256x1xf32> to vector<256x32xf32>
    %85 = vector.extract_strided_slice %66 {offsets = [0, 96], sizes = [256, 32], strides = [1, 1]} : vector<256x128xf32> to vector<256x32xf32>
    %cst_26 = arith.constant dense<0.000000e+00> : vector<256xf32>
    %86 = vector.multi_reduction <add>, %85, %cst_26 [1] : vector<256x32xf32> to vector<256xf32>
    %87 = vector.shape_cast %86 : vector<256xf32> to vector<256x1xf32>
    %88 = tpu.reciprocal %87 {approx = true} : vector<256x1xf32> -> vector<256x1xf32>
    %89 = vector.shape_cast %88 : vector<256x1xf32> to vector<256x1xf32>
    %90 = vector.broadcast %89 : vector<256x1xf32> to vector<256x32xf32>
    %91 = tpu.concatenate %72, %78, %84, %90 in 1 : vector<256x32xf32>, vector<256x32xf32>, vector<256x32xf32>, vector<256x32xf32> -> vector<256x128xf32>
    %92 = arith.mulf %66, %91 : vector<256x128xf32>
    %93 = arith.truncf %92 : vector<256x128xf32> to vector<256x128xbf16>
    %c0_27 = arith.constant 0 : index
    %c0_28 = arith.constant 0 : index
    %94 = vector.load %arg3[%c0_27, %c0_28] : memref<128x128xbf16, #tpu.memory_space<vmem>>, vector<128x128xbf16>
    %cst_29 = arith.constant dense<0.000000e+00> : vector<256x128xf32>
    %95 = tpu.matmul %93, %94, %cst_29 {dimension_numbers = #tpu.dot_dimension_numbers<[1], [0], [0], [1], [0, 0, 1, 1], [], []>} : vector<256x128xbf16>, vector<128x128xbf16>, vector<256x128xf32> -> vector<256x128xf32>
    %96 = arith.truncf %95 : vector<256x128xf32> to vector<256x128xbf16>
    %c0_30 = arith.constant 0 : index
    %c0_31 = arith.constant 0 : index
    %97 = vector.load %arg4[%c0_30, %c0_31] : memref<128x128xbf16, #tpu.memory_space<vmem>>, vector<128x128xbf16>
    %cst_32 = arith.constant dense<0.000000e+00> : vector<256x128xf32>
    %98 = tpu.matmul %96, %97, %cst_32 {dimension_numbers = #tpu.dot_dimension_numbers<[1], [0], [0], [1], [0, 0, 1, 1], [], []>} : vector<256x128xbf16>, vector<128x128xbf16>, vector<256x128xf32> -> vector<256x128xf32>
    %c0_33 = arith.constant 0 : index
    %c0_34 = arith.constant 0 : index
    %99 = vector.load %arg5[%c0_33, %c0_34] : memref<1x128xf32, #tpu.memory_space<vmem>>, vector<1x128xf32>
    %100 = vector.broadcast %99 : vector<1x128xf32> to vector<256x128xf32>
    %101 = arith.addf %98, %100 : vector<256x128xf32>
    %c0_35 = arith.constant 0 : index
    %c0_36 = arith.constant 0 : index
    %102 = vector.load %arg6[%c0_35, %c0_36] : memref<256x128xf32, #tpu.memory_space<vmem>>, vector<256x128xf32>
    tpu.vector_store %arg6[%c0_35, %c0_36], %101 {strides = array<i32>} : memref<256x128xf32, #tpu.memory_space<vmem>>, vector<256x128xf32>,
    return
  }
  func.func @transform_0(%arg0: i32) -> (i32, i32) {
    %c0_i32 = arith.constant 0 : i32
    %c0_i32_0 = arith.constant 0 : i32
    return %arg0, %c0_i32 : i32, i32
  }
  func.func @transform_1(%arg0: i32) -> (i32, i32) {
    %c0_i32 = arith.constant 0 : i32
    %c0_i32_0 = arith.constant 0 : i32
    %c0_i32_1 = arith.constant 0 : i32
    return %c0_i32, %c0_i32_0 : i32, i32
  }
  func.func @transform_2(%arg0: i32) -> (i32, i32) {
    %c0_i32 = arith.constant 0 : i32
    %c0_i32_0 = arith.constant 0 : i32
    %c0_i32_1 = arith.constant 0 : i32
    return %c0_i32, %c0_i32_0 : i32, i32
  }
  func.func @transform_3(%arg0: i32) -> (i32, i32) {
    %c0_i32 = arith.constant 0 : i32
    %c0_i32_0 = arith.constant 0 : i32
    %c0_i32_1 = arith.constant 0 : i32
    return %c0_i32, %c0_i32_0 : i32, i32
  }
  func.func @transform_4(%arg0: i32) -> (i32, i32) {
    %c0_i32 = arith.constant 0 : i32
    %c0_i32_0 = arith.constant 0 : i32
    %c0_i32_1 = arith.constant 0 : i32
    return %c0_i32, %c0_i32_0 : i32, i32
  }
  func.func @transform_5(%arg0: i32) -> (i32, i32) {
    %c0_i32 = arith.constant 0 : i32
    %c0_i32_0 = arith.constant 0 : i32
    return %arg0, %c0_i32 : i32, i32
  }
}

</mosaic_0001>

<bundles_post_ra>
// kernel: tpu_custom_call.1
= control target key start
LH: loop header
LB: loop body
LE: loop exit
PB: predicated region body
PF: predicated region fallthrough
CT: control target
= control target key end

     0   :  { %10 = vsyncpa [#allocation3], 0  ;;  %s7418_s0 = inlined_call_operand.hbm [shape: bf16[512,128], index: 0, kind: input, shape index: {}]   ;;  %s7419_s1 = inlined_call_operand.hbm [shape: bf16[128,128], index: 1, kind: input, shape index: {}]   ;;  %s7420_s2 = inlined_call_operand.hbm [shape: bf16[128,128], index: 2, kind: input, shape index: {}]   ;;  %s7421_s3 = inlined_call_operand.hbm [shape: bf16[128,128], index: 3, kind: input, shape index: {}]   ;;  %s7422_s4 = inlined_call_operand.vmem [shape: f32[1,128], index: 4, kind: input, shape index: {}]   ;;  %s7423_s5 = inlined_call_operand.hbm [shape: f32[512,128], index: 5, kind: output, shape index: {}]  }
   0x1   :  { %12 = vsyncpa [#allocation3 + $0x1], 0 }
   0x2   :  { %13 = vsyncpa [#allocation6], 0 }
   0x3   :  { %14 = vsyncpa [#allocation9], 0 }
   0x4   :  { %15 = vsyncpa [#allocation4], 0 }
   0x5   :  { %17 = vsyncpa [#allocation4 + $0x1], 0  ;;  %s4787_s18 = smov 0   ;;  %s4789_s19 = smov 0  }
   0x6   :  { %s4791_s20 = smov 0   ;;  %s4793_s21 = smov 0  }
   0x7 LB: > { %s4808_s22 = sadd.s32 4294967295, %s4742_s21   ;;  %s3686_s23 = sadd.s32 4294967294, %s4742_s21   ;;  %s4742_s21 = sphi %s4793_s21, %s7683_s21   ;;  %s4738_s20 = sphi %s4791_s20, %s7682_s20   ;;  %s4734_s19 = sphi %s4789_s19, %s7681_s19   ;;  %s4730_s18 = sphi %s4787_s18, %s7680_s18  }
   0x8   : > { %p43_p0 = scmp.ne.s32.totalorder %s4734_s19, %s4730_s18  ;;  %p7424_p1 = scmp.eq.s32.totalorder %s4808_s22, 0 }
   0x9   : > { %p157_p3 = scmp.eq.s32.totalorder %s3686_s23, 1  ;;  %p3687_p5 = scmp.ge.s32.totalorder %s4742_s21, 1 }
   0xa   : > { %p4817_p4 = por %p7424_p1, %p43_p0  ;;  %p164_p7 = scmp.lt.s32.totalorder %s4742_s21, 3 }
   0xb   : > { %p4822_p6 = por %p157_p3, %p43_p0  ;;  %s4744_s27 = smov [#allocation5]  }
   0xc   : > { %s7504_s24 = scalar_select %p4817_p4, 1, 0 }
   0xd   : > { %s7505_s25 = scalar_select %p4822_p6, 1, 0 }
   0xe   : > { %p4827_p8 = pnand %p3687_p5, %p164_p7  ;;  %s176_s28 = sshll.u32 %s4744_s27, 4  ;;  %s4831_s28 = int_to_ptr.vmem [resolvable:$true] %s176_s28 }
   0xf   : > { %s4745_s30 = smov [#allocation7]   ;;  %s4746_s7 = smov [#allocation8]  }
  0x10   : > { %s7506_s26 = scalar_select %p4827_p8, 1, 0 }
  0x11   : > { %p3997_p9 = pneg %p4827_p8  ;;  %s189_s6 = sshll.u32 %s4745_s30, 4  ;;  %s4842_s6 = int_to_ptr.vmem [resolvable:$true] %s189_s6 }
  0x12   : > { %s4844_s8 = sshll.u32 %s4746_s7, 4  ;;  %s4554_s11 = scalar_lea.hbm %s7419_s1, 1024  ;;  %s203_s8 = int_to_ptr.vmem [resolvable:$true] %s4844_s8 }
  0x13   : > { %p4838_p11 = pnand %p3997_p9, %p7424_p1  ;;  %p4555_p12 = scmp.ne.s32.totalorder %s7419_s1, %s4554_s11 }
  0x14   : > { %p4561_p5 = scmp.lt.u32.totalorder %s4554_s11, %s7419_s1 }
  0x15   : > { %p4854_p13 = pneg %p4838_p11 }
  0x17   : > { %p4557_p0 = pnand %p4854_p13, %p4555_p12 }
  0x19   : > { %p4558_p3 = pneg %p4557_p0 }
  0x1b   : > { %p4563_p7 = pnand %p4561_p5, %p4558_p3 }
  0x1d   : > { %4566 = shalt.err (!%p4563_p7)
}
  0x1e   : > { %s4567_s17 = scalar_lea.vmem %s4831_s28, 1024  ;;  %p4575_p2 = scmp.lt.s32.totalorder %s4831_s28, %s4831_s28 }
  0x1f   : > { %p4568_p9 = scmp.ne.s32.totalorder %s4831_s28, %s4567_s17  ;;  %p4576_p6 = scmp.lt.s32.totalorder %s4567_s17, %s4567_s17 }
  0x21   : > { %p4570_p10 = pnand %p4568_p9, %p4854_p13  ;;  %p4577_p12 = por %p4576_p6, %p4575_p2 }
  0x23   : > { %p4571_p1 = pneg %p4570_p10 }
  0x25   : > { %p4578_p0 = pnand %p4577_p12, %p4571_p1 }
  0x27   : > { %4581 = shalt.err (!%p4578_p0)
}
  0x28   : > { %s4747_s23 = smov 64   ;;  %s4748_s27 = smov 4  }
  0x29   : > { %4000 = dma.hbm_to_vmem [thread:$0]  (!%p4838_p11), %s7419_s1, 1024, %s4831_s28, [#allocation6], %s4747_s23, %s4747_s23, %s4748_s27  }
  0x2a   : > { %s4582_s11 = scalar_lea.hbm %s7420_s2, 1024 }
  0x2b   : > { %p4583_p1 = scmp.ne.s32.totalorder %s7420_s2, %s4582_s11  ;;  %p4589_p10 = scmp.lt.u32.totalorder %s4582_s11, %s7420_s2 }
  0x2d   : > { %p4585_p2 = pnand %p4583_p1, %p4854_p13 }
  0x2f   : > { %p4586_p6 = pneg %p4585_p2 }
  0x31   : > { %p4591_p3 = pnand %p4589_p10, %p4586_p6 }
  0x33   : > { %4594 = shalt.err (!%p4591_p3)
}
  0x34   : > { %s4595_s28 = scalar_lea.vmem %s4842_s6, 1024  ;;  %p4603_p12 = scmp.lt.s32.totalorder %s4842_s6, %s4842_s6 }
  0x35   : > { %p4596_p5 = scmp.ne.s32.totalorder %s4842_s6, %s4595_s28  ;;  %p4604_p0 = scmp.lt.s32.totalorder %s4595_s28, %s4595_s28 }
  0x37   : > { %p4598_p7 = pnand %p4596_p5, %p4854_p13  ;;  %p4605_p1 = por %p4604_p0, %p4603_p12 }
  0x39   : > { %p4599_p9 = pneg %p4598_p7 }
  0x3b   : > { %p4606_p2 = pnand %p4605_p1, %p4599_p9 }
  0x3d   : > { %4609 = shalt.err (!%p4606_p2)
}
  0x3e   : > { %4003 = dma.hbm_to_vmem [thread:$0]  (!%p4838_p11), %s7420_s2, 1024, %s4842_s6, [#allocation6], %s4747_s23, %s4747_s23, %s4748_s27  }
  0x3f   : > { %s4610_s10 = scalar_lea.hbm %s7421_s3, 1024 }
  0x40   : > { %p4611_p6 = scmp.ne.s32.totalorder %s7421_s3, %s4610_s10  ;;  %p4617_p5 = scmp.lt.u32.totalorder %s4610_s10, %s7421_s3 }
  0x42   : > { %p4613_p10 = pnand %p4611_p6, %p4854_p13 }
  0x44   : > { %p4614_p3 = pneg %p4613_p10 }
  0x46   : > { %p4619_p7 = pnand %p4617_p5, %p4614_p3 }
  0x48   : > { %4622 = shalt.err (!%p4619_p7)
}
  0x49   : > { %s4623_s16 = scalar_lea.vmem %s203_s8, 1024  ;;  %p4631_p1 = scmp.lt.s32.totalorder %s203_s8, %s203_s8 }
  0x4a   : > { %p4624_p9 = scmp.ne.s32.totalorder %s203_s8, %s4623_s16  ;;  %p4632_p2 = scmp.lt.s32.totalorder %s4623_s16, %s4623_s16 }
  0x4c   : > { %p4626_p12 = pnand %p4624_p9, %p4854_p13  ;;  %p4633_p4 = por %p4632_p2, %p4631_p1 }
  0x4e   : > { %p4627_p0 = pneg %p4626_p12 }
  0x50   : > { %p4634_p8 = pnand %p4633_p4, %p4627_p0 }
  0x52   : > { %4637 = shalt.err (!%p4634_p8)
}
  0x53   : > { %4006 = dma.hbm_to_vmem [thread:$0]  (!%p4838_p11), %s7421_s3, 1024, %s203_s8, [#allocation9], %s4747_s23, %s4747_s23, %s4748_s27  }
  0x54   : > { %s4927_s14 = sadd.s32 1, %s4742_s21   ;;  %s30_s17 = sadd.s32 1, %s4738_s20 }
  0x55   : > { %s27_s29 = ssub.s32 %s4742_s21, %s4927_s14  ;;  %p37_p8 = scmp.ne.s32.totalorder %s4738_s20, %s4734_s19 }
  0x56   : > { %p28_p4 = scmp.eq.s32.totalorder %s27_s29, 0  ;;  %p38_p13 = scmp.eq.s32.totalorder %s4742_s21, 0 }
  0x57   : > { %p4018_p6 = scmp.lt.s32.totalorder %s4742_s21, 2  ;;  %p7509_p3 = scmp.eq.s32.totalorder %s4808_s22, 1 }
  0x58   : > { %s4937_s30 = scalar_select %p28_p4, %s4738_s20, %s30_s17  }
  0x59   : > { %p39_p10 = por %p38_p13, %p37_p8  ;;  %p4941_p5 = por %p7509_p3, %p37_p8 }
  0x5a   : > { %s219_s9 = sand.u32 1, %s4738_s20   ;;  %s3747_s10 = sshll.u32 %s4742_s21, 11 }
  0x5b   : > { %s3692_s8 = sshll.u32 %s219_s9, 7  ;;  %s4950_s13 = scalar_lea.hbm %s7418_s0, %s3747_s10 }
  0x5c   : > { %s223_s15 = scalar_lea.vmem [#allocation2], %s3692_s8  ;;  %p4952_p11 = pnand %p4018_p6, %p39_p10 }
  0x5d   : > { %s230_s16 = sshll.u32 %s223_s15, 4  ;;  %s4958_s28 = scalar_lea.sflag [#allocation3], %s219_s9  ;;  %s4956_s16 = int_to_ptr.vmem [resolvable:$true] %s230_s16 }
  0x5e   : > { %s4638_s29 = scalar_lea.hbm %s4950_s13, 2048  ;;  %p4640_p9 = pneg %p4952_p11 }
  0x5f   : > { %p4639_p7 = scmp.ne.s32.totalorder %s4950_s13, %s4638_s29  ;;  %s4643_s8 = scalar_lea.hbm %s7418_s0, 4096 }
  0x60   : > { %p4644_p1 = scmp.lt.u32.totalorder %s4950_s13, %s7418_s0  ;;  %p4645_p2 = scmp.lt.u32.totalorder %s4643_s8, %s4638_s29 }
  0x61   : > { %p4641_p12 = pnand %p4640_p9, %p4639_p7  ;;  %p4647_p8 = scmp.lt.u32.totalorder %s4638_s29, %s4950_s13 }
  0x62   : > { %p4646_p4 = por %p4645_p2, %p4644_p1 }
  0x63   : > { %p4642_p0 = pneg %p4641_p12 }
  0x64   : > { %p4648_p13 = por %p4647_p8, %p4646_p4 }
  0x66   : > { %p4649_p6 = pnand %p4648_p13, %p4642_p0 }
  0x68   : > { %4652 = shalt.err (!%p4649_p6)
}
  0x69   : > { %s4653_s9 = scalar_lea.vmem %s4956_s16, 2048  ;;  %s4749_s15 = smov [#allocation2]  }
  0x6a   : > { %p4654_p10 = scmp.ne.s32.totalorder %s4956_s16, %s4653_s9  ;;  %s4658_s17 = sshll.u32 %s4749_s15, 4  ;;  %s4659_s17 = int_to_ptr.vmem [resolvable:$false] %s4658_s17 }
  0x6b   : > { %s4660_s10 = scalar_lea.vmem %s4659_s17, 4096  ;;  %p4661_p12 = scmp.lt.s32.totalorder %s4956_s16, %s4659_s17 }
  0x6c   : > { %p4656_p3 = pnand %p4654_p10, %p4640_p9  ;;  %p4662_p1 = scmp.lt.s32.totalorder %s4660_s10, %s4653_s9 }
  0x6e   : > { %p4657_p7 = pneg %p4656_p3  ;;  %p4663_p2 = por %p4662_p1, %p4661_p12 }
  0x70   : > { %p4664_p4 = pnand %p4663_p2, %p4657_p7 }
  0x72   : > { %4667 = shalt.err (!%p4664_p4)
}
  0x73   : > { %4010 = dma.hbm_to_vmem [thread:$0]  (!%p4952_p11), %s4950_s13, 2048, %s4956_s16, %s4958_s28, %s4747_s23, %s4747_s23, %s4748_s27  }
  0x74   : > { %p7512_p9 = scmp.ne.s32.totalorder %s7506_s26, 0 }
  0x76   : > { %242 = sbr.rel (%p7512_p9) target bundleno = 1846 (0x736), region = 40 }
  0x7d   : > { %s4992_s29 = sand.u32 1, %s4734_s19   ;;  %p7513_p0 = scmp.ne.s32.totalorder %s7504_s24, 0 }
  0x7e   : > { %s3696_s8 = sshll.u32 %s4992_s29, 7  ;;  %s245_s11 = scalar_lea.sflag [#allocation3], %s4992_s29 }
  0x7f   : > { %s4996_s12 = scalar_lea.vmem [#allocation2], %s3696_s8 }
  0x80   : > { %4713 = dma.done.wait (%p7513_p0), %s245_s11, 2048  }
  0x81   : > { %4715 = vsyncadd (%p7513_p0), %s245_s11, 4294965248  ;;  %p7514_p11 = scmp.eq.s32.totalorder %s4808_s22, 0 }
  0x83   : > { %4717 = dma.done.wait (%p7514_p11), [#allocation6], 2048   ;;  %p7515_p8 = pmov %p7514_p11 }
  0x85   : > { %4719 = vsyncadd (%p7515_p8), [#allocation6], 4294965248  ;;  %p7516_p13 = pmov %p7515_p8 }
  0x86   : > { %p7517_p6 = pmov %p7515_p8 }
  0x87   : > { %4721 = dma.done.wait (%p7516_p13), [#allocation9], 1024  }
  0x88   : > { %4723 = vsyncadd (%p7517_p6), [#allocation9], 4294966272  ;;  %v4066_v0 = vld [vmem:[#allocation5] sm:$0xff]   ;;  %v4067_v1 = vld [vmem:[#allocation5 + $0x8] sm:$0xff]   ;;  %vm1507_vm4 = vcmask 261120   ;;  %vm1604_vm6 = vcmask 523520  }
  0x89   : > { %3821 = vmatprep.subr.bf16.mxu0 %v4066_v0  ;;  %3965 = vmatprep.subr.bf16.mxu1 %v4066_v0  ;;  %v4068_v2 = vld [vmem:[#allocation5 + $0x10] sm:$0xff]   ;;  %v4069_v3 = vld [vmem:[#allocation5 + $0x18] sm:$0xff]   ;;  %v4074_v4 = vld [vmem:[%s4996_s12] sm:$0xff]   ;;  %vm1701_vm7 = vcmask 785920   ;;  %vm1798_vm9 = vcmask 1048320   ;;  %s4751_s24 = smov 96  }
  0x8a   : > { %3822 = vmatpush3.bf16.msra.mxu0 %v4066_v0  ;;  %3973 = vmatpush3.bf16.msra.mxu1 %v4066_v0  ;;  %v4075_v5 = vld [vmem:[%s4996_s12 + $0x40] sm:$0xff]   ;;  %v4071_v7 = vld [vmem:[#allocation5 + $0x28] sm:$0xff]   ;;  %v4072_v8 = vld [vmem:[#allocation5 + $0x30] sm:$0xff]   ;;  %s4752_s26 = smov 64   ;;  %s4753_s23 = smov 32  }
  0x8b   : > { %3823 = vmatprep.subr.bf16.mxu0 %v4067_v1  ;;  %3966 = vmatprep.subr.bf16.mxu1 %v4067_v1  ;;  %v4070_v6 = vld [vmem:[#allocation5 + $0x20] sm:$0xff]   ;;  %v4073_v9 = vld [vmem:[#allocation5 + $0x38] sm:$0xff]   ;;  %v4076_v10 = vld [vmem:[%s4996_s12 + $0x8] sm:$0xff]   ;;  %s3700_s27 = sshll.u32 %s4992_s29, 8  ;;  %s3748_s28 = sshll.u32 %s4808_s22, 12 }
  0x8c   : > { %3837 = vmatprep.mubr.bf16.mxu0 %v4074_v4  ;;  %3853 = vmatprep.mubr.bf16.mxu1 %v4075_v5  ;;  %v4077_v11 = vld [vmem:[%s4996_s12 + $0x48] sm:$0xff]   ;;  %v4078_v12 = vld [vmem:[%s4996_s12 + $0x10] sm:$0xff]   ;;  %v4079_v14 = vld [vmem:[%s4996_s12 + $0x18] sm:$0xff]   ;;  %s7303_s6 = scalar_lea.vmem [#allocation10], %s3700_s27  ;;  %s7368_s10 = scalar_lea.hbm %s7423_s5, %s3748_s28 }
  0x8d   : > { %v4080_v13 = vld [vmem:[%s4996_s12 + $0x50] sm:$0xff]   ;;  %v4081_v15 = vld [vmem:[%s4996_s12 + $0x58] sm:$0xff]   ;;  %v4082_v16 = vld [vmem:[%s4996_s12 + $0x20] sm:$0xff]   ;;  %s3584_s9 = sshll.u32 %s7303_s6, 4  ;;  %s3571_s22 = scalar_lea.sflag [#allocation4], %s4992_s29  ;;  %s7370_s9 = int_to_ptr.vmem [resolvable:$true] %s3584_s9 }
  0x8e   : > { %3824 = vmatpush3.bf16.msra.mxu0 %v4067_v1  ;;  %3974 = vmatpush3.bf16.msra.mxu1 %v4067_v1  ;;  %v4084_v17 = vld [vmem:[%s4996_s12 + $0x60] sm:$0xff]   ;;  %v4083_v18 = vld [vmem:[%s4996_s12 + $0x28] sm:$0xff]   ;;  %v4086_v20 = vld [vmem:[%s4996_s12 + $0x30] sm:$0xff]   ;;  %s4668_s8 = scalar_lea.vmem %s7370_s9, 4096  ;;  %s4754_s11 = smov [#allocation10]  }
  0x8f   : > { %3825 = vmatprep.subr.bf16.mxu0 %v4068_v2  ;;  %3967 = vmatprep.subr.bf16.mxu1 %v4068_v2  ;;  %v4085_v19 = vld [vmem:[%s4996_s12 + $0x68] sm:$0xff]   ;;  %v4088_v21 = vld [vmem:[%s4996_s12 + $0x70] sm:$0xff]   ;;  %v4087_v22 = vld [vmem:[%s4996_s12 + $0x38] sm:$0xff]   ;;  %p4669_p10 = scmp.ne.s32.totalorder %s7370_s9, %s4668_s8 }
  0x90   : > { %v4089_v23 = vld [vmem:[%s4996_s12 + $0x78] sm:$0xff]   ;;  %s4672_s12 = sshll.u32 %s4754_s11, 4  ;;  %s4673_s12 = int_to_ptr.vmem [resolvable:$false] %s4672_s12 }
  0x91   : > { %p4670_p3 = pnand %p4669_p10, %p4941_p5  ;;  %p4675_p12 = scmp.lt.s32.totalorder %s7370_s9, %s4673_s12 }
  0x92   : > { %3826 = vmatpush3.bf16.msra.mxu0 %v4068_v2  ;;  %3975 = vmatpush3.bf16.msra.mxu1 %v4068_v2 }
  0x93   : > { %3827 = vmatprep.subr.bf16.mxu0 %v4069_v3  ;;  %3968 = vmatprep.subr.bf16.mxu1 %v4069_v3  ;;  %p4671_p7 = pneg %p4670_p3 }
  0x96   : > { %3828 = vmatpush3.bf16.msra.mxu0 %v4069_v3  ;;  %3976 = vmatpush3.bf16.msra.mxu1 %v4069_v3 }
  0x97   : > { %3829 = vmatprep.subr.bf16.mxu0 %v4070_v6  ;;  %3969 = vmatprep.subr.bf16.mxu1 %v4070_v6 }
  0x9a   : > { %3830 = vmatpush3.bf16.msra.mxu0 %v4070_v6  ;;  %3977 = vmatpush3.bf16.msra.mxu1 %v4070_v6 }
  0x9b   : > { %3831 = vmatprep.subr.bf16.mxu0 %v4071_v7  ;;  %3970 = vmatprep.subr.bf16.mxu1 %v4071_v7 }
  0x9e   : > { %3832 = vmatpush3.bf16.msra.mxu0 %v4071_v7  ;;  %3978 = vmatpush3.bf16.msra.mxu1 %v4071_v7 }
  0x9f   : > { %3833 = vmatprep.subr.bf16.mxu0 %v4072_v8  ;;  %3971 = vmatprep.subr.bf16.mxu1 %v4072_v8 }
  0xa2   : > { %3834 = vmatpush3.bf16.msra.mxu0 %v4072_v8  ;;  %3979 = vmatpush3.bf16.msra.mxu1 %v4072_v8 }
  0xa3   : > { %3835 = vmatprep.subr.bf16.mxu0 %v4073_v9  ;;  %3972 = vmatprep.subr.bf16.mxu1 %v4073_v9 }
  0xa6   : > { %3836 = vmatpush3.bf16.msra.mxu0 %v4073_v9  ;;  %3980 = vmatpush3.bf16.msra.mxu1 %v4073_v9 }
  0xa9   : > { %3838 = vmatmul.mubr.bf16.vlgmr.msra.gmra.mrb[0].mxu0 %v4076_v10  ;;  %3854 = vmatmul.mubr.bf16.vlgmr.msra.gmra.mrb[0].mxu1 %v4077_v11 }
  0xaa   : > { %3841 = vmatprep.mubr.bf16.mxu0 %v4078_v12  ;;  %3857 = vmatprep.mubr.bf16.mxu1 %v4080_v13 }
  0xb1   : > { %3842 = vmatmul.mubr.bf16.gmra.mrb[4].mxu0 %v4079_v14  ;;  %3858 = vmatmul.mubr.bf16.gmra.mrb[4].mxu1 %v4081_v15 }
  0xb2   : > { %3845 = vmatprep.mubr.bf16.mxu0 %v4082_v16  ;;  %3861 = vmatprep.mubr.bf16.mxu1 %v4084_v17 }
  0xb9   : > { %3846 = vmatmul.mubr.bf16.gmra.mrb[8].mxu0 %v4083_v18  ;;  %3862 = vmatmul.mubr.bf16.gmra.mrb[8].mxu1 %v4085_v19 }
  0xba   : > { %3849 = vmatprep.mubr.bf16.mxu0 %v4086_v20  ;;  %3865 = vmatprep.mubr.bf16.mxu1 %v4088_v21 }
  0xc1   : > { %3850 = vmatmul.mubr.bf16.gmra.mrb[12].mxu0 %v4087_v22  ;;  %3866 = vmatmul.mubr.bf16.gmra.mrb[12].mxu1 %v4089_v23 }
 0x17c   : > { %v5026_v24 = vpop.f32.mrb[0].mxu0  ;;  %v5028_v25 = vpop.f32.mrb[0].mxu1 }
 0x17d   : > { %v5031_v26 = vmul.f32 0.70710677, %v5026_v24  ;;  %v5034_v27 = vmul.f32 0.70710677, %v5028_v25  ;;  %v5036_v28 = vpop.f32.mrb[1].mxu0  ;;  %v5038_v29 = vpop.f32.mrb[1].mxu1 }
 0x17e   : > { %v5047_v32 = vmul.f32 0.70710677, %v5036_v28  ;;  %v5049_v33 = vpop.f32.mrb[2].mxu0  ;;  %v5057_v37 = vmul.f32 0.70710677, %v5038_v29  ;;  %v5059_v39 = vpop.f32.mrb[2].mxu1 }
 0x17f   : > { %v5041_v30 = vand.u32 2147483647, %v5031_v26  ;;  %v5044_v31 = vand.u32 2147483647, %v5034_v27  ;;  %v5061_v40 = vpop.f32.mrb[3].mxu0  ;;  %v5063_v41 = vpop.f32.mrb[3].mxu1 }
 0x180   : > { %v5054_v36 = vand.u32 2147483647, %v5047_v32  ;;  %v5069_v45 = vand.u32 2147483647, %v5057_v37  ;;  %v5076_v48 = vmul.f32 0.70710677, %v5049_v33 }
 0x181   : > { %v805_v34 = vmul.f32 0.3275911, %v5041_v30  ;;  %v821_v35 = vmul.f32 0.3275911, %v5044_v31  ;;  %v5103_v1 = vmul.f32 0.70710677, %v5059_v39 }
 0x182   : > { %v803_v44 = vmul.f32 0.3275911, %v5054_v36  ;;  %v819_v54 = vmul.f32 0.3275911, %v5069_v45  ;;  %v5088_v55 = vand.u32 2147483647, %v5076_v48 }
 0x183   : > { %v853_v38 = vadd.f32 1.0, %v821_v35  ;;  %v837_v42 = vadd.f32 1.0, %v805_v34  ;;  %v5117_v9 = vand.u32 2147483647, %v5103_v1  ;;  %v5129_v17 = vmul.f32 0.70710677, %v5061_v40 }
 0x184   : > { %v5065_v43 = vpop.f32.mrb[4].mxu0  ;;  %v5073_v47 = vpop.f32.mrb[4].mxu1  ;;  %v835_v53 = vadd.f32 1.0, %v803_v44  ;;  %v851_v59 = vadd.f32 1.0, %v819_v54  ;;  %v806_v60 = vmul.f32 0.3275911, %v5088_v55 }
 0x185   : > { %4106 = vrcp.f32 %v853_v38  ;;  %v5071_v46 = vpop.f32.mrb[5].mxu0  ;;  %v5080_v50 = vpop.f32.mrb[5].mxu1  ;;  %v822_v14 = vmul.f32 0.3275911, %v5117_v9  ;;  %v1237_v21 = vsub.f32 0.0, %v5044_v31  ;;  %vm725_vm0 = vcmp.ge.f32.partialorder %v5034_v27, 0.0 }
 0x186   : > { %v5078_v49 = vpop.f32.mrb[6].mxu0  ;;  %4108 = vrcp.f32 %v837_v42  ;;  %v5084_v52 = vpop.f32.mrb[6].mxu1  ;;  %v838_v0 = vadd.f32 1.0, %v806_v60  ;;  %v5137_v35 = vand.u32 2147483647, %v5129_v17  ;;  %v1221_v42 = vsub.f32 0.0, %v5041_v30 }
 0x187   : > { %v5082_v51 = vpop.f32.mrb[7].mxu0  ;;  %v5090_v56 = vpop.f32.mrb[7].mxu1  ;;  %4110 = vrcp.f32 %v835_v53  ;;  %v854_v20 = vadd.f32 1.0, %v822_v14  ;;  %v1269_v53 = vmul.f32 %v1237_v21, %v5044_v31  ;;  %vm709_vm1 = vcmp.ge.f32.partialorder %v5031_v26, 0.0 }
 0x188   : > { %7518 = vst [vmem:[#allocation15_spill] sm:$0xff] %v5090_v56  ;;  %4112 = vrcp.f32 %v851_v59  ;;  %vm707_vm2 = vcmp.ge.f32.partialorder %v5047_v32, 0.0  ;;  %vm723_vm3 = vcmp.ge.f32.partialorder %v5057_v37, 0.0  ;;  %v5202_v37 = vmul.f32 0.70710677, %v5065_v43 }
 0x189   : > { %4114 = vrcp.f32 %v838_v0  ;;  %vm710_vm5 = vcmp.ge.f32.partialorder %v5076_v48, 0.0  ;;  %v643_v48 = vmul.f32 0.5, %v5036_v28  ;;  %v5224_v28 = vmul.f32 0.70710677, %v5073_v47 }
 0x18a   : > { %4116 = vrcp.f32 %v854_v20  ;;  %vm726_vm8 = vcmp.ge.f32.partialorder %v5103_v1, 0.0  ;;  %vm708_vm10 = vcmp.ge.f32.partialorder %v5129_v17, 0.0  ;;  %vm713_vm12 = vcmp.ge.f32.partialorder %v5202_v37, 0.0 }
 0x18b   : > { %vm729_vm14 = vcmp.ge.f32.partialorder %v5224_v28, 0.0 }
 0x18c   : > { %v5092_v57 = vpop.f32.mrb[8].mxu0  ;;  %v5109_v4 = vpop.f32.mrb[8].mxu1 }
 0x18d   : > { %v5094_v58 = vpop.f32.mrb[9].mxu0  ;;  %v5111_v5 = vpop.f32.mrb[9].mxu1 }
 0x18e   : > { %v5097_v61 = vpop.f32.mrb[10].mxu0  ;;  %v5113_v6 = vpop.f32.mrb[10].mxu1 }
 0x18f   : > { %v5099_v62 = vpop.eup %4106  ;;  %v5105_v2 = vpop.f32.mrb[11].mxu0 }
 0x190   : > { %v949_v63 = vmul.f32 1.0614054, %v5099_v62  ;;  %v5107_v3 = vpop.eup %4108  ;;  %v5119_v10 = vpop.f32.mrb[11].mxu1 }
 0x191   : > { %v933_v7 = vmul.f32 1.0614054, %v5107_v3  ;;  %v5121_v11 = vpop.eup %4110 }
 0x192   : > { %v981_v8 = vadd.f32 -1.4531521, %v949_v63  ;;  %v931_v15 = vmul.f32 1.0614054, %v5121_v11  ;;  %v5126_v16 = vpop.eup %4112  ;;  %v804_v63 = vmul.f32 0.3275911, %v5137_v35 }
 0x193   : > { %v965_v12 = vadd.f32 -1.4531521, %v933_v7  ;;  %v947_v23 = vmul.f32 1.0614054, %v5126_v16  ;;  %v5134_v34 = vpop.eup %4114  ;;  %v1253_v7 = vmul.f32 %v1221_v42, %v5041_v30 }
 0x194   : > { %v1013_v13 = vmul.f32 %v5099_v62, %v981_v8  ;;  %v963_v22 = vadd.f32 -1.4531521, %v931_v15  ;;  %v934_v60 = vmul.f32 1.0614054, %v5134_v34  ;;  %v836_v31 = vadd.f32 1.0, %v804_v63  ;;  %v5152_v30 = vpop.eup %4116 }
 0x195   : > { %v997_v18 = vmul.f32 %v5107_v3, %v965_v12  ;;  %v979_v59 = vadd.f32 -1.4531521, %v947_v23  ;;  %v1319_v12 = vmul.f32 1.442695, %v1269_v53  ;;  %v1287_v20 = vmul.f32 1.442695, %v1253_v7 }
 0x196   : > { %v1045_v19 = vadd.f32 1.4214138, %v1013_v13  ;;  %v995_v54 = vmul.f32 %v5121_v11, %v963_v22  ;;  %v966_v15 = vadd.f32 -1.4531521, %v934_v60 }
 0x197   : > { %v1029_v38 = vadd.f32 1.4214138, %v997_v18  ;;  %v1011_v14 = vmul.f32 %v5126_v16, %v979_v59  ;;  %v1219_v18 = vsub.f32 0.0, %v5054_v36  ;;  %4118 = vpow2.f32 %v1319_v12 }
 0x198   : > { %v1077_v44 = vmul.f32 %v5099_v62, %v1045_v19  ;;  %v1027_v13 = vadd.f32 1.4214138, %v995_v54  ;;  %4120 = vrcp.f32 %v836_v31  ;;  %v1222_v12 = vsub.f32 0.0, %v5088_v55 }
 0x199   : > { %v1061_v0 = vmul.f32 %v5107_v3, %v1029_v38  ;;  %v1043_v23 = vadd.f32 1.4214138, %v1011_v14  ;;  %v998_v38 = vmul.f32 %v5134_v34, %v966_v15  ;;  %v1251_v42 = vmul.f32 %v1219_v18, %v5054_v36 }
 0x19a   : > { %v1109_v8 = vadd.f32 -0.28449672, %v1077_v44  ;;  %v1059_v22 = vmul.f32 %v5121_v11, %v1027_v13  ;;  %v1235_v44 = vsub.f32 0.0, %v5069_v45  ;;  %4122 = vpow2.f32 %v1287_v20 }
 0x19b   : > { %v1093_v19 = vadd.f32 -0.28449672, %v1061_v0  ;;  %v1075_v60 = vmul.f32 %v5126_v16, %v1043_v23  ;;  %v1030_v63 = vadd.f32 1.4214138, %v998_v38  ;;  %v950_v0 = vmul.f32 1.0614054, %v5152_v30 }
 0x19c   : > { %v1141_v21 = vmul.f32 %v5099_v62, %v1109_v8  ;;  %v1091_v59 = vadd.f32 -0.28449672, %v1059_v22  ;;  %v1283_v7 = vmul.f32 1.442695, %v1251_v42  ;;  %v1267_v8 = vmul.f32 %v1235_v44, %v5069_v45 }
 0x19d   : > { %v1125_v53 = vmul.f32 %v5107_v3, %v1093_v19  ;;  %v1107_v15 = vadd.f32 -0.28449672, %v1075_v60  ;;  %v1062_v18 = vmul.f32 %v5134_v34, %v1030_v63  ;;  %v982_v31 = vadd.f32 -1.4531521, %v950_v0 }
 0x19e   : > { %v1173_v54 = vadd.f32 0.2548296, %v1141_v21  ;;  %v1123_v14 = vmul.f32 %v5121_v11, %v1091_v59  ;;  %4124 = vpow2.f32 %v1283_v7  ;;  %v1315_v19 = vmul.f32 1.442695, %v1267_v8 }
 0x19f   : > { %v1157_v13 = vadd.f32 0.2548296, %v1125_v53  ;;  %v1254_v20 = vmul.f32 %v1222_v12, %v5088_v55  ;;  %v1139_v42 = vmul.f32 %v5126_v16, %v1107_v15  ;;  %v1014_v44 = vmul.f32 %v5152_v30, %v982_v31 }
 0x1a0   : > { %v1205_v36 = vmul.f32 %v5099_v62, %v1173_v54  ;;  %v1155_v38 = vadd.f32 0.2548296, %v1123_v14  ;;  %v1094_v62 = vadd.f32 -0.28449672, %v1062_v18  ;;  %4126 = vpow2.f32 %v1315_v19 }
 0x1a1   : > { %v4119_v21 = vpop.eup %4118  ;;  %v1189_v22 = vmul.f32 %v5107_v3, %v1157_v13  ;;  %v1289_v54 = vmul.f32 1.442695, %v1254_v20  ;;  %v1171_v63 = vadd.f32 0.2548296, %v1139_v42  ;;  %v1046_v7 = vadd.f32 1.4214138, %v1014_v44 }
 0x1a2   : > { %v1365_v23 = vmul.f32 %v4119_v21, %v1205_v36  ;;  %v5166_v45 = vpop.eup %4120  ;;  %v1187_v3 = vmul.f32 %v5121_v11, %v1155_v38  ;;  %v1126_v0 = vmul.f32 %v5134_v34, %v1094_v62  ;;  %v1238_v8 = vsub.f32 0.0, %v5117_v9  ;;  %v5189_v44 = vpop.f32.mrb[12].mxu0 }
 0x1a3   : > { %v932_v55 = vmul.f32 1.0614054, %v5166_v45  ;;  %4128 = vpow2.f32 %v1289_v54  ;;  %v7427_v12 = vmov -1.0   ;;  %v5177_v36 = vmul.f32 0.70710677, %v5063_v41  ;;  %7519 = vst [vmem:[#allocation16_spill] sm:$0xff] %v5189_v44 }
 0x1a4   : > { %v4123_v53 = vpop.eup %4122  ;;  %v1397_v60 = vsub.f32 1.0, %v1365_v23  ;;  %v757_v13 = vsel %vm725_vm0, 1.0, %v7427_v12  ;;  %v1203_v31 = vmul.f32 %v5126_v16, %v1171_v63  ;;  %v1158_v19 = vadd.f32 0.2548296, %v1126_v0 }
 0x1a5   : > { %v1349_v59 = vmul.f32 %v4123_v53, %v1189_v22  ;;  %v964_v18 = vadd.f32 -1.4531521, %v932_v55  ;;  %v1078_v20 = vmul.f32 %v5152_v30, %v1046_v7  ;;  %v1270_v21 = vmul.f32 %v1238_v8, %v5117_v9 }
 0x1a6   : > { %v1429_v15 = vmul.f32 %v1397_v60, %v757_v13  ;;  %v741_v22 = vsel %vm709_vm1, 1.0, %v7427_v12  ;;  %v5185_v23 = vand.u32 2147483647, %v5177_v36  ;;  %v1190_v54 = vmul.f32 %v5134_v34, %v1158_v19 }
 0x1a7   : > { %v1381_v27 = vsub.f32 1.0, %v1349_v59  ;;  %v996_v26 = vmul.f32 %v5166_v45, %v964_v18  ;;  %v1110_v59 = vadd.f32 -0.28449672, %v1078_v20  ;;  %v661_v9 = vmul.f32 0.5, %v5028_v25 }
 0x1a8   : > { %v4125_v14 = vpop.eup %4124  ;;  %v1461_v62 = vadd.f32 1.0, %v1429_v15  ;;  %v1321_v60 = vmul.f32 1.442695, %v1270_v21  ;;  %v739_v55 = vsel %vm707_vm2, 1.0, %v7427_v12  ;;  %v1220_v8 = vsub.f32 0.0, %v5137_v35 }
 0x1a9   : > { %v1347_v11 = vmul.f32 %v4125_v14, %v1187_v3  ;;  %v1413_v42 = vmul.f32 %v1381_v27, %v741_v22  ;;  %v820_v3 = vmul.f32 0.3275911, %v5185_v23  ;;  %v1028_v7 = vadd.f32 1.4214138, %v996_v26 }
 0x1aa   : > { %v4127_v38 = vpop.eup %4126  ;;  %v5196_v0 = vmul.f32 %v1461_v62, %v661_v9  ;;  %v1142_v25 = vmul.f32 %v5152_v30, %v1110_v59  ;;  %v645_v27 = vmul.f32 0.5, %v5026_v24  ;;  %4130 = vpow2.f32 %v1321_v60 }
 0x1ab   : > { %v1379_v16 = vsub.f32 1.0, %v1347_v11  ;;  %v1363_v53 = vmul.f32 %v4127_v38, %v1203_v31  ;;  %v1445_v63 = vadd.f32 1.0, %v1413_v42  ;;  %v755_v15 = vsel %vm723_vm3, 1.0, %v7427_v12 }
 0x1ac   : > { %7520 = vst [vmem:[#allocation17_spill] sm:$0xff] %v5196_v0  ;;  %v852_v18 = vadd.f32 1.0, %v820_v3  ;;  %v1060_v31 = vmul.f32 %v5166_v45, %v1028_v7  ;;  %v1252_v19 = vmul.f32 %v1220_v8, %v5137_v35  ;;  %v1562_v20 = vsel %vm1507_vm4, %v5196_v0, -inf }
 0x1ad   : > { %v4129_v32 = vpop.eup %4128  ;;  %v1411_v13 = vmul.f32 %v1379_v16, %v739_v55  ;;  %v1395_v34 = vsub.f32 1.0, %v1363_v53  ;;  %v5206_v11 = vmul.f32 %v1445_v63, %v645_v27  ;;  %v1174_v38 = vadd.f32 0.2548296, %v1142_v25  ;;  %1563 = vmax.xlane.f32.xlu0 %v1562_v20  ;;  %v5226_v55 = vpop.f32.mrb[13].mxu0 }
 0x1ae   : > { %v1350_v14 = vmul.f32 %v4129_v32, %v1190_v54  ;;  %v5213_v42 = vand.u32 2147483647, %v5202_v37  ;;  %4132 = vrcp.f32 %v852_v18  ;;  %v742_v62 = vsel %vm710_vm5, 1.0, %v7427_v12  ;;  %7523 = vst [vmem:[#allocation20_spill] sm:$0xff] %v5226_v55  ;;  %v5229_v32 = vpop.f32.mrb[14].mxu0 }
 0x1af   : > { %7521 = vst [vmem:[#allocation18_spill] sm:$0xff] %v5206_v11  ;;  %v1443_v21 = vadd.f32 1.0, %v1411_v13  ;;  %v1427_v24 = vmul.f32 %v1395_v34, %v755_v15  ;;  %v1092_v26 = vadd.f32 -0.28449672, %v1060_v31  ;;  %v1285_v16 = vmul.f32 1.442695, %v1252_v19 }
 0x1b0   : > { %v1382_v22 = vsub.f32 1.0, %v1350_v14  ;;  %v1514_v35 = vsel %vm1507_vm4, %v5206_v11, -inf  ;;  %v1206_v9 = vmul.f32 %v5152_v30, %v1174_v38  ;;  %v809_v60 = vmul.f32 0.3275911, %v5213_v42  ;;  %7524 = vst [vmem:[#allocation21_spill] sm:$0xff] %v5229_v32 }
 0x1b1   : > { %v5219_v53 = vmul.f32 %v1443_v21, %v643_v48  ;;  %v1459_v54 = vadd.f32 1.0, %v1427_v24  ;;  %1515 = vmax.xlane.f32.xlu1 %v1514_v35  ;;  %v659_v3 = vmul.f32 0.5, %v5038_v29  ;;  %v1124_v7 = vmul.f32 %v5166_v45, %v1092_v26 }
 0x1b2   : > { %v1414_v59 = vmul.f32 %v1382_v22, %v742_v62  ;;  %v1611_v8 = vsel %vm1604_vm6, %v5206_v11, -inf  ;;  %4134 = vpow2.f32 %v1285_v16  ;;  %v841_v25 = vadd.f32 1.0, %v809_v60 }
 0x1b3   : > { %7522 = vst [vmem:[#allocation19_spill] sm:$0xff] %v5219_v53  ;;  %v5234_v30 = vmul.f32 %v1459_v54, %v659_v3  ;;  %v1508_v14 = vsel %vm1507_vm4, %v5219_v53, -inf  ;;  %v5239_v29 = vand.u32 2147483647, %v5224_v28  ;;  %v646_v27 = vmul.f32 0.5, %v5049_v33  ;;  %v5254_v33 = vpop.f32.mrb[15].mxu0 }
 0x1b4   : > { %v4131_v63 = vpop.eup %4130  ;;  %v1446_v13 = vadd.f32 1.0, %v1414_v59  ;;  %1509 = vmax.xlane.f32.xlu0 %v1508_v14  ;;  %v5243_v15 = vmul.f32 0.70710677, %v5071_v46  ;;  %v1708_v18 = vsel %vm1701_vm7, %v5206_v11, -inf  ;;  %v1156_v21 = vadd.f32 0.2548296, %v1124_v7 }
 0x1b5   : > { %7525 = vst [vmem:[#allocation22_spill] sm:$0xff] %v5234_v30  ;;  %v1366_v34 = vmul.f32 %v4131_v63, %v1206_v9  ;;  %1612 = vmax.xlane.f32.xlu1 %v1611_v8  ;;  %v1556_v24 = vsel %vm1507_vm4, %v5234_v30, -inf  ;;  %7527 = vst [vmem:[#allocation24_spill] sm:$0xff] %v5254_v33  ;;  %4136 = vrcp.f32 %v841_v25  ;;  %v825_v22 = vmul.f32 0.3275911, %v5239_v29  ;;  %v5267_v54 = vpop.f32.mrb[12].mxu1 }
 0x1b6   : > { %v5250_v19 = vmul.f32 %v1446_v13, %v646_v27  ;;  %v5258_v1 = vand.u32 2147483647, %v5243_v15  ;;  %v758_v38 = vsel %vm726_vm8, 1.0, %v7427_v12  ;;  %v1805_v62 = vsel %vm1798_vm9, %v5206_v11, -inf  ;;  %7528 = vst [vmem:[#allocation25_spill] sm:$0xff] %v5267_v54  ;;  %v5269_v9 = vpop.f32.mrb[13].mxu1 }
 0x1b7   : > { %v1398_v20 = vsub.f32 1.0, %v1366_v34  ;;  %v1188_v16 = vmul.f32 %v5166_v45, %v1156_v21  ;;  %v857_v59 = vadd.f32 1.0, %v825_v22  ;;  %7529 = vst [vmem:[#allocation26_spill] sm:$0xff] %v5269_v9  ;;  %v1659_v7 = vsel %vm1604_vm6, %v5196_v0, -inf  ;;  %v5281_v27 = vpop.f32.mrb[14].mxu1 }
 0x1b8   : > { %v5248_v31 = vpop.eup %4132  ;;  %7526 = vst [vmem:[#allocation23_spill] sm:$0xff] %v5250_v19  ;;  %1557 = vmax.xlane.f32.xlu0 %v1556_v24  ;;  %v1614_v35 = vsel %vm1604_vm6, %v5250_v19, -inf  ;;  %v807_v60 = vmul.f32 0.3275911, %v5258_v1  ;;  %v1711_v45 = vsel %vm1701_vm7, %v5250_v19, -inf  ;;  %v662_v34 = vmul.f32 0.5, %v5059_v39 }
 0x1b9   : > { %1709 = vmax.xlane.f32.xlu1 %v1708_v18  ;;  %v948_v48 = vmul.f32 1.0614054, %v5248_v31  ;;  %v1430_v26 = vmul.f32 %v1398_v20, %v758_v38  ;;  %4138 = vrcp.f32 %v857_v59  ;;  %v5279_v25 = vmul.f32 0.70710677, %v5078_v49  ;;  %7530 = vst [vmem:[#allocation27_spill] sm:$0xff] %v5281_v27 }
 0x1ba   : > { %v839_v14 = vadd.f32 1.0, %v807_v60  ;;  %v5287_v21 = vmul.f32 0.70710677, %v5080_v50  ;;  %v1756_v24 = vsel %vm1701_vm7, %v5196_v0, -inf  ;;  %v1808_v17 = vsel %vm1798_vm9, %v5250_v19, -inf  ;;  %v5308_v60 = vpop.f32.mrb[15].mxu1 }
 0x1bb   : > { %v980_v63 = vadd.f32 -1.4531521, %v948_v48  ;;  %v1462_v8 = vadd.f32 1.0, %v1430_v26  ;;  %v740_v38 = vsel %vm708_vm10, 1.0, %v7427_v12  ;;  %v5301_v26 = vmul.f32 0.70710677, %v5084_v52 }
 0x1bc   : > { %1615 = vmax.xlane.f32.xlu0 %v1614_v35  ;;  %v4135_v3 = vpop.eup %4134  ;;  %4140 = vrcp.f32 %v839_v14  ;;  %v5304_v35 = vand.u32 2147483647, %v5287_v21  ;;  %v1853_v59 = vsel %vm1798_vm9, %v5196_v0, -inf  ;;  %7532 = vst [vmem:[#allocation29_spill] sm:$0xff] %v5308_v60  ;;  %vm724_vm11 = vcmp.ge.f32.partialorder %v5177_v36, 0.0 }
 0x1bd   : > { %1806 = vmax.xlane.f32.xlu1 %v1805_v62  ;;  %v1348_v13 = vmul.f32 %v4135_v3, %v1188_v16  ;;  %v1012_v20 = vmul.f32 %v5248_v31, %v980_v63  ;;  %v5291_v22 = vmul.f32 %v1462_v8, %v662_v34  ;;  %v5298_v62 = vand.u32 2147483647, %v5279_v25 }
 0x1be   : > { %v1236_v63 = vsub.f32 0.0, %v5185_v23  ;;  %v7534_v44 = vmov -1.0   ;;  %vm711_vm13 = vcmp.ge.f32.partialorder %v5243_v15, 0.0  ;;  %vm714_vm15 = vcmp.ge.f32.partialorder %v5279_v25, 0.0 }
 0x1bf   : > { %v5283_v18 = vpop.eup %4136  ;;  %7531 = vst [vmem:[#allocation28_spill] sm:$0xff] %v5291_v22  ;;  %v1380_v39 = vsub.f32 1.0, %v1348_v13  ;;  %v1044_v16 = vadd.f32 1.4214138, %v1012_v20  ;;  %v810_v13 = vmul.f32 0.3275911, %v5298_v62 }
 0x1c0   : > { %1712 = vmax.xlane.f32.xlu0 %v1711_v45  ;;  %v937_v48 = vmul.f32 1.0614054, %v5283_v18  ;;  %v5315_v45 = vand.u32 2147483647, %v5301_v26  ;;  %v823_v20 = vmul.f32 0.3275911, %v5304_v35 }
 0x1c1   : > { %1660 = vmax.xlane.f32.xlu1 %v1659_v7  ;;  %v1412_v3 = vmul.f32 %v1380_v39, %v740_v38  ;;  %v1662_v7 = vsel %vm1604_vm6, %v5291_v22, -inf  ;;  %v1076_v14 = vmul.f32 %v5248_v31, %v1044_v16  ;;  %v1759_v38 = vsel %vm1701_vm7, %v5291_v22, -inf }
 0x1c2   : > { %v969_v8 = vadd.f32 -1.4531521, %v937_v48  ;;  %v644_v48 = vmul.f32 0.5, %v5061_v40  ;;  %v826_v12 = vmul.f32 0.3275911, %v5315_v45  ;;  %v855_v11 = vadd.f32 1.0, %v823_v20 }
 0x1c3   : > { %v5317_v34 = vpop.eup %4138  ;;  %v1444_v39 = vadd.f32 1.0, %v1412_v3  ;;  %v1108_v0 = vadd.f32 -0.28449672, %v1076_v14  ;;  %v1702_v3 = vsel %vm1701_vm7, %v5219_v53, -inf  ;;  %v1856_v40 = vsel %vm1798_vm9, %v5291_v22, -inf }
 0x1c4   : > { %1809 = vmax.xlane.f32.xlu0 %v1808_v17  ;;  %v1268_v17 = vmul.f32 %v1236_v63, %v5185_v23  ;;  %v953_v16 = vmul.f32 1.0614054, %v5317_v34  ;;  %v1226_v36 = vsub.f32 0.0, %v5298_v62  ;;  %v1565_v28 = vsel %vm1507_vm4, %v5291_v22, -inf }
 0x1c5   : > { %1757 = vmax.xlane.f32.xlu1 %v1756_v24  ;;  %v1605_v24 = vsel %vm1604_vm6, %v5219_v53, -inf  ;;  %v5334_v63 = vmul.f32 %v1444_v39, %v644_v48  ;;  %v1140_v60 = vmul.f32 %v5248_v31, %v1108_v0  ;;  %vm727_vm0 = vcmp.ge.f32.partialorder %v5287_v21, 0.0 }
 0x1c6   : > { %v5332_v23 = vpop.eup %4140  ;;  %v985_v20 = vadd.f32 -1.4531521, %v953_v16  ;;  %v5355_v16 = vmul.f32 0.70710677, %v5090_v56  ;;  %v756_v56 = vsel %vm724_vm11, 1.0, %v7534_v44  ;;  %vm730_vm1 = vcmp.ge.f32.partialorder %v5301_v26, 0.0 }
 0x1c7   : > { %7533 = vst [vmem:[#allocation30_spill] sm:$0xff] %v5334_v63  ;;  %v935_v39 = vmul.f32 1.0614054, %v5332_v23  ;;  %v1511_v48 = vsel %vm1507_vm4, %v5334_v63, -inf }
 0x1c8   : > { %1663 = vmax.xlane.f32.xlu0 %v1662_v7  ;;  %v842_v7 = vadd.f32 1.0, %v810_v13  ;;  %v5340_v13 = vmul.f32 0.70710677, %v5082_v51  ;;  %v1017_v0 = vmul.f32 %v5317_v34, %v985_v20  ;;  %v5364_v20 = vand.u32 2147483647, %v5355_v16 }
 0x1c9   : > { %1854 = vmax.xlane.f32.xlu1 %v1853_v59  ;;  %v1001_v59 = vmul.f32 %v5283_v18, %v969_v8  ;;  %v1225_v8 = vsub.f32 0.0, %v5213_v42  ;;  %vm728_vm3 = vcmp.ge.f32.partialorder %v5355_v16, 0.0 }
 0x1ca   : > { %4142 = vrcp.f32 %v842_v7  ;;  %v967_v7 = vadd.f32 -1.4531521, %v935_v39  ;;  %vm712_vm2 = vcmp.ge.f32.partialorder %v5340_v13, 0.0 }
 0x1cb   : > { %v1033_v14 = vadd.f32 1.4214138, %v1001_v59  ;;  %4144 = vrcp.f32 %v855_v11  ;;  %v5350_v59 = vand.u32 2147483647, %v5340_v13  ;;  %v1172_v11 = vadd.f32 0.2548296, %v1140_v60 }
 0x1cc   : > { %1760 = vmax.xlane.f32.xlu0 %v1759_v38  ;;  %v858_v38 = vadd.f32 1.0, %v826_v12 }
 0x1cd   : > { %1606 = vmax.xlane.f32.xlu1 %v1605_v24  ;;  %v1317_v24 = vmul.f32 1.442695, %v1268_v17  ;;  %v1799_v17 = vsel %vm1798_vm9, %v5219_v53, -inf  ;;  %v1065_v12 = vmul.f32 %v5283_v18, %v1033_v14  ;;  %v1204_v53 = vmul.f32 %v5248_v31, %v1172_v11 }
 0x1cf   : > { %4146 = vpow2.f32 %v1317_v24 }
 0x1d0   : > { %1857 = vmax.xlane.f32.xlu0 %v1856_v40  ;;  %4148 = vrcp.f32 %v858_v38  ;;  %v808_v40 = vmul.f32 0.3275911, %v5350_v59 }
 0x1d1   : > { %1703 = vmax.xlane.f32.xlu1 %v1702_v3  ;;  %v1257_v3 = vmul.f32 %v1225_v8, %v5213_v42  ;;  %v1097_v42 = vadd.f32 -0.28449672, %v1065_v12  ;;  %v1049_v8 = vadd.f32 1.4214138, %v1017_v0  ;;  %v1223_v12 = vsub.f32 0.0, %v5258_v1 }
 0x1d2   : > { %v840_v38 = vadd.f32 1.0, %v808_v40 }
 0x1d3   : > { %v1295_v24 = vmul.f32 1.442695, %v1257_v3  ;;  %v1129_v33 = vmul.f32 %v5283_v18, %v1097_v42  ;;  %v1081_v31 = vmul.f32 %v5317_v34, %v1049_v8 }
 0x1d4   : > { %1512 = vmax.xlane.f32.xlu0 %v1511_v48  ;;  %v999_v48 = vmul.f32 %v5332_v23, %v967_v7  ;;  %v5361_v14 = vpop.eup %4142 }
 0x1d5   : > { %1800 = vmax.xlane.f32.xlu1 %v1799_v17  ;;  %v1241_v17 = vsub.f32 0.0, %v5239_v29  ;;  %v5366_v60 = vpop.eup %4144  ;;  %4150 = vpow2.f32 %v1295_v24  ;;  %v938_v7 = vmul.f32 1.0614054, %v5361_v14  ;;  %v824_v24 = vmul.f32 0.3275911, %v5364_v20 }
 0x1d6   : > { %v1031_v11 = vadd.f32 1.4214138, %v999_v48  ;;  %v951_v9 = vmul.f32 1.0614054, %v5366_v60  ;;  %4152 = vrcp.f32 %v840_v38  ;;  %v1113_v42 = vadd.f32 -0.28449672, %v1081_v31 }
 0x1d7   : > { %v1273_v39 = vmul.f32 %v1241_v17, %v5239_v29  ;;  %v1653_v29 = vsel %vm1604_vm6, %v5234_v30, -inf  ;;  %v1161_v17 = vadd.f32 0.2548296, %v1129_v33  ;;  %v856_v54 = vadd.f32 1.0, %v824_v24 }
 0x1d8   : > { %v1063_v48 = vmul.f32 %v5332_v23, %v1031_v11  ;;  %v983_v55 = vadd.f32 -1.4531521, %v951_v9  ;;  %v1145_v33 = vmul.f32 %v5317_v34, %v1113_v42  ;;  %v5390_v9 = vmul.f32 0.70710677, %v5092_v57 }
 0x1d9   : > { %v4147_v3 = vpop.eup %4146  ;;  %v1327_v40 = vmul.f32 1.442695, %v1273_v39  ;;  %1654 = vmax.xlane.f32.xlu1 %v1653_v29  ;;  %v1193_v38 = vmul.f32 %v5283_v18, %v1161_v17  ;;  %v1608_v18 = vsel %vm1604_vm6, %v5334_v63, -inf  ;;  %v660_v24 = vmul.f32 0.5, %v5063_v41 }
 0x1da   : > { %v1364_v0 = vmul.f32 %v4147_v3, %v1204_v53  ;;  %v5373_v27 = vpop.eup %4148  ;;  %v1255_v53 = vmul.f32 %v1223_v12, %v5258_v1  ;;  %v970_v3 = vadd.f32 -1.4531521, %v938_v7  ;;  %v1095_v31 = vadd.f32 -0.28449672, %v1063_v48  ;;  %1609 = vmax.xlane.f32.xlu0 %v1608_v18 }
 0x1db   : > { %v954_v32 = vmul.f32 1.0614054, %v5373_v27  ;;  %4154 = vpow2.f32 %v1327_v40  ;;  %v1015_v7 = vmul.f32 %v5366_v60, %v983_v55  ;;  %v1750_v55 = vsel %vm1701_vm7, %v5234_v30, -inf }
 0x1dc   : > { %v1396_v8 = vsub.f32 1.0, %v1364_v0  ;;  %v1291_v39 = vmul.f32 1.442695, %v1255_v53  ;;  %v1002_v0 = vmul.f32 %v5361_v14, %v970_v3  ;;  %4156 = vrcp.f32 %v856_v54 }
 0x1dd   : > { %v986_v11 = vadd.f32 -1.4531521, %v954_v32  ;;  %v1177_v32 = vadd.f32 0.2548296, %v1145_v33  ;;  %v1127_v40 = vmul.f32 %v5332_v23, %v1095_v31  ;;  %v1258_v41 = vmul.f32 %v1226_v36, %v5298_v62  ;;  %1751 = vmax.xlane.f32.xlu1 %v1750_v55 }
 0x1de   : > { %v1428_v12 = vmul.f32 %v1396_v8, %v756_v56  ;;  %v1239_v56 = vsub.f32 0.0, %v5304_v35  ;;  %4158 = vpow2.f32 %v1291_v39  ;;  %v1034_v17 = vadd.f32 1.4214138, %v1002_v0 }
 0x1df   : > { %v4151_v1 = vpop.eup %4150  ;;  %v1018_v53 = vmul.f32 %v5373_v27, %v986_v11  ;;  %v1047_v8 = vadd.f32 1.4214138, %v1015_v7  ;;  %v5406_v48 = vand.u32 2147483647, %v5390_v9  ;;  %v1705_v3 = vsel %vm1701_vm7, %v5334_v63, -inf }
 0x1e0   : > { %v1353_v29 = vmul.f32 %v4151_v1, %v1193_v38  ;;  %v5400_v54 = vpop.eup %4152  ;;  %v1460_v42 = vadd.f32 1.0, %v1428_v12  ;;  %v649_v38 = vmul.f32 0.5, %v5065_v43  ;;  %v745_v39 = vsel %vm713_vm12, 1.0, %v7534_v44  ;;  %1706 = vmax.xlane.f32.xlu0 %v1705_v3 }
 0x1e1   : > { %v1271_v33 = vmul.f32 %v1239_v56, %v5304_v35  ;;  %v1242_v62 = vsub.f32 0.0, %v5315_v45  ;;  %v5419_v1 = vsel %vm711_vm13, 1.0, %v7534_v44  ;;  %v936_v12 = vmul.f32 1.0614054, %v5400_v54 }
 0x1e2   : > { %v1385_v36 = vsub.f32 1.0, %v1353_v29  ;;  %v1209_v31 = vmul.f32 %v5317_v34, %v1177_v32  ;;  %v1159_v0 = vadd.f32 0.2548296, %v1127_v40  ;;  %v1066_v37 = vmul.f32 %v5361_v14, %v1034_v17 }
 0x1e3   : > { %v1050_v11 = vadd.f32 1.4214138, %v1018_v53  ;;  %v1847_v35 = vsel %vm1798_vm9, %v5234_v30, -inf  ;;  %v5426_v7 = vmul.f32 %v1460_v42, %v660_v24  ;;  %v1297_v18 = vmul.f32 1.442695, %v1258_v41 }
 0x1e4   : > { %v1079_v56 = vmul.f32 %v5366_v60, %v1047_v8  ;;  %v813_v15 = vmul.f32 0.3275911, %v5406_v48  ;;  %1848 = vmax.xlane.f32.xlu1 %v1847_v35  ;;  %v1323_v29 = vmul.f32 1.442695, %v1271_v33  ;;  %v1274_v34 = vmul.f32 %v1242_v62, %v5315_v45 }
 0x1e5   : > { %v4155_v43 = vpop.eup %4154  ;;  %7535 = vst [vmem:[#allocation31_spill] sm:$0xff] %v5426_v7  ;;  %v5433_v32 = vmul.f32 0.70710677, %v5109_v4  ;;  %v1417_v40 = vmul.f32 %v1385_v36, %v745_v39  ;;  %v968_v17 = vadd.f32 -1.4531521, %v936_v12  ;;  %v1802_v41 = vsel %vm1798_vm9, %v5334_v63, -inf }
 0x1e6   : > { %v5435_v55 = vpop.eup %4156  ;;  %v1369_v24 = vmul.f32 %v4155_v43, %v1209_v31  ;;  %v1191_v53 = vmul.f32 %v5332_v23, %v1159_v0  ;;  %v1098_v42 = vadd.f32 -0.28449672, %v1066_v37  ;;  %v1082_v8 = vmul.f32 %v5373_v27, %v1050_v11  ;;  %1803 = vmax.xlane.f32.xlu0 %v1802_v41 }
 0x1e7   : > { %v1517_v45 = vsel %vm1507_vm4, %v5250_v19, -inf  ;;  %4160 = vpow2.f32 %v1297_v18  ;;  %v1111_v33 = vadd.f32 -0.28449672, %v1079_v56  ;;  %v845_v62 = vadd.f32 1.0, %v813_v15 }
 0x1e8   : > { %v4159_v3 = vpop.eup %4158  ;;  %v5444_v39 = vmul.f32 0.70710677, %v5094_v58  ;;  %1518 = vmax.xlane.f32.xlu1 %v1517_v45  ;;  %v761_v36 = vsel %vm729_vm14, 1.0, %v7534_v44  ;;  %4162 = vpow2.f32 %v1323_v29  ;;  %v952_v23 = vmul.f32 1.0614054, %v5435_v55 }
 0x1e9   : > { %v5451_v12 = vand.u32 2147483647, %v5433_v32  ;;  %v1449_v31 = vadd.f32 1.0, %v1417_v40  ;;  %v1401_v43 = vsub.f32 1.0, %v1369_v24  ;;  %v1329_v0 = vmul.f32 1.442695, %v1274_v34 }
 0x1ea   : > { %v1656_v37 = vsel %vm1604_vm6, %v5426_v7, -inf  ;;  %v1351_v11 = vmul.f32 %v4159_v3, %v1191_v53  ;;  %v1130_v35 = vmul.f32 %v5361_v14, %v1098_v42  ;;  %v1114_v18 = vadd.f32 -0.28449672, %v1082_v8 }
 0x1eb   : > { %1657 = vmax.xlane.f32.xlu0 %v1656_v37  ;;  %v1000_v56 = vmul.f32 %v5400_v54, %v968_v17  ;;  %v1143_v15 = vmul.f32 %v5366_v60, %v1111_v33  ;;  %4164 = vrcp.f32 %v845_v62  ;;  %v5461_v29 = vand.u32 2147483647, %v5444_v39 }
 0x1ec   : > { %1566 = vmax.xlane.f32.xlu1 %v1565_v28  ;;  %v1224_v34 = vsub.f32 0.0, %v5350_v59  ;;  %v984_v40 = vadd.f32 -1.4531521, %v952_v23  ;;  %v829_v24 = vmul.f32 0.3275911, %v5451_v12  ;;  %v5466_v41 = vmul.f32 %v1449_v31, %v649_v38 }
 0x1ed   : > { %v1433_v53 = vmul.f32 %v1401_v43, %v761_v36  ;;  %4166 = vpow2.f32 %v1329_v0  ;;  %v1753_v17 = vsel %vm1701_vm7, %v5426_v7, -inf  ;;  %v1383_v42 = vsub.f32 1.0, %v1351_v11 }
 0x1ee   : > { %7536 = vst [vmem:[#allocation32_spill] sm:$0xff] %v5466_v41  ;;  %v1162_v8 = vadd.f32 0.2548296, %v1130_v35  ;;  %v1146_v45 = vmul.f32 %v5373_v27, %v1114_v18  ;;  %v1559_v3 = vsel %vm1507_vm4, %v5426_v7, -inf  ;;  %v1032_v33 = vadd.f32 1.4214138, %v1000_v56 }
 0x1ef   : > { %1754 = vmax.xlane.f32.xlu0 %v1753_v17  ;;  %v1175_v62 = vadd.f32 0.2548296, %v1143_v15  ;;  %v811_v23 = vmul.f32 0.3275911, %v5461_v29  ;;  %v647_v38 = vmul.f32 0.5, %v5071_v46  ;;  %v5478_v36 = vsel %vm714_vm15, 1.0, %v7534_v44 }
 0x1f0   : > { %1560 = vmax.xlane.f32.xlu1 %v1559_v3  ;;  %v1016_v31 = vmul.f32 %v5435_v55, %v984_v40  ;;  %v861_v43 = vadd.f32 1.0, %v829_v24  ;;  %v1256_v37 = vmul.f32 %v1224_v34, %v5350_v59  ;;  %v665_v11 = vmul.f32 0.5, %v5073_v47 }
 0x1f1   : > { %v4161_v0 = vpop.eup %4160  ;;  %v1465_v35 = vadd.f32 1.0, %v1433_v53  ;;  %v1850_v18 = vsel %vm1798_vm9, %v5426_v7, -inf  ;;  %v1415_v46 = vmul.f32 %v1383_v42, %v5419_v1  ;;  %v1194_v56 = vmul.f32 %v5361_v14, %v1162_v8 }
 0x1f2   : > { %v4163_v28 = vpop.eup %4162  ;;  %v1178_v25 = vadd.f32 0.2548296, %v1146_v45  ;;  %v1623_v15 = vsel %vm1604_vm6, %v5466_v41, -inf  ;;  %v1064_v40 = vmul.f32 %v5400_v54, %v1032_v33  ;;  %v1207_v59 = vmul.f32 %v5366_v60, %v1175_v62 }
 0x1f3   : > { %1851 = vmax.xlane.f32.xlu0 %v1850_v18  ;;  %v843_v34 = vadd.f32 1.0, %v811_v23  ;;  %v5492_v47 = vmul.f32 0.70710677, %v5097_v61  ;;  %v1048_v24 = vadd.f32 1.4214138, %v1016_v31  ;;  %v1240_v1 = vsub.f32 0.0, %v5364_v20 }
 0x1f4   : > { %1624 = vmax.xlane.f32.xlu1 %v1623_v15  ;;  %4168 = vrcp.f32 %v861_v43  ;;  %v1293_v53 = vmul.f32 1.442695, %v1256_v37  ;;  %v5498_v17 = vmul.f32 %v1465_v35, %v665_v11  ;;  %v5501_v42 = vmul.f32 0.70710677, %v5111_v5 }
 0x1f5   : > { %v5496_v14 = vpop.eup %4164  ;;  %v1526_v60 = vsel %vm1507_vm4, %v5466_v41, -inf  ;;  %v1447_v8 = vadd.f32 1.0, %v1415_v46  ;;  %v1354_v45 = vmul.f32 %v4161_v0, %v1194_v56  ;;  %v1210_v3 = vmul.f32 %v5373_v27, %v1178_v25 }
 0x1f6   : > { %7537 = vst [vmem:[#allocation33_spill] sm:$0xff] %v5498_v17  ;;  %v1720_v33 = vsel %vm1701_vm7, %v5466_v41, -inf  ;;  %v1096_v23 = vadd.f32 -0.28449672, %v1064_v40  ;;  %v1367_v31 = vmul.f32 %v4163_v28, %v1207_v59  ;;  %4170 = vrcp.f32 %v843_v34 }
 0x1f7   : > { %1527 = vmax.xlane.f32.xlu0 %v1526_v60  ;;  %v4167_v62 = vpop.eup %4166  ;;  %v5509_v43 = vand.u32 2147483647, %v5492_v47  ;;  %v759_v37 = vsel %vm727_vm0, 1.0, %v7534_v44  ;;  %v1080_v0 = vmul.f32 %v5435_v55, %v1048_v24  ;;  %v1272_v27 = vmul.f32 %v1240_v1, %v5364_v20 }
 0x1f8   : > { %1721 = vmax.xlane.f32.xlu1 %v1720_v33  ;;  %v941_v11 = vmul.f32 1.0614054, %v5496_v14  ;;  %4172 = vpow2.f32 %v1293_v53  ;;  %v5518_v35 = vand.u32 2147483647, %v5501_v42  ;;  %v5521_v18 = vmul.f32 0.70710677, %v5113_v6 }
 0x1f9   : > { %v1574_v28 = vsel %vm1507_vm4, %v5498_v17, -inf  ;;  %v5525_v46 = vmul.f32 %v1447_v8, %v647_v38  ;;  %v1386_v21 = vsub.f32 1.0, %v1354_v45  ;;  %v1370_v56 = vmul.f32 %v4167_v62, %v1210_v3 }
 0x1fa   : > { %v1817_v20 = vsel %vm1798_vm9, %v5466_v41, -inf  ;;  %v1128_v25 = vmul.f32 %v5400_v54, %v1096_v23  ;;  %v1399_v15 = vsub.f32 1.0, %v1367_v31  ;;  %v814_v40 = vmul.f32 0.3275911, %v5509_v43 }
 0x1fb   : > { %7538 = vst [vmem:[#allocation34_spill] sm:$0xff] %v5525_v46  ;;  %1575 = vmax.xlane.f32.xlu0 %v1574_v28  ;;  %v1112_v59 = vadd.f32 -0.28449672, %v1080_v0  ;;  %v1325_v34 = vmul.f32 1.442695, %v1272_v27  ;;  %v1671_v53 = vsel %vm1604_vm6, %v5498_v17, -inf  ;;  %v1418_v45 = vmul.f32 %v1386_v21, %v5478_v36 }
 0x1fc   : > { %1818 = vmax.xlane.f32.xlu1 %v1817_v20  ;;  %v973_v24 = vadd.f32 -1.4531521, %v941_v11  ;;  %v827_v38 = vmul.f32 0.3275911, %v5518_v35  ;;  %v5534_v1 = vand.u32 2147483647, %v5521_v18  ;;  %v1431_v23 = vmul.f32 %v1399_v15, %v759_v37 }
 0x1fd   : > { %v650_v8 = vmul.f32 0.5, %v5078_v49  ;;  %v1402_v3 = vsub.f32 1.0, %v1370_v56  ;;  %v1617_v33 = vsel %vm1604_vm6, %v5525_v46, -inf  ;;  %v1160_v62 = vadd.f32 0.2548296, %v1128_v25 }
 0x1fe   : > { %v5538_v60 = vpop.eup %4168  ;;  %v762_v31 = vsel %vm730_vm1, 1.0, %v7534_v44  ;;  %v846_v0 = vadd.f32 1.0, %v814_v40  ;;  %v663_v27 = vmul.f32 0.5, %v5080_v50  ;;  %v1144_v11 = vmul.f32 %v5435_v55, %v1112_v59 }
 0x1ff   : > { %1672 = vmax.xlane.f32.xlu0 %v1671_v53  ;;  %4174 = vpow2.f32 %v1325_v34  ;;  %v1005_v49 = vmul.f32 %v5496_v14, %v973_v24  ;;  %v957_v28 = vmul.f32 1.0614054, %v5538_v60  ;;  %v859_v21 = vadd.f32 1.0, %v827_v38 }
 0x200   : > { %1618 = vmax.xlane.f32.xlu1 %v1617_v33  ;;  %v5550_v36 = vpop.eup %4170  ;;  %v830_v37 = vmul.f32 0.3275911, %v5534_v1  ;;  %v1768_v26 = vsel %vm1701_vm7, %v5498_v17, -inf  ;;  %v1450_v56 = vadd.f32 1.0, %v1418_v45  ;;  %v666_v20 = vmul.f32 0.5, %v5084_v52 }
 0x201   : > { %v1434_v25 = vmul.f32 %v1402_v3, %v762_v31  ;;  %v1714_v50 = vsel %vm1701_vm7, %v5525_v46, -inf  ;;  %v1192_v40 = vmul.f32 %v5400_v54, %v1160_v62  ;;  %v1463_v59 = vadd.f32 1.0, %v1431_v23 }
 0x202   : > { %v4173_v15 = vpop.eup %4172  ;;  %v1229_v34 = vsub.f32 0.0, %v5406_v48  ;;  %4176 = vrcp.f32 %v846_v0  ;;  %v1176_v24 = vadd.f32 0.2548296, %v1144_v11  ;;  %v1037_v38 = vadd.f32 1.4214138, %v1005_v49 }
 0x203   : > { %1769 = vmax.xlane.f32.xlu0 %v1768_v26  ;;  %v939_v53 = vmul.f32 1.0614054, %v5550_v36  ;;  %v989_v45 = vadd.f32 -1.4531521, %v957_v28  ;;  %4178 = vrcp.f32 %v859_v21  ;;  %v862_v52 = vadd.f32 1.0, %v830_v37 }
 0x204   : > { %1715 = vmax.xlane.f32.xlu1 %v1714_v50  ;;  %v1865_v3 = vsel %vm1798_vm9, %v5498_v17, -inf  ;;  %v5564_v33 = vmul.f32 %v1450_v56, %v650_v8  ;;  %v1466_v31 = vadd.f32 1.0, %v1434_v25  ;;  %v5567_v54 = vmul.f32 0.70710677, %v5105_v2 }
 0x205   : > { %v1811_v62 = vsel %vm1798_vm9, %v5525_v46, -inf  ;;  %v1352_v23 = vmul.f32 %v4173_v15, %v1192_v40  ;;  %v1261_v0 = vmul.f32 %v1229_v34, %v5406_v48  ;;  %v5573_v11 = vmul.f32 %v1463_v59, %v663_v27 }
 0x206   : > { %7539 = vst [vmem:[#allocation35_spill] sm:$0xff] %v5564_v33  ;;  %v1208_v49 = vmul.f32 %v5435_v55, %v1176_v24  ;;  %v971_v8 = vadd.f32 -1.4531521, %v939_v53  ;;  %v1069_v28 = vmul.f32 %v5496_v14, %v1037_v38  ;;  %v1021_v21 = vmul.f32 %v5538_v60, %v989_v45 }
 0x207   : > { %1866 = vmax.xlane.f32.xlu0 %v1865_v3  ;;  %7540 = vst [vmem:[#allocation36_spill] sm:$0xff] %v5573_v11  ;;  %4180 = vrcp.f32 %v862_v52  ;;  %v1520_v37 = vsel %vm1507_vm4, %v5525_v46, -inf  ;;  %v5580_v56 = vmul.f32 %v1466_v31, %v666_v20  ;;  %v5583_v48 = vand.u32 2147483647, %v5567_v54 }
 0x208   : > { %1812 = vmax.xlane.f32.xlu1 %v1811_v62  ;;  %v1529_v27 = vsel %vm1507_vm4, %v5564_v33, -inf  ;;  %v1384_v55 = vsub.f32 1.0, %v1352_v23  ;;  %v1303_v25 = vmul.f32 1.442695, %v1261_v0  ;;  %v744_v50 = vsel %vm712_vm2, 1.0, %v7534_v44 }
 0x209   : > { %v4175_v26 = vpop.eup %4174  ;;  %7541 = vst [vmem:[#allocation37_spill] sm:$0xff] %v5580_v56  ;;  %v1003_v15 = vmul.f32 %v5550_v36, %v971_v8  ;;  %v1245_v40 = vsub.f32 0.0, %v5451_v12  ;;  %v5593_v20 = vmul.f32 0.70710677, %v5119_v10  ;;  %v1101_v24 = vadd.f32 -0.28449672, %v1069_v28 }
 0x20a   : > { %v1368_v34 = vmul.f32 %v4175_v26, %v1208_v49  ;;  %v1053_v38 = vadd.f32 1.4214138, %v1021_v21  ;;  %v1568_v53 = vsel %vm1507_vm4, %v5573_v11, -inf  ;;  %v812_v45 = vmul.f32 0.3275911, %v5583_v48 }
 0x20b   : > { %1521 = vmax.xlane.f32.xlu0 %v1520_v37  ;;  %v1577_v13 = vsel %vm1507_vm4, %v5580_v56, -inf  ;;  %v1416_v3 = vmul.f32 %v1384_v55, %v744_v50  ;;  %4182 = vpow2.f32 %v1303_v25  ;;  %v1227_v31 = vsub.f32 0.0, %v5461_v29 }
 0x20c   : > { %1530 = vmax.xlane.f32.xlu1 %v1529_v27  ;;  %v5595_v59 = vpop.eup %4176  ;;  %v1035_v62 = vadd.f32 1.4214138, %v1003_v15  ;;  %v1277_v0 = vmul.f32 %v1245_v40, %v5451_v12  ;;  %v5609_v49 = vand.u32 2147483647, %v5593_v20  ;;  %v1400_v8 = vsub.f32 1.0, %v1368_v34 }
 0x20d   : > { %v5602_v52 = vpop.eup %4178  ;;  %v942_v23 = vmul.f32 1.0614054, %v5595_v59  ;;  %v1133_v28 = vmul.f32 %v5496_v14, %v1101_v24  ;;  %v1085_v21 = vmul.f32 %v5538_v60, %v1053_v38  ;;  %v1665_v16 = vsel %vm1604_vm6, %v5573_v11, -inf }
 0x20e   : > { %v760_v37 = vsel %vm728_vm3, 1.0, %v7534_v44  ;;  %v844_v26 = vadd.f32 1.0, %v812_v45  ;;  %v955_v27 = vmul.f32 1.0614054, %v5602_v52  ;;  %v1674_v12 = vsel %vm1604_vm6, %v5580_v56, -inf }
 0x20f   : > { %1569 = vmax.xlane.f32.xlu0 %v1568_v53  ;;  %v648_v25 = vmul.f32 0.5, %v5082_v51  ;;  %v1448_v50 = vadd.f32 1.0, %v1416_v3  ;;  %v1259_v15 = vmul.f32 %v1227_v31, %v5461_v29  ;;  %v1067_v40 = vmul.f32 %v5550_v36, %v1035_v62  ;;  %v7543_v31 = vld [vmem:[#allocation15_spill] sm:$0xff] }
 0x210   : > { %1578 = vmax.xlane.f32.xlu1 %v1577_v13  ;;  %v974_v34 = vadd.f32 -1.4531521, %v942_v23  ;;  %v1335_v24 = vmul.f32 1.442695, %v1277_v0  ;;  %v828_v38 = vmul.f32 0.3275911, %v5609_v49  ;;  %v1432_v53 = vmul.f32 %v1400_v8, %v760_v37 }
 0x211   : > { %v5619_v55 = vpop.eup %4180  ;;  %v1165_v45 = vadd.f32 0.2548296, %v1133_v28  ;;  %v1117_v13 = vadd.f32 -0.28449672, %v1085_v21  ;;  %4184 = vrcp.f32 %v844_v26  ;;  %v987_v46 = vadd.f32 -1.4531521, %v955_v27 }
 0x212   : > { %v958_v51 = vmul.f32 1.0614054, %v5619_v55  ;;  %v1771_v29 = vsel %vm1701_vm7, %v5580_v56, -inf  ;;  %v5630_v3 = vmul.f32 %v1448_v50, %v648_v25  ;;  %v664_v62 = vmul.f32 0.5, %v7543_v31 }
 0x213   : > { %1666 = vmax.xlane.f32.xlu0 %v1665_v16  ;;  %v1762_v16 = vsel %vm1701_vm7, %v5573_v11, -inf  ;;  %v1299_v23 = vmul.f32 1.442695, %v1259_v15  ;;  %v1099_v0 = vadd.f32 -0.28449672, %v1067_v40  ;;  %v1006_v8 = vmul.f32 %v5595_v59, %v974_v34 }
 0x214   : > { %1675 = vmax.xlane.f32.xlu1 %v1674_v12  ;;  %7542 = vst [vmem:[#allocation38_spill] sm:$0xff] %v5630_v3  ;;  %4186 = vpow2.f32 %v1335_v24  ;;  %v860_v28 = vadd.f32 1.0, %v828_v38  ;;  %v1197_v37 = vmul.f32 %v5496_v14, %v1165_v45  ;;  %v1230_v26 = vsub.f32 0.0, %v5509_v43  ;;  %v7544_v24 = vld [vmem:[#allocation16_spill] sm:$0xff] }
 0x215   : > { %v4183_v21 = vpop.eup %4182  ;;  %v1149_v27 = vmul.f32 %v5538_v60, %v1117_v13  ;;  %v1859_v12 = vsel %vm1798_vm9, %v5573_v11, -inf  ;;  %v1464_v25 = vadd.f32 1.0, %v1432_v53  ;;  %v1019_v50 = vmul.f32 %v5602_v52, %v987_v46  ;;  %v7547_v11 = vld [vmem:[#allocation20_spill] sm:$0xff] }
 0x216   : > { %v990_v15 = vadd.f32 -1.4531521, %v958_v51  ;;  %v1868_v40 = vsel %vm1798_vm9, %v5580_v56, -inf  ;;  %4188 = vpow2.f32 %v1299_v23  ;;  %v1243_v34 = vsub.f32 0.0, %v5518_v35 }
 0x217   : > { %1763 = vmax.xlane.f32.xlu0 %v1762_v16  ;;  %v5644_v14 = vmul.f32 0.70710677, %v7544_v24  ;;  %vm717_vm5 = vcmp.ge.f32.partialorder %v5390_v9, 0.0  ;;  %v1131_v38 = vmul.f32 %v5550_v36, %v1099_v0  ;;  %v1038_v45 = vadd.f32 1.4214138, %v1006_v8 }
 0x218   : > { %1772 = vmax.xlane.f32.xlu1 %v1771_v29  ;;  %4190 = vrcp.f32 %v860_v28  ;;  %v1357_v53 = vmul.f32 %v4183_v21, %v1197_v37  ;;  %v1262_v46 = vmul.f32 %v1230_v26, %v5509_v43  ;;  %v1181_v13 = vadd.f32 0.2548296, %v1149_v27 }
 0x219   : > { %v1626_v16 = vsel %vm1604_vm6, %v5564_v33, -inf  ;;  %v5651_v51 = vmul.f32 %v1464_v25, %v664_v62  ;;  %v1051_v29 = vadd.f32 1.4214138, %v1019_v50  ;;  %v1022_v31 = vmul.f32 %v5619_v55, %v990_v15 }
 0x21a   : > { %v1523_v9 = vsel %vm1507_vm4, %v5630_v3, -inf  ;;  %v5657_v23 = vmul.f32 0.5, %v5092_v57  ;;  %v749_v0 = vsel %vm717_vm5, 1.0, %v7534_v44  ;;  %v1275_v43 = vmul.f32 %v1243_v34, %v5518_v35 }
 0x21b   : > { %1860 = vmax.xlane.f32.xlu0 %v1859_v12  ;;  %7545 = vst [vmem:[#allocation15_spill] sm:$0xff] %v5651_v51  ;;  %v5662_v8 = vand.u32 2147483647, %v5644_v14  ;;  %v5664_v62 = vpop.eup %4184  ;;  %vm715_vm8 = vcmp.ge.f32.partialorder %v5444_v39, 0.0  ;;  %v1163_v28 = vadd.f32 0.2548296, %v1131_v38  ;;  %v1070_v21 = vmul.f32 %v5595_v59, %v1038_v45 }
 0x21c   : > { %1869 = vmax.xlane.f32.xlu1 %v1868_v40  ;;  %v1246_v37 = vsub.f32 0.0, %v5534_v1  ;;  %v1389_v26 = vsub.f32 1.0, %v1357_v53  ;;  %v1305_v57 = vmul.f32 1.442695, %v1262_v46  ;;  %v1213_v27 = vmul.f32 %v5538_v60, %v1181_v13  ;;  %v7546_v46 = vld [vmem:[#allocation25_spill] sm:$0xff] }
 0x21d   : > { %v1723_v35 = vsel %vm1701_vm7, %v5564_v33, -inf  ;;  %vm733_vm10 = vcmp.ge.f32.partialorder %v5433_v32, 0.0  ;;  %v1083_v25 = vmul.f32 %v5602_v52, %v1051_v29  ;;  %v1054_v50 = vadd.f32 1.4214138, %v1022_v31 }
 0x21e   : > { %v4187_v12 = vpop.eup %4186  ;;  %v1571_v15 = vsel %vm1507_vm4, %v5651_v51, -inf  ;;  %v940_v40 = vmul.f32 1.0614054, %v5664_v62  ;;  %v1331_v34 = vmul.f32 1.442695, %v1275_v43  ;;  %v1195_v60 = vmul.f32 %v5550_v36, %v1163_v28 }
 0x21f   : > { %1627 = vmax.xlane.f32.xlu0 %v1626_v16  ;;  %v817_v38 = vmul.f32 0.3275911, %v5662_v8  ;;  %v1102_v45 = vadd.f32 -0.28449672, %v1070_v21  ;;  %v1278_v53 = vmul.f32 %v1246_v37, %v5534_v1  ;;  %v5681_v13 = vmul.f32 0.70710677, %v7546_v46 }
 0x220   : > { %1524 = vmax.xlane.f32.xlu1 %v1523_v9  ;;  %v4189_v16 = vpop.eup %4188  ;;  %v1421_v29 = vmul.f32 %v1389_v26, %v749_v0  ;;  %4192 = vpow2.f32 %v1305_v57  ;;  %v1373_v31 = vmul.f32 %v4187_v12, %v1213_v27  ;;  %v1820_v9 = vsel %vm1798_vm9, %v5564_v33, -inf }
 0x221   : > { %v1115_v43 = vadd.f32 -0.28449672, %v1083_v25  ;;  %v5689_v36 = vmul.f32 0.70710677, %v7547_v11  ;;  %v1668_v1 = vsel %vm1604_vm6, %v5651_v51, -inf  ;;  %v765_v0 = vsel %vm733_vm10, 1.0, %v7534_v44 }
 0x222   : > { %v972_v28 = vadd.f32 -1.4531521, %v940_v40  ;;  %4194 = vpow2.f32 %v1331_v34  ;;  %v849_v21 = vadd.f32 1.0, %v817_v38  ;;  %v1355_v37 = vmul.f32 %v4189_v16, %v1195_v60 }
 0x223   : > { %1724 = vmax.xlane.f32.xlu0 %v1723_v35  ;;  %v5685_v35 = vpop.eup %4190  ;;  %v1134_v26 = vmul.f32 %v5595_v59, %v1102_v45  ;;  %v1337_v57 = vmul.f32 1.442695, %v1278_v53  ;;  %v5698_v27 = vand.u32 2147483647, %v5681_v13  ;;  %v1453_v12 = vadd.f32 1.0, %v1421_v29 }
 0x224   : > { %1572 = vmax.xlane.f32.xlu1 %v1571_v15  ;;  %v1086_v15 = vmul.f32 %v5619_v55, %v1054_v50  ;;  %v1405_v25 = vsub.f32 1.0, %v1373_v31  ;;  %v956_v50 = vmul.f32 1.0614054, %v5685_v35  ;;  %v1620_v40 = vsel %vm1604_vm6, %v5630_v3, -inf }
 0x225   : > { %v1147_v32 = vmul.f32 %v5602_v52, %v1115_v43  ;;  %v5705_v34 = vand.u32 2147483647, %v5689_v36  ;;  %v1765_v38 = vsel %vm1701_vm7, %v5651_v51, -inf  ;;  %v747_v60 = vsel %vm715_vm8, 1.0, %v7534_v44 }
 0x226   : > { %v1004_v45 = vmul.f32 %v5664_v62, %v972_v28  ;;  %4196 = vrcp.f32 %v849_v21  ;;  %v1387_v53 = vsub.f32 1.0, %v1355_v37  ;;  %v1166_v16 = vadd.f32 0.2548296, %v1134_v26 }
 0x227   : > { %1821 = vmax.xlane.f32.xlu0 %v1820_v9  ;;  %v1118_v9 = vadd.f32 -0.28449672, %v1086_v15  ;;  %4198 = vpow2.f32 %v1337_v57  ;;  %v833_v29 = vmul.f32 0.3275911, %v5698_v27  ;;  %v5715_v31 = vmul.f32 %v1453_v12, %v5657_v23 }
 0x228   : > { %1669 = vmax.xlane.f32.xlu1 %v1668_v1  ;;  %v1437_v43 = vmul.f32 %v1405_v25, %v765_v0  ;;  %v988_v15 = vadd.f32 -1.4531521, %v956_v50  ;;  %v1717_v1 = vsel %vm1701_vm7, %v5630_v3, -inf  ;;  %v815_v28 = vmul.f32 0.3275911, %v5705_v34 }
 0x229   : > { %7548 = vst [vmem:[#allocation16_spill] sm:$0xff] %v5715_v31  ;;  %v1150_v39 = vmul.f32 %v5619_v55, %v1118_v9  ;;  %v1862_v21 = vsel %vm1798_vm9, %v5651_v51, -inf  ;;  %v1036_v26 = vadd.f32 1.4214138, %v1004_v45  ;;  %v1198_v23 = vmul.f32 %v5595_v59, %v1166_v16 }
 0x22a   : > { %v4193_v37 = vpop.eup %4192  ;;  %v1228_v0 = vsub.f32 0.0, %v5583_v48  ;;  %v669_v12 = vmul.f32 0.5, %v5109_v4  ;;  %v865_v25 = vadd.f32 1.0, %v833_v29  ;;  %v1419_v9 = vmul.f32 %v1387_v53, %v747_v60  ;;  %v7549_v53 = vld [vmem:[#allocation21_spill] sm:$0xff] }
 0x22b   : > { %1621 = vmax.xlane.f32.xlu0 %v1620_v40  ;;  %v1179_v40 = vadd.f32 0.2548296, %v1147_v32  ;;  %v1814_v45 = vsel %vm1798_vm9, %v5630_v3, -inf  ;;  %v1182_v17 = vadd.f32 0.2548296, %v1150_v39  ;;  %v847_v41 = vadd.f32 1.0, %v815_v28 }
 0x22c   : > { %1766 = vmax.xlane.f32.xlu1 %v1765_v38  ;;  %v4195_v32 = vpop.eup %4194  ;;  %v1469_v38 = vadd.f32 1.0, %v1437_v43  ;;  %v1635_v59 = vsel %vm1604_vm6, %v5715_v31, -inf  ;;  %v651_v4 = vmul.f32 0.5, %v5094_v58  ;;  %v1068_v16 = vmul.f32 %v5664_v62, %v1036_v26 }
 0x22d   : > { %v1244_v60 = vsub.f32 0.0, %v5609_v49  ;;  %v5740_v29 = vmul.f32 0.70710677, %v7549_v53  ;;  %vm718_vm11 = vcmp.ge.f32.partialorder %v5492_v47, 0.0  ;;  %v1358_v43 = vmul.f32 %v4193_v37, %v1198_v23 }
 0x22e   : > { %4200 = vrcp.f32 %v865_v25  ;;  %v1451_v39 = vadd.f32 1.0, %v1419_v9  ;;  %v5748_v58 = vmul.f32 %v1469_v38, %v669_v12  ;;  %v1538_v26 = vsel %vm1507_vm4, %v5715_v31, -inf }
 0x22f   : > { %1718 = vmax.xlane.f32.xlu0 %v1717_v1  ;;  %v1020_v1 = vmul.f32 %v5685_v35, %v988_v15  ;;  %v1214_v37 = vmul.f32 %v5619_v55, %v1182_v17  ;;  %4202 = vrcp.f32 %v847_v41  ;;  %v750_v23 = vsel %vm718_vm11, 1.0, %v7534_v44  ;;  %v7551_v17 = vld [vmem:[#allocation26_spill] sm:$0xff] }
 0x230   : > { %1863 = vmax.xlane.f32.xlu1 %v1862_v21  ;;  %v1211_v21 = vmul.f32 %v5602_v52, %v1179_v40  ;;  %v1260_v52 = vmul.f32 %v1228_v0, %v5583_v48  ;;  %v5746_v40 = vpop.eup %4196  ;;  %7550 = vst [vmem:[#allocation25_spill] sm:$0xff] %v5748_v58  ;;  %v1732_v48 = vsel %vm1701_vm7, %v5715_v31, -inf  ;;  %v1100_v0 = vadd.f32 -0.28449672, %v1068_v16 }
 0x231   : > { %v1052_v28 = vadd.f32 1.4214138, %v1020_v1  ;;  %v1276_v12 = vmul.f32 %v1244_v60, %v5609_v49  ;;  %v5762_v25 = vand.u32 2147483647, %v5740_v29  ;;  %v1390_v9 = vsub.f32 1.0, %v1358_v43  ;;  %v7553_v1 = vld [vmem:[#allocation27_spill] sm:$0xff] }
 0x232   : > { %v1371_v51 = vmul.f32 %v4195_v32, %v1211_v21  ;;  %vm731_vm12 = vcmp.ge.f32.partialorder %v5501_v42, 0.0  ;;  %v945_v41 = vmul.f32 1.0614054, %v5746_v40  ;;  %v5767_v55 = vmul.f32 0.70710677, %v7551_v17 }
 0x233   : > { %1815 = vmax.xlane.f32.xlu0 %v1814_v45  ;;  %v1301_v38 = vmul.f32 1.442695, %v1260_v52  ;;  %v1084_v47 = vmul.f32 %v5685_v35, %v1052_v28  ;;  %v5773_v21 = vmul.f32 0.70710677, %v7553_v1  ;;  %v1586_v49 = vsel %vm1507_vm4, %v5748_v58, -inf }
 0x234   : > { %1636 = vmax.xlane.f32.xlu1 %v1635_v59  ;;  %v4199_v59 = vpop.eup %4198  ;;  %v5779_v60 = vmul.f32 %v1451_v39, %v651_v4  ;;  %v1403_v42 = vsub.f32 1.0, %v1371_v51  ;;  %v763_v52 = vsel %vm731_vm12, 1.0, %v7534_v44  ;;  %vm734_vm13 = vcmp.ge.f32.partialorder %v5521_v18, 0.0 }
 0x235   : > { %v1374_v43 = vmul.f32 %v4199_v59, %v1214_v37  ;;  %v1333_v28 = vmul.f32 1.442695, %v1276_v12  ;;  %v1422_v3 = vmul.f32 %v1390_v9, %v750_v23  ;;  %v1132_v56 = vmul.f32 %v5664_v62, %v1100_v0 }
 0x236   : > { %7554 = vst [vmem:[#allocation21_spill] sm:$0xff] %v5779_v60  ;;  %v977_v33 = vadd.f32 -1.4531521, %v945_v41  ;;  %v5788_v4 = vand.u32 2147483647, %v5767_v55  ;;  %4204 = vpow2.f32 %v1301_v38  ;;  %v1683_v37 = vsel %vm1604_vm6, %v5748_v58, -inf }
 0x237   : > { %1539 = vmax.xlane.f32.xlu0 %v1538_v26  ;;  %v1829_v26 = vsel %vm1798_vm9, %v5715_v31, -inf  ;;  %v1116_v39 = vadd.f32 -0.28449672, %v1084_v47  ;;  %v5793_v59 = vand.u32 2147483647, %v5773_v21  ;;  %v654_v23 = vmul.f32 0.5, %v5097_v61 }
 0x238   : > { %1733 = vmax.xlane.f32.xlu1 %v1732_v48  ;;  %v818_v48 = vmul.f32 0.3275911, %v5762_v25  ;;  %v5797_v12 = vpop.eup %4200  ;;  %v1435_v9 = vmul.f32 %v1403_v42, %v763_v52  ;;  %v1406_v0 = vsub.f32 1.0, %v1374_v43  ;;  %v1629_v41 = vsel %vm1604_vm6, %v5779_v60, -inf }
 0x239   : > { %v766_v38 = vsel %vm734_vm13, 1.0, %v7534_v44  ;;  %4206 = vpow2.f32 %v1333_v28  ;;  %v5808_v31 = vpop.eup %4202  ;;  %v1454_v61 = vadd.f32 1.0, %v1422_v3  ;;  %v1164_v42 = vadd.f32 0.2548296, %v1132_v56 }
 0x23a   : > { %v5723_v57 = vpop.xlane.xlu0 %1563  ;;  %v850_v47 = vadd.f32 1.0, %v818_v48  ;;  %v1009_v43 = vmul.f32 %v5746_v40, %v977_v33  ;;  %v831_v52 = vmul.f32 0.3275911, %v5788_v4  ;;  %v961_v7 = vmul.f32 1.0614054, %v5797_v12 }
 0x23b   : > { %1587 = vmax.xlane.f32.xlu0 %v1586_v49  ;;  %v667_v49 = vmul.f32 0.5, %v5111_v5  ;;  %v1148_v5 = vmul.f32 %v5685_v35, %v1116_v39  ;;  %v834_v18 = vmul.f32 0.3275911, %v5793_v59  ;;  %v1780_v28 = vsel %vm1701_vm7, %v5748_v58, -inf }
 0x23c   : > { %1830 = vmax.xlane.f32.xlu1 %v1829_v26  ;;  %v1467_v48 = vadd.f32 1.0, %v1435_v9  ;;  %v1233_v30 = vsub.f32 0.0, %v5662_v8  ;;  %v1726_v33 = vsel %vm1701_vm7, %v5779_v60, -inf  ;;  %v670_v56 = vmul.f32 0.5, %v5113_v6 }
 0x23d   : > { %v943_v3 = vmul.f32 1.0614054, %v5808_v31  ;;  %4208 = vrcp.f32 %v850_v47  ;;  %v5822_v39 = vmul.f32 %v1454_v61, %v654_v23  ;;  %v1196_v63 = vmul.f32 %v5664_v62, %v1164_v42  ;;  %v7558_v42 = vld [vmem:[#allocation24_spill] sm:$0xff] }
 0x23e   : > { %v5728_v50 = vpop.xlane.xlu1 %1515  ;;  %v1041_v22 = vadd.f32 1.4214138, %v1009_v43  ;;  %v863_v19 = vadd.f32 1.0, %v831_v52  ;;  %v5829_v6 = vmul.f32 %v1467_v48, %v667_v49  ;;  %v1265_v47 = vmul.f32 %v1233_v30, %v5662_v8 }
 0x23f   : > { %1684 = vmax.xlane.f32.xlu0 %v1683_v37  ;;  %v1823_v62 = vsel %vm1798_vm9, %v5779_v60, -inf  ;;  %v975_v61 = vadd.f32 -1.4531521, %v943_v3  ;;  %v5835_v43 = vmul.f32 0.70710677, %v7558_v42  ;;  %vm1927_vm14 = vcmask 523264  }
 0x240   : > { %1630 = vmax.xlane.f32.xlu1 %v1629_v41  ;;  %v1438_v41 = vmul.f32 %v1406_v0, %v766_v38  ;;  %v1180_v0 = vadd.f32 0.2548296, %v1148_v5  ;;  %v993_v38 = vadd.f32 -1.4531521, %v961_v7  ;;  %7557 = vst [vmem:[#allocation39_spill] sm:$0xff] %v5829_v6  ;;  %v4205_v23 = vpop.eup %4204  ;;  %v1073_v49 = vmul.f32 %v5746_v40, %v1041_v22 }
 0x241   : > { %v5752_v45 = vpop.xlane.xlu0 %1509  ;;  %4210 = vrcp.f32 %v863_v19  ;;  %vm1960_vm15 = vcmask 785408   ;;  %v1541_v19 = vsel %vm1507_vm4, %v5822_v39, -inf  ;;  %vm716_vm0 = vcmp.ge.f32.partialorder %v5567_v54, 0.0 }
 0x242   : > { %v5744_v15 = vpop.xlane.xlu1 %1612  ;;  %v1025_v5 = vmul.f32 %v5797_v12, %v993_v38  ;;  %v1212_v22 = vmul.f32 %v5685_v35, %v1180_v0  ;;  %vm732_vm1 = vcmp.ge.f32.partialorder %v5593_v20, 0.0  ;;  %vm721_vm2 = vcmp.ge.f32.partialorder %v5644_v14, 0.0 }
 0x243   : > { %1781 = vmax.xlane.f32.xlu0 %v1780_v28  ;;  %v1877_v28 = vsel %vm1798_vm9, %v5748_v58, -inf  ;;  %v4207_v52 = vpop.eup %4206  ;;  %v764_v54 = vsel %vm732_vm1, 1.0, %v7534_v44  ;;  %vm737_vm3 = vcmp.ge.f32.partialorder %v5681_v13, 0.0  ;;  %vm719_vm5 = vcmp.ge.f32.partialorder %v5689_v36, 0.0 }
 0x244   : > { %1727 = vmax.xlane.f32.xlu1 %v1726_v33  ;;  %v1057_v38 = vadd.f32 1.4214138, %v1025_v5  ;;  %vm722_vm8 = vcmp.ge.f32.partialorder %v5740_v29, 0.0  ;;  %vm735_vm10 = vcmp.ge.f32.partialorder %v5767_v55, 0.0  ;;  %vm738_vm11 = vcmp.ge.f32.partialorder %v5773_v21, 0.0 }
 0x245   : > { %v5777_v16 = vpop.xlane.xlu0 %1557  ;;  %v770_v21 = vsel %vm738_vm11, 1.0, %v7534_v44  ;;  %vm720_vm12 = vcmp.ge.f32.partialorder %v5835_v43, 0.0 }
 0x246   : > { %v5769_v32 = vpop.xlane.xlu1 %1709 }
 0x247   : > { %7552 = vst [vmem:[#allocation20_spill] sm:$0xff] %v5769_v32  ;;  %1878 = vmax.xlane.f32.xlu0 %v1877_v28  ;;  %v5863_v0 = vpop.eup %4208  ;;  %v1580_v28 = vsel %vm1507_vm4, %v5829_v6, -inf }
 0x248   : > { %1824 = vmax.xlane.f32.xlu1 %v1823_v62 }
 0x249   : > { %v5806_v26 = vpop.xlane.xlu0 %1615 }
 0x24a   : > { %v5790_v51 = vpop.xlane.xlu1 %1806  ;;  %7556 = vst [vmem:[#allocation27_spill] sm:$0xff] %v5806_v26  ;;  %v1470_v26 = vadd.f32 1.0, %v1438_v41  ;;  %v1356_v41 = vmul.f32 %v4205_v23, %v1196_v63  ;;  %v1105_v63 = vadd.f32 -0.28449672, %v1073_v49  ;;  %v1372_v23 = vmul.f32 %v4207_v52, %v1212_v22 }
 0x24b   : > { %7555 = vst [vmem:[#allocation26_spill] sm:$0xff] %v5790_v51  ;;  %v866_v51 = vadd.f32 1.0, %v834_v18  ;;  %v1532_v18 = vsel %vm1507_vm4, %v5779_v60, -inf  ;;  %v946_v52 = vmul.f32 1.0614054, %v5863_v0  ;;  %v652_v22 = vmul.f32 0.5, %v5105_v2 }
 0x24c   : > { %v5847_v33 = vmul.f32 %v1470_v26, %v670_v56  ;;  %1533 = vmax.xlane.f32.xlu0 %v1532_v18  ;;  %1542 = vmax.xlane.f32.xlu1 %v1541_v19  ;;  %v1311_v26 = vmul.f32 1.442695, %v1265_v47  ;;  %v7560_v56 = vld [vmem:[#allocation29_spill] sm:$0xff]  ;;  %v1388_v62 = vsub.f32 1.0, %v1356_v41  ;;  %v1137_v5 = vmul.f32 %v5746_v40, %v1105_v63 }
 0x24d   : > { %v5827_v32 = vpop.xlane.xlu0 %1712  ;;  %4212 = vrcp.f32 %v866_v51  ;;  %v5855_v51 = vand.u32 2147483647, %v5835_v43  ;;  %v5861_v35 = vmul.f32 0.70710677, %v7560_v56  ;;  %v1089_v19 = vmul.f32 %v5797_v12, %v1057_v38 }
 0x24e   : > { %v1661_v37 = vpop.xlane.xlu1 %1660  ;;  %v1589_v47 = vsel %vm1507_vm4, %v5847_v33, -inf  ;;  %4214 = vpow2.f32 %v1311_v26  ;;  %v1404_v26 = vsub.f32 1.0, %v1372_v23  ;;  %v1686_v2 = vsel %vm1604_vm6, %v5847_v33, -inf }
 0x24f   : > { %v1913_v7 = vsel %vm1507_vm4, %v5723_v57, %v1661_v37  ;;  %v1007_v57 = vmul.f32 %v5808_v31, %v975_v61  ;;  %v1249_v37 = vsub.f32 0.0, %v5698_v27  ;;  %v1231_v61 = vsub.f32 0.0, %v5705_v34 }
 0x250   : > { %1581 = vmax.xlane.f32.xlu0 %v1580_v28  ;;  %1590 = vmax.xlane.f32.xlu1 %v1589_v47  ;;  %v5879_v18 = vand.u32 2147483647, %v5861_v35  ;;  %vm736_vm13 = vcmp.ge.f32.partialorder %v5861_v35, 0.0  ;;  %v656_v35 = vmul.f32 0.5, %v7558_v42 }
 0x251   : > { %v5858_v3 = vpop.xlane.xlu0 %1809  ;;  %v1039_v49 = vadd.f32 1.4214138, %v1007_v57  ;;  %v1263_v28 = vmul.f32 %v1231_v61, %v5705_v34  ;;  %v1121_v61 = vadd.f32 -0.28449672, %v1089_v19 }
 0x252   : > { %v1758_v9 = vpop.xlane.xlu1 %1757 }
 0x253   : > { %v1946_v30 = vsel %vm1927_vm14, %v1913_v7, %v1758_v9  ;;  %v748_v7 = vsel %vm716_vm0, 1.0, %v7534_v44  ;;  %v1071_v20 = vmul.f32 %v5808_v31, %v1039_v49 }
 0x254   : > { %v1420_v63 = vmul.f32 %v1388_v62, %v748_v7  ;;  %1687 = vmax.xlane.f32.xlu1 %v1686_v2  ;;  %v832_v62 = vmul.f32 0.3275911, %v5879_v18 }
 0x255   : > { %v5888_v57 = vpop.xlane.xlu0 %1663 }
 0x256   : > { %v1855_v8 = vpop.xlane.xlu1 %1854  ;;  %7561 = vst [vmem:[#allocation29_spill] sm:$0xff] %v5888_v57  ;;  %v978_v57 = vadd.f32 -1.4531521, %v946_v52  ;;  %v864_v2 = vadd.f32 1.0, %v832_v62 }
 0x257   : > { %v5845_v48 = vsel %vm1960_vm15, %v1946_v30, %v1855_v8  ;;  %v816_v30 = vmul.f32 0.3275911, %v5855_v51  ;;  %v1281_v8 = vmul.f32 %v1249_v37, %v5698_v27  ;;  %v1677_v27 = vsel %vm1604_vm6, %v5829_v6, -inf  ;;  %v5890_v37 = vpop.eup %4210 }
 0x258   : > { %7559 = vst [vmem:[#allocation24_spill] sm:$0xff] %v5845_v48  ;;  %1678 = vmax.xlane.f32.xlu0 %v1677_v27  ;;  %v5895_v47 = vpop.eup %4212  ;;  %v1169_v48 = vadd.f32 0.2548296, %v1137_v5  ;;  %v959_v7 = vmul.f32 1.0614054, %v5890_v37  ;;  %v1774_v27 = vsel %vm1701_vm7, %v5829_v6, -inf  ;;  %v1010_v19 = vmul.f32 %v5863_v0, %v978_v57 }
 0x259   : > { %v848_v38 = vadd.f32 1.0, %v816_v30  ;;  %v1343_v60 = vmul.f32 1.442695, %v1281_v8  ;;  %v1452_v30 = vadd.f32 1.0, %v1420_v63  ;;  %v1436_v8 = vmul.f32 %v1404_v26, %v764_v54  ;;  %v5912_v52 = vpop.xlane.xlu0 %1760 }
 0x25a   : > { %v1607_v9 = vpop.xlane.xlu1 %1606  ;;  %v1307_v5 = vmul.f32 1.442695, %v1263_v28  ;;  %v1201_v54 = vmul.f32 %v5746_v40, %v1169_v48  ;;  %v1153_v63 = vmul.f32 %v5797_v12, %v1121_v61  ;;  %v991_v26 = vadd.f32 -1.4531521, %v959_v7 }
 0x25b   : > { %v1895_v58 = vsel %vm1507_vm4, %v5752_v45, %v1607_v9  ;;  %v962_v45 = vmul.f32 1.0614054, %v5895_v47  ;;  %v1783_v9 = vsel %vm1701_vm7, %v5847_v33, -inf  ;;  %4216 = vrcp.f32 %v848_v38 }
 0x25c   : > { %1775 = vmax.xlane.f32.xlu0 %v1774_v27  ;;  %1784 = vmax.xlane.f32.xlu1 %v1783_v9  ;;  %4218 = vpow2.f32 %v1343_v60  ;;  %v1468_v28 = vadd.f32 1.0, %v1436_v8  ;;  %v1234_v60 = vsub.f32 0.0, %v5762_v25  ;;  %v1042_v48 = vadd.f32 1.4214138, %v1010_v19 }
 0x25d   : > { %v994_v38 = vadd.f32 -1.4531521, %v962_v45  ;;  %4220 = vpow2.f32 %v1307_v5  ;;  %v1247_v57 = vsub.f32 0.0, %v5788_v4  ;;  %v1185_v61 = vadd.f32 0.2548296, %v1153_v63  ;;  %v5929_v27 = vpop.xlane.xlu0 %1857 }
 0x25e   : > { %v1704_v41 = vpop.xlane.xlu1 %1703  ;;  %4222 = vrcp.f32 %v864_v2  ;;  %v1638_v7 = vsel %vm1604_vm6, %v5822_v39, -inf  ;;  %v1266_v9 = vmul.f32 %v1234_v60, %v5762_v25  ;;  %v1250_v5 = vsub.f32 0.0, %v5793_v59 }
 0x25f   : > { %v1928_v34 = vsel %vm1927_vm14, %v1895_v58, %v1704_v41  ;;  %v668_v58 = vmul.f32 0.5, %v5119_v10  ;;  %v1103_v41 = vadd.f32 -0.28449672, %v1071_v20  ;;  %v5919_v10 = vmul.f32 %v1452_v30, %v652_v22 }
 0x260   : > { %v1880_v20 = vsel %vm1798_vm9, %v5847_v33, -inf  ;;  %v1023_v22 = vmul.f32 %v5890_v37, %v991_v26  ;;  %v1026_v8 = vmul.f32 %v5895_v47, %v994_v38  ;;  %v1074_v19 = vmul.f32 %v5863_v0, %v1042_v48 }
 0x261   : > { %1881 = vmax.xlane.f32.xlu1 %v1880_v20  ;;  %v1135_v40 = vmul.f32 %v5808_v31, %v1103_v41  ;;  %v5931_v30 = vmul.f32 %v1468_v28, %v668_v58  ;;  %v1535_v45 = vsel %vm1507_vm4, %v5919_v10, -inf  ;;  %v1279_v2 = vmul.f32 %v1247_v57, %v5788_v4  ;;  %v1513_v20 = vpop.xlane.xlu0 %1512 }
 0x262   : > { %v1801_v23 = vpop.xlane.xlu1 %1800  ;;  %v1217_v63 = vmul.f32 %v5797_v12, %v1185_v61  ;;  %v1055_v26 = vadd.f32 1.4214138, %v1023_v22  ;;  %v753_v25 = vsel %vm721_vm2, 1.0, %v7534_v44  ;;  %v1313_v38 = vmul.f32 1.442695, %v1266_v9 }
 0x263   : > { %v5906_v49 = vsel %vm1960_vm15, %v1928_v34, %v1801_v23  ;;  %v1871_v34 = vsel %vm1798_vm9, %v5829_v6, -inf  ;;  %v4215_v23 = vpop.eup %4214  ;;  %v1167_v41 = vadd.f32 0.2548296, %v1135_v40  ;;  %v1583_v28 = vsel %vm1507_vm4, %v5931_v30, -inf }
 0x264   : > { %1872 = vmax.xlane.f32.xlu0 %v1871_v34  ;;  %v1361_v62 = vmul.f32 %v4215_v23, %v1201_v54  ;;  %v1735_v34 = vsel %vm1701_vm7, %v5822_v39, -inf  ;;  %v1058_v23 = vadd.f32 1.4214138, %v1026_v8  ;;  %v1282_v4 = vmul.f32 %v1250_v5, %v5793_v59 }
 0x265   : > { %1536 = vmax.xlane.f32.xlu1 %v1535_v45  ;;  %v5941_v58 = vpop.eup %4216  ;;  %v1199_v12 = vmul.f32 %v5808_v31, %v1167_v41  ;;  %v1106_v60 = vadd.f32 -0.28449672, %v1074_v19  ;;  %v1339_v48 = vmul.f32 1.442695, %v1279_v2  ;;  %v1087_v22 = vmul.f32 %v5890_v37, %v1055_v26 }
 0x266   : > { %v1393_v54 = vsub.f32 1.0, %v1361_v62  ;;  %v4219_v14 = vpop.eup %4218  ;;  %v944_v40 = vmul.f32 1.0614054, %v5941_v58  ;;  %v1655_v8 = vpop.xlane.xlu1 %1654  ;;  %v1090_v59 = vmul.f32 %v5895_v47, %v1058_v23  ;;  %v1680_v31 = vsel %vm1604_vm6, %v5931_v30, -inf }
 0x267   : > { %v4221_v57 = vpop.eup %4220  ;;  %v1377_v61 = vmul.f32 %v4219_v14, %v1217_v63  ;;  %v657_v9 = vmul.f32 0.5, %v7544_v24  ;;  %4224 = vpow2.f32 %v1313_v38  ;;  %v769_v5 = vsel %vm737_vm3, 1.0, %v7534_v44 }
 0x268   : > { %1639 = vmax.xlane.f32.xlu0 %v1638_v7  ;;  %v1425_v62 = vmul.f32 %v1393_v54, %v753_v25  ;;  %v1832_v7 = vsel %vm1798_vm9, %v5822_v39, -inf  ;;  %v5956_v45 = vpop.eup %4222  ;;  %v1345_v41 = vmul.f32 1.442695, %v1282_v4  ;;  %v1359_v19 = vmul.f32 %v4221_v57, %v1199_v12  ;;  %v1610_v25 = vpop.xlane.xlu0 %1609 }
 0x269   : > { %1584 = vmax.xlane.f32.xlu1 %v1583_v28  ;;  %v1138_v2 = vmul.f32 %v5863_v0, %v1106_v60  ;;  %v976_v54 = vadd.f32 -1.4531521, %v944_v40  ;;  %4226 = vpow2.f32 %v1339_v48  ;;  %v1409_v26 = vsub.f32 1.0, %v1377_v61 }
 0x26a   : > { %v1457_v63 = vadd.f32 1.0, %v1425_v62  ;;  %v1632_v14 = vsel %vm1604_vm6, %v5919_v10, -inf  ;;  %v1122_v24 = vadd.f32 -0.28449672, %v1090_v59  ;;  %v960_v23 = vmul.f32 1.0614054, %v5956_v45  ;;  %v1752_v4 = vpop.xlane.xlu1 %1751 }
 0x26b   : > { %v1896_v13 = vsel %vm1507_vm4, %v1513_v20, %v1610_v25  ;;  %v1777_v28 = vsel %vm1701_vm7, %v5931_v30, -inf  ;;  %4228 = vpow2.f32 %v1345_v41  ;;  %v1911_v38 = vsel %vm1507_vm4, %v5777_v16, %v1655_v8 }
 0x26c   : > { %1736 = vmax.xlane.f32.xlu0 %v1735_v34  ;;  %v1119_v34 = vadd.f32 -0.28449672, %v1087_v22  ;;  %v1391_v12 = vsub.f32 1.0, %v1359_v19  ;;  %v1170_v60 = vadd.f32 0.2548296, %v1138_v2  ;;  %v1008_v40 = vmul.f32 %v5941_v58, %v976_v54 }
 0x26d   : > { %1681 = vmax.xlane.f32.xlu1 %v1680_v31  ;;  %v1944_v48 = vsel %vm1927_vm14, %v1911_v38, %v1752_v4  ;;  %v5977_v57 = vmul.f32 %v1457_v63, %v657_v9  ;;  %v1441_v20 = vmul.f32 %v1409_v26, %v769_v5  ;;  %v1729_v61 = vsel %vm1701_vm7, %v5919_v10, -inf  ;;  %v1707_v22 = vpop.xlane.xlu0 %1706 }
 0x26e   : > { %v1151_v62 = vmul.f32 %v5890_v37, %v1119_v34  ;;  %v992_v16 = vadd.f32 -1.4531521, %v960_v23  ;;  %v1929_v8 = vsel %vm1927_vm14, %v1896_v13, %v1707_v22  ;;  %v1874_v59 = vsel %vm1798_vm9, %v5931_v30, -inf }
 0x26f   : > { %7562 = vst [vmem:[#allocation40_spill] sm:$0xff] %v5977_v57  ;;  %v751_v31 = vsel %vm719_vm5, 1.0, %v7534_v44  ;;  %v1202_v9 = vmul.f32 %v5863_v0, %v1170_v60  ;;  %v1040_v5 = vadd.f32 1.4214138, %v1008_v40  ;;  %v1232_v41 = vsub.f32 0.0, %v5855_v51 }
 0x270   : > { %1833 = vmax.xlane.f32.xlu0 %v1832_v7  ;;  %v1154_v7 = vmul.f32 %v5895_v47, %v1122_v24  ;;  %v673_v19 = vmul.f32 0.5, %v7546_v46  ;;  %v1473_v63 = vadd.f32 1.0, %v1441_v20  ;;  %v1183_v26 = vadd.f32 0.2548296, %v1151_v62 }
 0x271   : > { %1778 = vmax.xlane.f32.xlu1 %v1777_v28  ;;  %v1849_v2 = vpop.xlane.xlu1 %1848  ;;  %v4225_v54 = vpop.eup %4224  ;;  %v1826_v34 = vsel %vm1798_vm9, %v5919_v10, -inf  ;;  %v1423_v25 = vmul.f32 %v1391_v12, %v751_v31  ;;  %v1024_v0 = vmul.f32 %v5956_v45, %v992_v16  ;;  %v1647_v23 = vsel %vm1604_vm6, %v5977_v57, -inf }
 0x272   : > { %v1186_v24 = vadd.f32 0.2548296, %v1154_v7  ;;  %v655_v46 = vmul.f32 0.5, %v7547_v11  ;;  %v1072_v28 = vmul.f32 %v5941_v58, %v1040_v5  ;;  %v1264_v38 = vmul.f32 %v1232_v41, %v5855_v51 }
 0x273   : > { %v4227_v36 = vpop.eup %4226  ;;  %v1804_v13 = vpop.xlane.xlu0 %1803  ;;  %v1248_v4 = vsub.f32 0.0, %v5879_v18  ;;  %v6010_v20 = vmul.f32 %v1473_v63, %v673_v19  ;;  %v1215_v11 = vmul.f32 %v5890_v37, %v1183_v26  ;;  %v1550_v62 = vsel %vm1507_vm4, %v5977_v57, -inf }
 0x274   : > { %1633 = vmax.xlane.f32.xlu0 %v1632_v14  ;;  %v5995_v14 = vsel %vm1960_vm15, %v1944_v48, %v1849_v2  ;;  %v6006_v12 = vsel %vm1960_vm15, %v1929_v8, %v1804_v13  ;;  %v1362_v48 = vmul.f32 %v4225_v54, %v1202_v9  ;;  %v1218_v22 = vmul.f32 %v5895_v47, %v1186_v24 }
 0x275   : > { %1875 = vmax.xlane.f32.xlu1 %v1874_v59  ;;  %v6008_v60 = vpop.xlane.xlu1 %1518  ;;  %v4229_v40 = vpop.eup %4228  ;;  %7563 = vst [vmem:[#allocation41_spill] sm:$0xff] %v6010_v20  ;;  %v1056_v51 = vadd.f32 1.4214138, %v1024_v0  ;;  %v1744_v7 = vsel %vm1701_vm7, %v5977_v57, -inf  ;;  %v1104_v8 = vadd.f32 -0.28449672, %v1072_v28  ;;  %v1280_v31 = vmul.f32 %v1248_v4, %v5879_v18 }
 0x276   : > { %v1309_v59 = vmul.f32 1.442695, %v1264_v38  ;;  %v754_v9 = vsel %vm722_vm8, 1.0, %v7534_v44  ;;  %v1394_v47 = vsub.f32 1.0, %v1362_v48  ;;  %v1375_v5 = vmul.f32 %v4227_v36, %v1215_v11 }
 0x277   : > { %v1598_v41 = vsel %vm1507_vm4, %v6010_v20, -inf  ;;  %v1378_v2 = vmul.f32 %v4229_v40, %v1218_v22  ;;  %v1088_v54 = vmul.f32 %v5956_v45, %v1056_v51  ;;  %v1841_v55 = vsel %vm1798_vm9, %v5977_v57, -inf }
 0x278   : > { %1730 = vmax.xlane.f32.xlu0 %v1729_v61  ;;  %v1455_v61 = vadd.f32 1.0, %v1423_v25  ;;  %v1658_v16 = vpop.xlane.xlu0 %1657  ;;  %v767_v18 = vsel %vm735_vm10, 1.0, %v7534_v44  ;;  %v1136_v29 = vmul.f32 %v5941_v58, %v1104_v8  ;;  %4230 = vpow2.f32 %v1309_v59 }
 0x279   : > { %1648 = vmax.xlane.f32.xlu1 %v1647_v23  ;;  %v6020_v37 = vpop.xlane.xlu1 %1566  ;;  %v1341_v26 = vmul.f32 1.442695, %v1280_v31  ;;  %v1426_v36 = vmul.f32 %v1394_v47, %v754_v9  ;;  %v1407_v25 = vsub.f32 1.0, %v1375_v5  ;;  %v1695_v24 = vsel %vm1604_vm6, %v6010_v20, -inf }
 0x27a   : > { %v6027_v19 = vmul.f32 %v1455_v61, %v655_v46  ;;  %v1410_v23 = vsub.f32 1.0, %v1378_v2  ;;  %v1120_v46 = vadd.f32 -0.28449672, %v1088_v54  ;;  %v658_v4 = vmul.f32 0.5, %v7549_v53 }
 0x27b   : > { %v1168_v48 = vadd.f32 0.2548296, %v1136_v29  ;;  %v1439_v11 = vmul.f32 %v1407_v25, %v767_v18  ;;  %4232 = vpow2.f32 %v1341_v26  ;;  %v1458_v61 = vadd.f32 1.0, %v1426_v36 }
 0x27c   : > { %1827 = vmax.xlane.f32.xlu0 %v1826_v34  ;;  %7564 = vst [vmem:[#allocation42_spill] sm:$0xff] %v6027_v19  ;;  %v1755_v63 = vpop.xlane.xlu0 %1754  ;;  %v1641_v28 = vsel %vm1604_vm6, %v6027_v19, -inf  ;;  %v1442_v22 = vmul.f32 %v1410_v23, %v770_v21  ;;  %v1152_v51 = vmul.f32 %v5956_v45, %v1120_v46  ;;  %v671_v53 = vmul.f32 0.5, %v7551_v17 }
 0x27d   : > { %1745 = vmax.xlane.f32.xlu1 %v1744_v7  ;;  %v1561_v34 = vpop.xlane.xlu1 %1560  ;;  %v1738_v7 = vsel %vm1701_vm7, %v6027_v19, -inf  ;;  %v1200_v59 = vmul.f32 %v5941_v58, %v1168_v48  ;;  %v1471_v31 = vadd.f32 1.0, %v1439_v11  ;;  %v674_v9 = vmul.f32 0.5, %v7553_v1 }
 0x27e   : > { %v1912_v0 = vsel %vm1507_vm4, %v1561_v34, %v1658_v16  ;;  %v1889_v47 = vsel %vm1798_vm9, %v6010_v20, -inf  ;;  %v1474_v2 = vadd.f32 1.0, %v1442_v22  ;;  %v1184_v54 = vadd.f32 0.2548296, %v1152_v51 }
 0x27f   : > { %v6039_v13 = vsel %vm1927_vm14, %v1912_v0, %v1755_v63  ;;  %v6071_v58 = vmul.f32 %v1471_v31, %v671_v53  ;;  %v1544_v1 = vsel %vm1507_vm4, %v6027_v19, -inf }
 0x280   : > { %1551 = vmax.xlane.f32.xlu0 %v1550_v62  ;;  %v6044_v38 = vpop.xlane.xlu0 %1851  ;;  %v1792_v62 = vsel %vm1701_vm7, %v6010_v20, -inf  ;;  %v6075_v29 = vmul.f32 %v1474_v2, %v674_v9  ;;  %v1216_v26 = vmul.f32 %v5956_v45, %v1184_v54 }
 0x281   : > { %1842 = vmax.xlane.f32.xlu1 %v1841_v55  ;;  %v6047_v40 = vpop.xlane.xlu1 %1624  ;;  %v1835_v55 = vsel %vm1798_vm9, %v6027_v19, -inf  ;;  %7565 = vst [vmem:[#allocation43_spill] sm:$0xff] %v6071_v58  ;;  %v1592_v0 = vsel %vm1507_vm4, %v6071_v58, -inf  ;;  %v1689_v43 = vsel %vm1604_vm6, %v6071_v58, -inf  ;;  %v1883_v54 = vsel %vm1798_vm9, %v6071_v58, -inf }
 0x282   : > { %v4231_v5 = vpop.eup %4230  ;;  %v1601_v45 = vsel %vm1507_vm4, %v6075_v29, -inf  ;;  %v1795_v31 = vsel %vm1701_vm7, %v6075_v29, -inf }
 0x283   : > { %v1360_v63 = vmul.f32 %v4231_v5, %v1200_v59  ;;  %v672_v5 = vmul.f32 0.5, %v7560_v56 }
 0x284   : > { %1599 = vmax.xlane.f32.xlu0 %v1598_v41  ;;  %v6054_v16 = vpop.xlane.xlu0 %1527  ;;  %v6063_v41 = vmul.f32 %v1458_v61, %v658_v4  ;;  %v768_v61 = vsel %vm736_vm13, 1.0, %v7534_v44 }
 0x285   : > { %1642 = vmax.xlane.f32.xlu1 %v1641_v28  ;;  %v6057_v8 = vpop.xlane.xlu1 %1721  ;;  %v4233_v36 = vpop.eup %4232  ;;  %v1392_v23 = vsub.f32 1.0, %v1360_v63  ;;  %v752_v28 = vsel %vm720_vm12, 1.0, %v7534_v44  ;;  %v1892_v63 = vsel %vm1798_vm9, %v6075_v29, -inf }
 0x286   : > { %v1553_v34 = vsel %vm1507_vm4, %v6063_v41, -inf  ;;  %v1376_v46 = vmul.f32 %v4233_v36, %v1216_v26  ;;  %v1650_v56 = vsel %vm1604_vm6, %v6063_v41, -inf }
 0x287   : > { %v1424_v48 = vmul.f32 %v1392_v23, %v752_v28 }
 0x288   : > { %1696 = vmax.xlane.f32.xlu0 %v1695_v24  ;;  %v6067_v17 = vpop.xlane.xlu0 %1575  ;;  %v1408_v11 = vsub.f32 1.0, %v1376_v46  ;;  %v1747_v46 = vsel %vm1701_vm7, %v6063_v41, -inf }
 0x289   : > { %1739 = vmax.xlane.f32.xlu1 %v1738_v7  ;;  %v6069_v18 = vpop.xlane.xlu1 %1818  ;;  %v1786_v7 = vsel %vm1701_vm7, %v6071_v58, -inf  ;;  %v1456_v53 = vadd.f32 1.0, %v1424_v48 }
 0x28a   : > { %v1440_v59 = vmul.f32 %v1408_v11, %v768_v61  ;;  %v7566_v61 = vld [vmem:[#allocation27_spill] sm:$0xff] }
 0x28b   : > { %v6110_v42 = vmul.f32 %v1456_v53, %v656_v35  ;;  %v7567_v35 = vld [vmem:[#allocation20_spill] sm:$0xff] }
 0x28c   : > { %1793 = vmax.xlane.f32.xlu0 %v1792_v62  ;;  %v6080_v25 = vpop.xlane.xlu0 %1672  ;;  %v1698_v62 = vsel %vm1604_vm6, %v6075_v29, -inf }
 0x28d   : > { %1836 = vmax.xlane.f32.xlu1 %v1835_v55  ;;  %v1619_v24 = vpop.xlane.xlu1 %1618  ;;  %v1472_v55 = vadd.f32 1.0, %v1440_v59  ;;  %v1644_v59 = vsel %vm1604_vm6, %v6110_v42, -inf }
 0x28f   : > { %v6123_v36 = vmul.f32 %v1472_v55, %v672_v5  ;;  %v7569_v5 = vld [vmem:[#allocation18_spill] sm:$0xff] }
 0x290   : > { %1890 = vmax.xlane.f32.xlu0 %v1889_v47  ;;  %v6088_v21 = vpop.xlane.xlu0 %1769 }
 0x291   : > { %1554 = vmax.xlane.f32.xlu1 %v1553_v34  ;;  %v1716_v4 = vpop.xlane.xlu1 %1715  ;;  %v1692_v48 = vsel %vm1604_vm6, %v6123_v36, -inf }
 0x294   : > { %1545 = vmax.xlane.f32.xlu0 %v1544_v1  ;;  %v6096_v22 = vpop.xlane.xlu0 %1866 }
 0x295   : > { %1602 = vmax.xlane.f32.xlu1 %v1601_v45  ;;  %v1813_v51 = vpop.xlane.xlu1 %1812  ;;  %v1595_v45 = vsel %vm1507_vm4, %v6123_v36, -inf }
 0x298   : > { %1593 = vmax.xlane.f32.xlu0 %v1592_v0  ;;  %v1522_v9 = vpop.xlane.xlu0 %1521 }
 0x299   : > { %1699 = vmax.xlane.f32.xlu1 %v1698_v62  ;;  %v1899_v47 = vsel %vm1507_vm4, %v1522_v9, %v1619_v24  ;;  %v6104_v44 = vpop.xlane.xlu1 %1530  ;;  %v1547_v24 = vsel %vm1507_vm4, %v6110_v42, -inf  ;;  %v1897_v62 = vsel %vm1507_vm4, %v5728_v50, %v5744_v15 }
 0x29a   : > { %v1932_v2 = vsel %vm1927_vm14, %v1899_v47, %v1716_v4  ;;  %v1930_v53 = vsel %vm1927_vm14, %v1897_v62, %v7567_v35  ;;  %v1789_v47 = vsel %vm1701_vm7, %v6123_v36, -inf  ;;  %v7571_v62 = vld [vmem:[#allocation29_spill] sm:$0xff] }
 0x29b   : > { %v6113_v1 = vsel %vm1960_vm15, %v1932_v2, %v1813_v51  ;;  %v1898_v51 = vsel %vm1507_vm4, %v6008_v60, %v7566_v61 }
 0x29c   : > { %1690 = vmax.xlane.f32.xlu0 %v1689_v43  ;;  %v6117_v26 = vpop.xlane.xlu0 %1569  ;;  %v1844_v43 = vsel %vm1798_vm9, %v6063_v41, -inf  ;;  %v1931_v50 = vsel %vm1927_vm14, %v1898_v51, %v5827_v32 }
 0x29d   : > { %1796 = vmax.xlane.f32.xlu1 %v1795_v31  ;;  %v6119_v34 = vpop.xlane.xlu1 %1578  ;;  %v7568_v31 = vld [vmem:[#allocation26_spill] sm:$0xff]  ;;  %v1964_v55 = vsel %vm1960_vm15, %v1931_v50, %v5858_v3  ;;  %v1914_v3 = vsel %vm1507_vm4, %v6020_v37, %v7571_v62  ;;  %v7573_v50 = vld [vmem:[#allocation17_spill] sm:$0xff] }
 0x29e   : > { %v1963_v9 = vsel %vm1960_vm15, %v1930_v53, %v7568_v31  ;;  %v1947_v35 = vsel %vm1927_vm14, %v1914_v3, %v5912_v52  ;;  %v7577_v3 = vld [vmem:[#allocation19_spill] sm:$0xff] }
 0x29f   : > { %v1995_v2 = vsub.f32 %v7569_v5, %v1963_v9  ;;  %v1980_v31 = vsel %vm1960_vm15, %v1947_v35, %v5929_v27 }
 0x2a0   : > { %1787 = vmax.xlane.f32.xlu0 %v1786_v7  ;;  %v6127_v0 = vpop.xlane.xlu0 %1666 }
 0x2a1   : > { %1893 = vmax.xlane.f32.xlu1 %v1892_v63  ;;  %v6129_v23 = vpop.xlane.xlu1 %1675  ;;  %v1886_v63 = vsel %vm1798_vm9, %v6123_v36, -inf }
 0x2a4   : > { %1884 = vmax.xlane.f32.xlu0 %v1883_v54  ;;  %v6135_v28 = vpop.xlane.xlu0 %1763  ;;  %v1741_v54 = vsel %vm1701_vm7, %v6110_v42, -inf }
 0x2a5   : > { %1548 = vmax.xlane.f32.xlu1 %v1547_v24  ;;  %v6137_v4 = vpop.xlane.xlu1 %1772  ;;  %v2029_v24 = vmul.f32 1.442695, %v1995_v2  ;;  %v7574_v2 = vld [vmem:[#allocation28_spill] sm:$0xff] }
 0x2a7   : > { %4234 = vpow2.f32 %v2029_v24 }
 0x2a8   : > { %1651 = vmax.xlane.f32.xlu0 %v1650_v56  ;;  %v6143_v11 = vpop.xlane.xlu0 %1860 }
 0x2a9   : > { %1596 = vmax.xlane.f32.xlu1 %v1595_v45  ;;  %v6151_v7 = vpop.xlane.xlu1 %1869 }
 0x2ac   : > { %1748 = vmax.xlane.f32.xlu0 %v1747_v46  ;;  %v6163_v15 = vpop.xlane.xlu0 %1627  ;;  %v7570_v46 = vld [vmem:[#allocation23_spill] sm:$0xff] }
 0x2ad   : > { %1693 = vmax.xlane.f32.xlu1 %v1692_v48  ;;  %v6165_v60 = vpop.xlane.xlu1 %1524  ;;  %v1996_v45 = vsub.f32 %v7570_v46, %v1964_v55 }
 0x2af   : > { %v2031_v51 = vmul.f32 1.442695, %v1996_v45 }
 0x2b0   : > { %1845 = vmax.xlane.f32.xlu0 %v1844_v43  ;;  %v6174_v56 = vpop.xlane.xlu0 %1724  ;;  %v1838_v43 = vsel %vm1798_vm9, %v6110_v42, -inf }
 0x2b1   : > { %1790 = vmax.xlane.f32.xlu1 %v1789_v47  ;;  %v6176_v32 = vpop.xlane.xlu1 %1572  ;;  %4236 = vpow2.f32 %v2031_v51  ;;  %v7572_v47 = vld [vmem:[#allocation24_spill] sm:$0xff]  ;;  %v6203_v55 = vpop.eup %4234  ;;  %v1993_v51 = vsub.f32 %v7577_v3, %v5906_v49  ;;  %v1978_v3 = vsel %vm1960_vm15, %v6039_v13, %v6044_v38 }
 0x2b2   : > { %v2011_v37 = vsub.f32 %v7573_v50, %v7572_v47  ;;  %7575 = vst [vmem:[#allocation27_spill] sm:$0xff] %v6203_v55 }
 0x2b4   : > { %1645 = vmax.xlane.f32.xlu0 %v1644_v59  ;;  %v6181_v48 = vpop.xlane.xlu0 %1821 }
 0x2b5   : > { %1887 = vmax.xlane.f32.xlu1 %v1886_v63  ;;  %v6186_v61 = vpop.xlane.xlu1 %1669  ;;  %v2061_v63 = vmul.f32 1.442695, %v2011_v37  ;;  %v2025_v37 = vmul.f32 1.442695, %v1993_v51 }
 0x2b7   : > { %4238 = vpow2.f32 %v2061_v63 }
 0x2b8   : > { %1742 = vmax.xlane.f32.xlu0 %v1741_v54  ;;  %v6190_v53 = vpop.xlane.xlu0 %1621  ;;  %v2012_v54 = vsub.f32 %v7574_v2, %v1980_v31  ;;  %v7578_v31 = vld [vmem:[#allocation30_spill] sm:$0xff] }
 0x2b9   : > { %v6192_v59 = vpop.xlane.xlu1 %1766  ;;  %v1994_v47 = vsub.f32 %v7578_v31, %v6006_v12  ;;  %v7581_v31 = vld [vmem:[#allocation22_spill] sm:$0xff] }
 0x2ba   : > { %v2063_v27 = vmul.f32 1.442695, %v2012_v54 }
 0x2bb   : > { %v6211_v46 = vpop.eup %4236  ;;  %v2027_v2 = vmul.f32 1.442695, %v1994_v47  ;;  %v2009_v47 = vsub.f32 %v7581_v31, %v5995_v14 }
 0x2bc   : > { %1839 = vmax.xlane.f32.xlu0 %v1838_v43  ;;  %v6196_v9 = vpop.xlane.xlu0 %1718  ;;  %7576 = vst [vmem:[#allocation20_spill] sm:$0xff] %v6211_v46  ;;  %4240 = vpow2.f32 %v2063_v27 }
 0x2bd   : > { %v6200_v5 = vpop.xlane.xlu1 %1863  ;;  %4242 = vpow2.f32 %v2025_v37 }
 0x2be   : > { %4244 = vpow2.f32 %v2027_v2  ;;  %v2057_v2 = vmul.f32 1.442695, %v2009_v47 }
 0x2c0   : > { %v6205_v52 = vpop.xlane.xlu0 %1815  ;;  %4246 = vpow2.f32 %v2057_v2 }
 0x2c1   : > { %v6207_v24 = vpop.xlane.xlu1 %1636  ;;  %v6237_v54 = vpop.eup %4238 }
 0x2c2   : > { %7579 = vst [vmem:[#allocation26_spill] sm:$0xff] %v6237_v54 }
 0x2c4   : > { %v6213_v45 = vpop.xlane.xlu0 %1539 }
 0x2c5   : > { %v6215_v43 = vpop.xlane.xlu1 %1733 }
 0x2c6   : > { %2253 = vrot.lane.b32.xlu1 %v6203_v55, %s4751_s24  ;;  %v6239_v63 = vpop.eup %4240 }
 0x2c7   : > { %7580 = vst [vmem:[#allocation18_spill] sm:$0xff] %v6239_v63  ;;  %v6267_v31 = vpop.eup %4242 }
 0x2c8   : > { %v6219_v62 = vpop.xlane.xlu0 %1587  ;;  %7583 = vst [vmem:[#allocation23_spill] sm:$0xff] %v6267_v31 }
 0x2c9   : > { %v6225_v35 = vpop.xlane.xlu1 %1830 }
 0x2ca   : > { %2255 = vrot.lane.b32.xlu1 %v6211_v46, %s4751_s24 }
 0x2cc   : > { %v6231_v50 = vpop.xlane.xlu0 %1684 }
 0x2cd   : > { %v1631_v49 = vpop.xlane.xlu1 %1630 }
 0x2ce   : > { %2479 = vrot.lane.b32.xlu1 %v6211_v46, %s4752_s26 }
 0x2d0   : > { %v6241_v27 = vpop.xlane.xlu0 %1781 }
 0x2d1   : > { %v1728_v12 = vpop.xlane.xlu1 %1727 }
 0x2d2   : > { %2477 = vrot.lane.b32.xlu0 %v6203_v55, %s4752_s26  ;;  %2703 = vrot.lane.b32.xlu1 %v6211_v46, %s4753_s23 }
 0x2d4   : > { %v6250_v51 = vpop.xlane.xlu0 %1878 }
 0x2d5   : > { %v1825_v37 = vpop.xlane.xlu1 %1824 }
 0x2d6   : > { %2701 = vrot.lane.b32.xlu0 %v6203_v55, %s4753_s23  ;;  %2287 = vrot.lane.b32.xlu1 %v6239_v63, %s4751_s24  ;;  %v7582_v55 = vld [vmem:[#allocation31_spill] sm:$0xff] }
 0x2d7   : > { %v2010_v46 = vsub.f32 %v7582_v55, %v1978_v3  ;;  %v6272_v55 = vpop.eup %4244 }
 0x2d8   : > { %7584 = vst [vmem:[#allocation29_spill] sm:$0xff] %v6272_v55  ;;  %v6306_v2 = vpop.eup %4246 }
 0x2d9   : > { %v1534_v58 = vpop.xlane.xlu0 %1533  ;;  %v6262_v13 = vpop.xlane.xlu1 %1542  ;;  %v2059_v14 = vmul.f32 1.442695, %v2010_v46  ;;  %7586 = vst [vmem:[#allocation24_spill] sm:$0xff] %v6306_v2 }
 0x2da   : > { %2285 = vrot.lane.b32.xlu0 %v6237_v54, %s4751_s24  ;;  %2511 = vrot.lane.b32.xlu1 %v6239_v63, %s4752_s26  ;;  %v1903_v19 = vsel %vm1507_vm4, %v1534_v58, %v1631_v49  ;;  %v1902_v58 = vsel %vm1507_vm4, %v6104_v44, %v6163_v15  ;;  %v7585_v15 = vld [vmem:[#allocation35_spill] sm:$0xff] }
 0x2db   : > { %v1936_v38 = vsel %vm1927_vm14, %v1903_v19, %v1728_v12  ;;  %4248 = vpow2.f32 %v2059_v14  ;;  %v1935_v19 = vsel %vm1927_vm14, %v1902_v58, %v6174_v56  ;;  %v1918_v58 = vsel %vm1507_vm4, %v6119_v34, %v6129_v23  ;;  %v7588_v23 = vld [vmem:[#allocation37_spill] sm:$0xff] }
 0x2dc   : > { %v6270_v20 = vsel %vm1960_vm15, %v1936_v38, %v1825_v37  ;;  %v1968_v49 = vsel %vm1960_vm15, %v1935_v19, %v6181_v48 }
 0x2dd   : > { %v6274_v3 = vpop.xlane.xlu0 %1581  ;;  %v6281_v46 = vpop.xlane.xlu1 %1590  ;;  %v2000_v47 = vsub.f32 %v7585_v15, %v1968_v49  ;;  %v1951_v49 = vsel %vm1927_vm14, %v1918_v58, %v6137_v4 }
 0x2de   : > { %2509 = vrot.lane.b32.xlu0 %v6237_v54, %s4752_s26  ;;  %2735 = vrot.lane.b32.xlu1 %v6239_v63, %s4753_s23  ;;  %v1984_v15 = vsel %vm1960_vm15, %v1951_v49, %v6151_v7  ;;  %v1900_v49 = vsel %vm1507_vm4, %v6165_v60, %v6190_v53  ;;  %v7590_v60 = vld [vmem:[#allocation38_spill] sm:$0xff] }
 0x2df   : > { %v2039_v48 = vmul.f32 1.442695, %v2000_v47 }
 0x2e1   : > { %v6293_v44 = vpop.xlane.xlu1 %1687  ;;  %4250 = vpow2.f32 %v2039_v48 }
 0x2e2   : > { %2733 = vrot.lane.b32.xlu0 %v6237_v54, %s4753_s23  ;;  %2251 = vrot.lane.b32.xlu1 %v6272_v55, %s4751_s24  ;;  %v2016_v54 = vsub.f32 %v7588_v23, %v1984_v15  ;;  %v1933_v15 = vsel %vm1927_vm14, %v1900_v49, %v6196_v9  ;;  %v1916_v49 = vsel %vm1507_vm4, %v6176_v32, %v6186_v61  ;;  %v7593_v32 = vld [vmem:[#allocation15_spill] sm:$0xff] }
 0x2e3   : > { %v1966_v23 = vsel %vm1960_vm15, %v1933_v15, %v6205_v52 }
 0x2e4   : > { %v2071_v7 = vmul.f32 1.442695, %v2016_v54  ;;  %v1998_v53 = vsub.f32 %v7590_v60, %v1966_v23  ;;  %v1949_v23 = vsel %vm1927_vm14, %v1916_v49, %v6192_v59 }
 0x2e5   : > { %v6289_v12 = vpop.xlane.xlu0 %1678  ;;  %v6308_v14 = vpop.eup %4248  ;;  %v1982_v60 = vsel %vm1960_vm15, %v1949_v23, %v6200_v5 }
 0x2e6   : > { %2249 = vrot.lane.b32.xlu0 %v6267_v31, %s4751_s24  ;;  %2475 = vrot.lane.b32.xlu1 %v6272_v55, %s4752_s26  ;;  %7587 = vst [vmem:[#allocation17_spill] sm:$0xff] %v6308_v14  ;;  %4252 = vpow2.f32 %v2071_v7  ;;  %v2035_v9 = vmul.f32 1.442695, %v1998_v53  ;;  %v2014_v61 = vsub.f32 %v7593_v32, %v1982_v60  ;;  %v1901_v60 = vsel %vm1507_vm4, %v6054_v16, %v6047_v40  ;;  %v7597_v16 = vld [vmem:[#allocation32_spill] sm:$0xff] }
 0x2e8   : > { %4254 = vpow2.f32 %v2035_v9  ;;  %v2067_v59 = vmul.f32 1.442695, %v2014_v61  ;;  %v1934_v61 = vsel %vm1927_vm14, %v1901_v60, %v6057_v8 }
 0x2e9   : > { %v6298_v37 = vpop.xlane.xlu0 %1775  ;;  %v6302_v56 = vpop.xlane.xlu1 %1784 }
 0x2ea   : > { %2473 = vrot.lane.b32.xlu0 %v6267_v31, %s4752_s26  ;;  %2699 = vrot.lane.b32.xlu1 %v6272_v55, %s4753_s23  ;;  %4256 = vpow2.f32 %v2067_v59 }
 0x2eb   : > { %v6338_v48 = vpop.eup %4250 }
 0x2ec   : > { %7589 = vst [vmem:[#allocation28_spill] sm:$0xff] %v6338_v48 }
 0x2ee   : > { %2697 = vrot.lane.b32.xlu0 %v6267_v31, %s4753_s23  ;;  %v6317_v19 = vpop.xlane.xlu1 %1881  ;;  %2283 = vrot.lane.b32.xlu1 %v6308_v14, %s4751_s24 }
 0x2f0   : > { %v6364_v7 = vpop.eup %4252 }
 0x2f1   : > { %v6310_v38 = vpop.xlane.xlu0 %1872  ;;  %7591 = vst [vmem:[#allocation19_spill] sm:$0xff] %v6364_v7 }
 0x2f2   : > { %2281 = vrot.lane.b32.xlu0 %v6306_v2, %s4751_s24  ;;  %v6327_v34 = vpop.xlane.xlu1 %1536  ;;  %2507 = vrot.lane.b32.xlu1 %v6308_v14, %s4752_s26  ;;  %v6392_v9 = vpop.eup %4254 }
 0x2f3   : > { %7595 = vst [vmem:[#allocation31_spill] sm:$0xff] %v6392_v9 }
 0x2f5   : > { %v1640_v47 = vpop.xlane.xlu0 %1639 }
 0x2f6   : > { %2505 = vrot.lane.b32.xlu0 %v6306_v2, %s4752_s26  ;;  %v6334_v4 = vpop.xlane.xlu1 %1584  ;;  %2731 = vrot.lane.b32.xlu1 %v6308_v14, %s4753_s23  ;;  %v1906_v49 = vsel %vm1507_vm4, %v6262_v13, %v1640_v47  ;;  %v1967_v13 = vsel %vm1960_vm15, %v1934_v61, %v6069_v18  ;;  %v6421_v18 = vpop.eup %4256 }
 0x2f7   : > { %7598 = vst [vmem:[#allocation37_spill] sm:$0xff] %v6421_v18 }
 0x2f9   : > { %v1737_v63 = vpop.xlane.xlu0 %1736 }
 0x2fa   : > { %2729 = vrot.lane.b32.xlu0 %v6306_v2, %s4753_s23  ;;  %v6343_v55 = vpop.xlane.xlu1 %1681  ;;  %2263 = vrot.lane.b32.xlu1 %v6338_v48, %s4751_s24  ;;  %v1939_v32 = vsel %vm1927_vm14, %v1906_v49, %v1737_v63  ;;  %v1999_v63 = vsub.f32 %v7597_v16, %v1967_v13 }
 0x2fc   : > { %v2037_v49 = vmul.f32 1.442695, %v1999_v63 }
 0x2fd   : > { %v1834_v58 = vpop.xlane.xlu0 %1833 }
 0x2fe   : > { %v6353_v2 = vpop.xlane.xlu1 %1778  ;;  %2487 = vrot.lane.b32.xlu1 %v6338_v48, %s4752_s26 }
 0x301   : > { %v6351_v54 = vpop.xlane.xlu0 %1633 }
 0x302   : > { %v6360_v57 = vpop.xlane.xlu1 %1875  ;;  %2711 = vrot.lane.b32.xlu1 %v6338_v48, %s4753_s23 }
 0x305   : > { %v6358_v14 = vpop.xlane.xlu0 %1730 }
 0x306   : > { %v6371_v15 = vpop.xlane.xlu1 %1648  ;;  %2295 = vrot.lane.b32.xlu1 %v6364_v7, %s4751_s24 }
 0x307   : > { %7592 = vst [vmem:[#allocation30_spill] sm:$0xff] %v6371_v15 }
 0x309   : > { %v6366_v52 = vpop.xlane.xlu0 %1827 }
 0x30a   : > { %v6381_v48 = vpop.xlane.xlu1 %1745  ;;  %2519 = vrot.lane.b32.xlu1 %v6364_v7, %s4752_s26 }
 0x30d   : > { %v6379_v53 = vpop.xlane.xlu0 %1551 }
 0x30e   : > { %v6388_v6 = vpop.xlane.xlu1 %1842  ;;  %2743 = vrot.lane.b32.xlu1 %v6364_v7, %s4753_s23  ;;  %v1972_v7 = vsel %vm1960_vm15, %v1939_v32, %v1834_v58 }
 0x30f   : > { %v2004_v40 = vsub.f32 %v5822_v39, %v1972_v7  ;;  %v1917_v7 = vsel %vm1507_vm4, %v6067_v17, %v6080_v25 }
 0x311   : > { %v6386_v15 = vpop.xlane.xlu0 %1599  ;;  %v2047_v59 = vmul.f32 1.442695, %v2004_v40 }
 0x312   : > { %7594 = vst [vmem:[#allocation22_spill] sm:$0xff] %v6386_v15  ;;  %v1643_v23 = vpop.xlane.xlu1 %1642  ;;  %2259 = vrot.lane.b32.xlu1 %v6392_v9, %s4751_s24  ;;  %v2089_v15 = vsel %vm1507_vm4, %v6267_v31, 0.0 }
 0x313   : > { %4258 = vpow2.f32 %v2047_v59 }
 0x314   : > { %4260 = vpow2.f32 %v2037_v49 }
 0x315   : > { %v6394_v5 = vpop.xlane.xlu0 %1696 }
 0x316   : > { %7596 = vst [vmem:[#allocation35_spill] sm:$0xff] %v6394_v5  ;;  %v1740_v5 = vpop.xlane.xlu1 %1739  ;;  %2483 = vrot.lane.b32.xlu1 %v6392_v9, %s4752_s26 }
 0x319   : > { %v6411_v47 = vpop.xlane.xlu0 %1793  ;;  %2090 = vadd.xlane.f32.xlu0 %v2089_v15  ;;  %v1922_v15 = vsel %vm1507_vm4, %v6281_v46, %v6293_v44  ;;  %v1950_v46 = vsel %vm1927_vm14, %v1917_v7, %v6088_v21 }
 0x31a   : > { %v1837_v58 = vpop.xlane.xlu1 %1836  ;;  %2707 = vrot.lane.b32.xlu1 %v6392_v9, %s4753_s23  ;;  %v1955_v61 = vsel %vm1927_vm14, %v1922_v15, %v6302_v56  ;;  %v1983_v40 = vsel %vm1960_vm15, %v1950_v46, %v6096_v22 }
 0x31b   : > { %v1988_v44 = vsel %vm1960_vm15, %v1955_v61, %v6317_v19 }
 0x31c   : > { %v2020_v56 = vsub.f32 %v5847_v33, %v1988_v44  ;;  %v1904_v33 = vsel %vm1507_vm4, %v6327_v34, %v6351_v54 }
 0x31d   : > { %v6417_v8 = vpop.xlane.xlu0 %1890  ;;  %v1937_v15 = vsel %vm1927_vm14, %v1904_v33, %v6358_v14  ;;  %v7601_v14 = vld [vmem:[#allocation34_spill] sm:$0xff] }
 0x31e   : > { %v6427_v39 = vpop.xlane.xlu1 %1554  ;;  %2291 = vrot.lane.b32.xlu1 %v6421_v18, %s4751_s24  ;;  %v2079_v63 = vmul.f32 1.442695, %v2020_v56  ;;  %v1997_v61 = vsub.f32 %v7601_v14, %v6113_v1  ;;  %v1920_v56 = vsel %vm1507_vm4, %v6334_v4, %v6343_v55 }
 0x320   : > { %4262 = vpow2.f32 %v2079_v63  ;;  %v2033_v46 = vmul.f32 1.442695, %v1997_v61  ;;  %v1905_v61 = vsel %vm1507_vm4, %v6213_v45, %v6207_v24  ;;  %v7606_v45 = vld [vmem:[#allocation16_spill] sm:$0xff] }
 0x321   : > { %v1546_v60 = vpop.xlane.xlu0 %1545 }
 0x322   : > { %v1907_v32 = vsel %vm1507_vm4, %v1546_v60, %v1643_v23  ;;  %v6448_v25 = vpop.xlane.xlu1 %1602  ;;  %2515 = vrot.lane.b32.xlu1 %v6421_v18, %s4752_s26 }
 0x323   : > { %v1940_v13 = vsel %vm1927_vm14, %v1907_v32, %v1740_v5  ;;  %v7599_v5 = vld [vmem:[#allocation33_spill] sm:$0xff]  ;;  %v1970_v32 = vsel %vm1960_vm15, %v1937_v15, %v6366_v52 }
 0x324   : > { %v6442_v23 = vsel %vm1960_vm15, %v1940_v13, %v1837_v58  ;;  %v2015_v21 = vsub.f32 %v7599_v5, %v1983_v40  ;;  %v6460_v58 = vpop.eup %4258  ;;  %v2002_v34 = vsub.f32 %v5919_v10, %v1970_v32  ;;  %v1915_v5 = vsel %vm1507_vm4, %v6117_v26, %v6127_v0 }
 0x325   : > { %v6446_v17 = vpop.xlane.xlu0 %1593  ;;  %v6464_v49 = vpop.eup %4260  ;;  %v1948_v55 = vsel %vm1927_vm14, %v1915_v5, %v6135_v28 }
 0x326   : > { %v6456_v19 = vpop.xlane.xlu1 %1699  ;;  %2739 = vrot.lane.b32.xlu1 %v6421_v18, %s4753_s23  ;;  %v2069_v22 = vmul.f32 1.442695, %v2015_v21  ;;  %7600 = vst [vmem:[#allocation38_spill] sm:$0xff] %v6464_v49  ;;  %v2043_v52 = vmul.f32 1.442695, %v2002_v34  ;;  %v1953_v21 = vsel %vm1927_vm14, %v1920_v56, %v6353_v2  ;;  %v1981_v63 = vsel %vm1960_vm15, %v1948_v55, %v6143_v11 }
 0x327   : > { %v1986_v4 = vsel %vm1960_vm15, %v1953_v21, %v6360_v57 }
 0x328   : > { %4264 = vpow2.f32 %v2069_v22  ;;  %v2018_v0 = vsub.f32 %v5931_v30, %v1986_v4  ;;  %v7604_v22 = vld [vmem:[#allocation36_spill] sm:$0xff] }
 0x329   : > { %v6454_v16 = vpop.xlane.xlu0 %1690  ;;  %4266 = vpow2.f32 %v2043_v52  ;;  %v2013_v33 = vsub.f32 %v7604_v22, %v1981_v63 }
 0x32a   : > { %v6469_v60 = vpop.xlane.xlu1 %1796  ;;  %2271 = vrot.lane.b32.xlu1 %v6460_v58, %s4751_s24  ;;  %v6496_v44 = vpop.eup %4262  ;;  %4268 = vpow2.f32 %v2033_v46  ;;  %v2075_v28 = vmul.f32 1.442695, %v2018_v0  ;;  %v1938_v46 = vsel %vm1927_vm14, %v1905_v61, %v6215_v43 }
 0x32b   : > { %7602 = vst [vmem:[#allocation15_spill] sm:$0xff] %v6496_v44  ;;  %v2065_v11 = vmul.f32 1.442695, %v2013_v33 }
 0x32c   : > { %4270 = vpow2.f32 %v2075_v28 }
 0x32d   : > { %v6462_v59 = vpop.xlane.xlu0 %1787  ;;  %4272 = vpow2.f32 %v2065_v11 }
 0x32e   : > { %v6479_v7 = vpop.xlane.xlu1 %1893  ;;  %2495 = vrot.lane.b32.xlu1 %v6460_v58, %s4752_s26 }
 0x32f   : > { %2261 = vrot.lane.b32.xlu0 %v6464_v49, %s4751_s24 }
 0x331   : > { %v6484_v54 = vpop.xlane.xlu0 %1884 }
 0x332   : > { %2719 = vrot.lane.b32.xlu1 %v6460_v58, %s4753_s23  ;;  %v6492_v13 = vpop.xlane.xlu1 %1548  ;;  %v6498_v40 = vpop.eup %4264 }
 0x333   : > { %2485 = vrot.lane.b32.xlu0 %v6464_v49, %s4752_s26  ;;  %7603 = vst [vmem:[#allocation32_spill] sm:$0xff] %v6498_v40  ;;  %v6534_v15 = vpop.eup %4266 }
 0x334   : > { %v6536_v30 = vpop.eup %4268 }
 0x335   : > { %v1652_v10 = vpop.xlane.xlu0 %1651  ;;  %7605 = vst [vmem:[#allocation33_spill] sm:$0xff] %v6536_v30 }
 0x336   : > { %2303 = vrot.lane.b32.xlu1 %v6496_v44, %s4751_s24  ;;  %v6505_v1 = vpop.xlane.xlu1 %1596  ;;  %v1910_v34 = vsel %vm1507_vm4, %v6427_v39, %v1652_v10  ;;  %v1971_v10 = vsel %vm1960_vm15, %v1938_v46, %v6225_v35  ;;  %v6569_v4 = vpop.eup %4270 }
 0x337   : > { %2709 = vrot.lane.b32.xlu0 %v6464_v49, %s4753_s23  ;;  %v2003_v5 = vsub.f32 %v7606_v45, %v1971_v10  ;;  %7607 = vst [vmem:[#allocation34_spill] sm:$0xff] %v6569_v4  ;;  %v6571_v63 = vpop.eup %4272  ;;  %v7610_v45 = vld [vmem:[#allocation21_spill] sm:$0xff] }
 0x338   : > { %7608 = vst [vmem:[#allocation36_spill] sm:$0xff] %v6571_v63 }
 0x339   : > { %v1749_v2 = vpop.xlane.xlu0 %1748  ;;  %v2045_v35 = vmul.f32 1.442695, %v2003_v5  ;;  %v2001_v5 = vsub.f32 %v7610_v45, %v6270_v20  ;;  %v7618_v45 = vld [vmem:[#allocation35_spill] sm:$0xff] }
 0x33a   : > { %2527 = vrot.lane.b32.xlu1 %v6496_v44, %s4752_s26  ;;  %v6522_v26 = vpop.xlane.xlu1 %1693  ;;  %v1943_v52 = vsel %vm1927_vm14, %v1910_v34, %v1749_v2  ;;  %v1921_v2 = vsel %vm1507_vm4, %v6219_v62, %v6231_v50 }
 0x33b   : > { %2293 = vrot.lane.b32.xlu0 %v6498_v40, %s4751_s24 }
 0x33d   : > { %v1846_v32 = vpop.xlane.xlu0 %1845 }
 0x33e   : > { %2751 = vrot.lane.b32.xlu1 %v6496_v44, %s4753_s23  ;;  %v6530_v57 = vpop.xlane.xlu1 %1790  ;;  %v1976_v39 = vsel %vm1960_vm15, %v1943_v52, %v1846_v32 }
 0x33f   : > { %2517 = vrot.lane.b32.xlu0 %v6498_v40, %s4752_s26  ;;  %v2008_v24 = vsub.f32 %v6063_v41, %v1976_v39  ;;  %v1926_v41 = vsel %vm1507_vm4, %v6448_v25, %v6456_v19  ;;  %v1954_v25 = vsel %vm1927_vm14, %v1921_v2, %v6241_v27 }
 0x340   : > { %v1959_v22 = vsel %vm1927_vm14, %v1926_v41, %v6469_v60  ;;  %v1987_v28 = vsel %vm1960_vm15, %v1954_v25, %v6250_v51  ;;  %v7609_v60 = vld [vmem:[#allocation25_spill] sm:$0xff]  ;;  %v2041_v41 = vmul.f32 1.442695, %v2001_v5  ;;  %v7619_v5 = vld [vmem:[#allocation22_spill] sm:$0xff] }
 0x341   : > { %v1646_v21 = vpop.xlane.xlu0 %1645  ;;  %v2055_v55 = vmul.f32 1.442695, %v2008_v24  ;;  %v1992_v19 = vsel %vm1960_vm15, %v1959_v22, %v6479_v7  ;;  %v2019_v11 = vsub.f32 %v7609_v60, %v1987_v28  ;;  %v7614_v60 = vld [vmem:[#allocation30_spill] sm:$0xff] }
 0x342   : > { %2267 = vrot.lane.b32.xlu1 %v6534_v15, %s4751_s24  ;;  %v6542_v14 = vpop.xlane.xlu1 %1887  ;;  %v2024_v50 = vsub.f32 %v6075_v29, %v1992_v19  ;;  %v1908_v27 = vsel %vm1507_vm4, %v6492_v13, %v1646_v21 }
 0x343   : > { %2741 = vrot.lane.b32.xlu0 %v6498_v40, %s4753_s23  ;;  %4274 = vpow2.f32 %v2055_v55  ;;  %v2077_v29 = vmul.f32 1.442695, %v2019_v11  ;;  %v1909_v11 = vsel %vm1507_vm4, %v6379_v53, %v7614_v60  ;;  %v7615_v53 = vld [vmem:[#allocation40_spill] sm:$0xff] }
 0x344   : > { %4276 = vpow2.f32 %v2045_v35  ;;  %v2087_v7 = vmul.f32 1.442695, %v2024_v50 }
 0x345   : > { %v1743_v33 = vpop.xlane.xlu0 %1742 }
 0x346   : > { %2491 = vrot.lane.b32.xlu1 %v6534_v15, %s4752_s26  ;;  %v6557_v56 = vpop.permute.xlu1 %2253  ;;  %v1941_v34 = vsel %vm1927_vm14, %v1908_v27, %v1743_v33  ;;  %4278 = vpow2.f32 %v2087_v7  ;;  %v1942_v27 = vsel %vm1927_vm14, %v1909_v11, %v6381_v48 }
 0x347   : > { %2257 = vrot.lane.b32.xlu0 %v6536_v30, %s4751_s24  ;;  %4280 = vpow2.f32 %v2077_v29 }
 0x349   : > { %v1840_v32 = vpop.xlane.xlu0 %1839 }
 0x34a   : > { %2715 = vrot.lane.b32.xlu1 %v6534_v15, %s4753_s23  ;;  %v6565_v43 = vpop.permute.xlu1 %2255  ;;  %v1974_v61 = vsel %vm1960_vm15, %v1941_v34, %v1840_v32  ;;  %v1975_v34 = vsel %vm1960_vm15, %v1942_v27, %v6388_v6 }
 0x34b   : > { %2481 = vrot.lane.b32.xlu0 %v6536_v30, %s4752_s26  ;;  %v2006_v39 = vsub.f32 %v6110_v42, %v1974_v61  ;;  %v1924_v42 = vsel %vm1507_vm4, %v6505_v1, %v6522_v26  ;;  %v1919_v26 = vsel %vm1507_vm4, %v6274_v3, %v6289_v12  ;;  %v2007_v29 = vsub.f32 %v7615_v53, %v1975_v34 }
 0x34c   : > { %v1957_v35 = vsel %vm1927_vm14, %v1924_v42, %v6530_v57  ;;  %v1925_v42 = vsel %vm1507_vm4, %v7619_v5, %v7618_v45  ;;  %v1923_v53 = vsel %vm1507_vm4, %v6446_v17, %v6454_v16  ;;  %v7624_v5 = vld [vmem:[#allocation43_spill] sm:$0xff] }
 0x34d   : > { %v6611_v52 = vpop.eup %4274  ;;  %v2051_v24 = vmul.f32 1.442695, %v2006_v39  ;;  %v6633_v21 = vpop.permute.xlu0 %2477  ;;  %v1990_v20 = vsel %vm1960_vm15, %v1957_v35, %v6542_v14  ;;  %v1952_v14 = vsel %vm1927_vm14, %v1919_v26, %v6298_v37  ;;  %v2053_v6 = vmul.f32 1.442695, %v2007_v29 }
 0x34e   : > { %2299 = vrot.lane.b32.xlu1 %v6569_v4, %s4751_s24  ;;  %v6578_v0 = vpop.permute.xlu1 %2479  ;;  %v6613_v46 = vpop.eup %4276  ;;  %v2022_v57 = vsub.f32 %v6123_v36, %v1990_v20  ;;  %v1985_v25 = vsel %vm1960_vm15, %v1952_v14, %v6310_v38  ;;  %v7613_v36 = vld [vmem:[#allocation39_spill] sm:$0xff] }
 0x34f   : > { %2705 = vrot.lane.b32.xlu0 %v6536_v30, %s4753_s23  ;;  %4282 = vpow2.f32 %v2051_v24  ;;  %v2017_v12 = vsub.f32 %v7613_v36, %v1985_v25 }
 0x350   : > { %v6645_v2 = vpop.eup %4278  ;;  %4284 = vpow2.f32 %v2041_v41  ;;  %v2083_v3 = vmul.f32 1.442695, %v2022_v57  ;;  %v1958_v41 = vsel %vm1927_vm14, %v1925_v42, %v6411_v47  ;;  %v7620_v57 = vld [vmem:[#allocation41_spill] sm:$0xff] }
 0x351   : > { %7611 = vst [vmem:[#allocation16_spill] sm:$0xff] %v6645_v2  ;;  %v6647_v1 = vpop.eup %4280  ;;  %v6661_v33 = vpop.permute.xlu0 %2701  ;;  %v2073_v37 = vmul.f32 1.442695, %v2017_v12  ;;  %v1991_v26 = vsel %vm1960_vm15, %v1958_v41, %v6417_v8  ;;  %v7621_v8 = vld [vmem:[#allocation42_spill] sm:$0xff] }
 0x352   : > { %2523 = vrot.lane.b32.xlu1 %v6569_v4, %s4752_s26  ;;  %v6595_v62 = vpop.permute.xlu1 %2703  ;;  %7612 = vst [vmem:[#allocation25_spill] sm:$0xff] %v6647_v1  ;;  %4286 = vpow2.f32 %v2083_v3  ;;  %v2023_v14 = vsub.f32 %v7620_v57, %v1991_v26 }
 0x353   : > { %2289 = vrot.lane.b32.xlu0 %v6571_v63, %s4751_s24  ;;  %4288 = vpow2.f32 %v2073_v37  ;;  %v2005_v37 = vsub.f32 %v7621_v8, %v6442_v23  ;;  %v1956_v23 = vsel %vm1927_vm14, %v1923_v53, %v6462_v59 }
 0x354   : > { %4290 = vpow2.f32 %v2053_v6  ;;  %v2085_v47 = vmul.f32 1.442695, %v2023_v14  ;;  %v1989_v29 = vsel %vm1960_vm15, %v1956_v23, %v6484_v54  ;;  %v7627_v14 = vld [vmem:[#allocation29_spill] sm:$0xff] }
 0x355   : > { %v6674_v50 = vpop.permute.xlu0 %2285  ;;  %v2049_v11 = vmul.f32 1.442695, %v2005_v37  ;;  %v2021_v42 = vsub.f32 %v7624_v5, %v1989_v29 }
 0x356   : > { %2747 = vrot.lane.b32.xlu1 %v6569_v4, %s4753_s23  ;;  %v6605_v51 = vpop.permute.xlu1 %2287  ;;  %4292 = vpow2.f32 %v2085_v47  ;;  %v2092_v47 = vsel %vm1507_vm4, %v7627_v14, 0.0 }
 0x357   : > { %2513 = vrot.lane.b32.xlu0 %v6571_v63, %s4752_s26  ;;  %4294 = vpow2.f32 %v2049_v11  ;;  %v2081_v16 = vmul.f32 1.442695, %v2021_v42 }
 0x359   : > { %v6670_v19 = vpop.eup %4282  ;;  %v6693_v7 = vpop.permute.xlu0 %2509  ;;  %4296 = vpow2.f32 %v2081_v16 }
 0x35a   : > { %2279 = vrot.lane.b32.xlu1 %v6611_v52, %s4751_s24  ;;  %v6617_v13 = vpop.permute.xlu1 %2511  ;;  %v6680_v38 = vpop.eup %4284 }
 0x35b   : > { %2737 = vrot.lane.b32.xlu0 %v6571_v63, %s4753_s23 }
 0x35c   : > { %v6702_v61 = vpop.eup %4286 }
 0x35d   : > { %7616 = vst [vmem:[#allocation21_spill] sm:$0xff] %v6702_v61  ;;  %v6706_v24 = vpop.permute.xlu0 %2733  ;;  %v6712_v48 = vpop.eup %4288 }
 0x35e   : > { %2503 = vrot.lane.b32.xlu1 %v6611_v52, %s4752_s26  ;;  %v6624_v10 = vpop.permute.xlu1 %2735  ;;  %7617 = vst [vmem:[#allocation39_spill] sm:$0xff] %v6712_v48  ;;  %v6740_v36 = vpop.eup %4290 }
 0x35f   : > { %2269 = vrot.lane.b32.xlu0 %v6613_v46, %s4751_s24 }
 0x360   : > { %v6765_v6 = vpop.eup %4292 }
 0x361   : > { %v6725_v20 = vpop.permute.xlu0 %2249  ;;  %7622 = vst [vmem:[#allocation30_spill] sm:$0xff] %v6765_v6  ;;  %v6778_v59 = vpop.eup %4294 }
 0x362   : > { %2727 = vrot.lane.b32.xlu1 %v6611_v52, %s4753_s23  ;;  %v6637_v55 = vpop.permute.xlu1 %2251 }
 0x363   : > { %2493 = vrot.lane.b32.xlu0 %v6613_v46, %s4752_s26  ;;  %v6798_v11 = vpop.eup %4296 }
 0x364   : > { %7628 = vst [vmem:[#allocation41_spill] sm:$0xff] %v6798_v11 }
 0x365   : > { %v6736_v3 = vpop.permute.xlu0 %2473 }
 0x366   : > { %2311 = vrot.lane.b32.xlu1 %v6645_v2, %s4751_s24  ;;  %v6657_v22 = vpop.permute.xlu1 %2475 }
 0x367   : > { %2717 = vrot.lane.b32.xlu0 %v6613_v46, %s4753_s23 }
 0x369   : > { %v6748_v60 = vpop.permute.xlu0 %2697 }
 0x36a   : > { %2535 = vrot.lane.b32.xlu1 %v6645_v2, %s4752_s26  ;;  %v6672_v28 = vpop.permute.xlu1 %2699 }
 0x36b   : > { %2301 = vrot.lane.b32.xlu0 %v6647_v1, %s4751_s24 }
 0x36d   : > { %v6754_v34 = vpop.permute.xlu0 %2281 }
 0x36e   : > { %2275 = vrot.lane.b32.xlu1 %v6670_v19, %s4751_s24  ;;  %v6687_v32 = vpop.permute.xlu1 %2283 }
 0x36f   : > { %2525 = vrot.lane.b32.xlu0 %v6647_v1, %s4752_s26 }
 0x371   : > { %v6772_v17 = vpop.permute.xlu0 %2505 }
 0x372   : > { %2499 = vrot.lane.b32.xlu1 %v6670_v19, %s4752_s26  ;;  %v6704_v39 = vpop.permute.xlu1 %2507 }
 0x373   : > { %2749 = vrot.lane.b32.xlu0 %v6647_v1, %s4753_s23 }
 0x375   : > { %v6780_v54 = vpop.permute.xlu0 %2729 }
 0x376   : > { %2723 = vrot.lane.b32.xlu1 %v6670_v19, %s4753_s23  ;;  %v6719_v35 = vpop.permute.xlu1 %2731 }
 0x377   : > { %2265 = vrot.lane.b32.xlu0 %v6680_v38, %s4751_s24 }
 0x37a   : > { %2307 = vrot.lane.b32.xlu1 %v6702_v61, %s4751_s24  ;;  %v6734_v25 = vpop.permute.xlu1 %2263 }
 0x37b   : > { %2489 = vrot.lane.b32.xlu0 %v6680_v38, %s4752_s26 }
 0x37e   : > { %2531 = vrot.lane.b32.xlu1 %v6702_v61, %s4752_s26  ;;  %v6742_v12 = vpop.permute.xlu1 %2487 }
 0x37f   : > { %2713 = vrot.lane.b32.xlu0 %v6680_v38, %s4753_s23 }
 0x382   : > { %2755 = vrot.lane.b32.xlu1 %v6702_v61, %s4753_s23  ;;  %v6752_v27 = vpop.permute.xlu1 %2711 }
 0x383   : > { %2297 = vrot.lane.b32.xlu0 %v6712_v48, %s4751_s24 }
 0x386   : > { %v6767_v45 = vpop.permute.xlu1 %2295 }
 0x387   : > { %2521 = vrot.lane.b32.xlu0 %v6712_v48, %s4752_s26  ;;  %7623 = vst [vmem:[#allocation40_spill] sm:$0xff] %v6767_v45  ;;  %v7637_v45 = vld [vmem:[#allocation27_spill] sm:$0xff] }
 0x38a   : > { %v6776_v41 = vpop.permute.xlu1 %2519 }
 0x38b   : > { %2745 = vrot.lane.b32.xlu0 %v6712_v48, %s4753_s23  ;;  %7625 = vst [vmem:[#allocation35_spill] sm:$0xff] %v6776_v41 }
 0x38e   : > { %v6786_v57 = vpop.permute.xlu1 %2743 }
 0x38f   : > { %2277 = vrot.lane.b32.xlu0 %v6740_v36, %s4751_s24  ;;  %7626 = vst [vmem:[#allocation22_spill] sm:$0xff] %v6786_v57  ;;  %v7636_v57 = vld [vmem:[#allocation20_spill] sm:$0xff] }
 0x392   : > { %v6796_v37 = vpop.permute.xlu1 %2259 }
 0x393   : > { %2501 = vrot.lane.b32.xlu0 %v6740_v36, %s4752_s26 }
 0x396   : > { %v6806_v29 = vpop.permute.xlu1 %2483 }
 0x397   : > { %2725 = vrot.lane.b32.xlu0 %v6740_v36, %s4753_s23 }
 0x39a   : > { %v6814_v42 = vpop.permute.xlu1 %2707 }
 0x39b   : > { %2309 = vrot.lane.b32.xlu0 %v6765_v6, %s4751_s24 }
 0x39e   : > { %v6824_v61 = vpop.permute.xlu1 %2291 }
 0x39f   : > { %2533 = vrot.lane.b32.xlu0 %v6765_v6, %s4752_s26 }
 0x3a2   : > { %v6828_v44 = vpop.permute.xlu1 %2515 }
 0x3a3   : > { %2273 = vrot.lane.b32.xlu0 %v6778_v59, %s4751_s24  ;;  %7632 = vst [vmem:[#allocation45_spill] sm:$0xff] %v6828_v44 }
 0x3a6   : > { %v6784_v26 = vpop.xlane.xlu0 %2090  ;;  %2093 = vadd.xlane.f32.xlu1 %v2092_v47  ;;  %v6834_v31 = vpop.permute.xlu1 %2739 }
 0x3a7   : > { %2497 = vrot.lane.b32.xlu0 %v6778_v59, %s4752_s26  ;;  %7633 = vst [vmem:[#allocation46_spill] sm:$0xff] %v6834_v31  ;;  %v2101_v31 = vsel %vm1507_vm4, %v6536_v30, 0.0  ;;  %4298 = vrcp.f32 %v6784_v26 }
 0x3aa   : > { %v6792_v8 = vpop.permute.xlu0 %2261 }
 0x3ab   : > { %2721 = vrot.lane.b32.xlu0 %v6778_v59, %s4753_s23 }
 0x3ae   : > { %v6800_v53 = vpop.permute.xlu0 %2485 }
 0x3af   : > { %2305 = vrot.lane.b32.xlu0 %v6798_v11, %s4751_s24  ;;  %s4674_s24 = scalar_lea.vmem %s4673_s12, 8192 }
 0x3b0   : > { %p4676_p1 = scmp.lt.s32.totalorder %s4674_s24, %s4668_s8 }
 0x3b2   : > { %v6804_v23 = vpop.permute.xlu0 %2709  ;;  %p4677_p2 = por %p4676_p1, %p4675_p12 }
 0x3b3   : > { %2529 = vrot.lane.b32.xlu0 %v6798_v11, %s4752_s26 }
 0x3b4   : > { %p4678_p4 = pnand %p4677_p2, %p4671_p7 }
 0x3b6   : > { %v6810_v5 = vpop.permute.xlu0 %2293 }
 0x3b7   : > { %7629 = vst [vmem:[#allocation42_spill] sm:$0xff] %v6810_v5  ;;  %2753 = vrot.lane.b32.xlu0 %v6798_v11, %s4753_s23  ;;  %2759 = vrot.lane.b32.xlu1 %v6645_v2, %s4753_s23 }
 0x3ba   : > { %v6816_v16 = vpop.permute.xlu0 %2517 }
 0x3bb   : > { %7630 = vst [vmem:[#allocation43_spill] sm:$0xff] %v6816_v16  ;;  %2757 = vrot.lane.b32.xlu0 %v6765_v6, %s4753_s23  ;;  %v6838_v6 = vpop.permute.xlu1 %2271  ;;  %v2098_v16 = vsel %vm1507_vm4, %v7636_v57, 0.0 }
 0x3be   : > { %v6822_v47 = vpop.permute.xlu0 %2741  ;;  %v7646_v26 = vld [vmem:[#allocation42_spill] sm:$0xff] }
 0x3bf   : > { %7631 = vst [vmem:[#allocation44_spill] sm:$0xff] %v6822_v47  ;;  %v6844_v47 = vpop.permute.xlu1 %2495 }
 0x3c2   : > { %v6826_v1 = vpop.permute.xlu0 %2257 }
 0x3c3   : > { %v6850_v44 = vpop.permute.xlu1 %2719 }
 0x3c6   : > { %v6830_v14 = vpop.permute.xlu0 %2481 }
 0x3c7   : > { %v6864_v40 = vpop.permute.xlu1 %2303 }
 0x3ca   : > { %v6832_v11 = vpop.permute.xlu0 %2705 }
 0x3ce   : > { %v6836_v48 = vpop.permute.xlu0 %2289 }
 0x3d2   : > { %v6840_v4 = vpop.permute.xlu0 %2513 }
 0x3d3   : > { %7634 = vst [vmem:[#allocation47_spill] sm:$0xff] %v6840_v4  ;;  %v2095_v4 = vsel %vm1507_vm4, %v7637_v45, 0.0  ;;  %v7638_v45 = vld [vmem:[#allocation28_spill] sm:$0xff] }
 0x3d6   : > { %v6842_v2 = vpop.permute.xlu0 %2737 }
 0x3d7   : > { %7635 = vst [vmem:[#allocation48_spill] sm:$0xff] %v6842_v2  ;;  %v2107_v2 = vsel %vm1507_vm4, %v6464_v49, 0.0  ;;  %v6872_v49 = vpop.permute.xlu1 %2527 }
 0x3da   : > { %2099 = vadd.xlane.f32.xlu0 %v2098_v16  ;;  %v6848_v41 = vpop.permute.xlu0 %2269  ;;  %v2104_v16 = vsel %vm1507_vm4, %v6392_v9, 0.0  ;;  %v2354_v9 = vsel %vm1507_vm4, %v6565_v43, 0.0 }
 0x3db   : > { %2096 = vadd.xlane.f32.xlu1 %v2095_v4  ;;  %v2110_v4 = vsel %vm1507_vm4, %v7638_v45, 0.0 }
 0x3de   : > { %2102 = vadd.xlane.f32.xlu0 %v2101_v31  ;;  %v6854_v5 = vpop.permute.xlu0 %2493  ;;  %v2351_v31 = vsel %vm1507_vm4, %v6557_v56, 0.0  ;;  %v2799_v56 = vsel %vm1507_vm4, %v6661_v33, 0.0  ;;  %v2569_v33 = vsel %vm1507_vm4, %v6736_v3, 0.0  ;;  %v2348_v3 = vsel %vm1507_vm4, %v6637_v55, 0.0  ;;  %v4091_v55 = vld [vmem:[#allocation7 + $0x8] sm:$0xff]  }
 0x3df   : > { %2105 = vadd.xlane.f32.xlu1 %v2104_v16 }
 0x3e2   : > { %2108 = vadd.xlane.f32.xlu0 %v2107_v2  ;;  %v6860_v57 = vpop.permute.xlu0 %2717  ;;  %v2575_v2 = vsel %vm1507_vm4, %v6633_v21, 0.0  ;;  %v2345_v21 = vsel %vm1507_vm4, %v6725_v20, 0.0  ;;  %v2793_v20 = vsel %vm1507_vm4, %v6748_v60, 0.0 }
 0x3e3   : > { %2111 = vadd.xlane.f32.xlu1 %v2110_v4  ;;  %v6884_v4 = vpop.permute.xlu1 %2751 }
 0x3e6   : > { %v6868_v30 = vpop.permute.xlu0 %2301  ;;  %2352 = vadd.xlane.f32.xlu0 %v2351_v31  ;;  %v2578_v31 = vsel %vm1507_vm4, %v6578_v0, 0.0  ;;  %v2572_v0 = vsel %vm1507_vm4, %v6657_v22, 0.0  ;;  %v2366_v22 = vsel %vm1507_vm4, %v6734_v25, 0.0  ;;  %v2357_v25 = vsel %vm1507_vm4, %v6826_v1, 0.0 }
 0x3e7   : > { %2355 = vadd.xlane.f32.xlu1 %v2354_v9  ;;  %v2802_v9 = vsel %vm1507_vm4, %v6595_v62, 0.0  ;;  %v6892_v43 = vpop.permute.xlu1 %2267  ;;  %v2796_v62 = vsel %vm1507_vm4, %v6672_v28, 0.0  ;;  %v2363_v28 = vsel %vm1507_vm4, %v6792_v8, 0.0  ;;  %v2590_v1 = vsel %vm1507_vm4, %v6742_v12, 0.0 }
 0x3e8   : > { %v2805_v12 = vsel %vm1507_vm4, %v6832_v11, 0.0  ;;  %v2116_v11 = vsel %vm1507_vm4, %v6534_v15, 0.0 }
 0x3ea   : > { %2576 = vadd.xlane.f32.xlu0 %v2575_v2  ;;  %v6878_v16 = vpop.permute.xlu0 %2525 }
 0x3eb   : > { %2579 = vadd.xlane.f32.xlu1 %v2578_v31  ;;  %v6904_v31 = vpop.permute.xlu1 %2491 }
 0x3ee   : > { %2800 = vadd.xlane.f32.xlu0 %v2799_v56  ;;  %v6888_v2 = vpop.permute.xlu0 %2749 }
 0x3ef   : > { %2803 = vadd.xlane.f32.xlu1 %v2802_v9  ;;  %v4090_v9 = vld [vmem:[#allocation7] sm:$0xff]   ;;  %v6912_v60 = vpop.permute.xlu1 %2715 }
 0x3f0   : > { %3869 = vmatprep.subr.bf16.mxu1 %v4090_v9 }
 0x3f1   : > { %3870 = vmatpush3.bf16.msra.mxu1 %v4090_v9 }
 0x3f2   : > { %2346 = vadd.xlane.f32.xlu0 %v2345_v21  ;;  %v6898_v56 = vpop.permute.xlu0 %2265  ;;  %3871 = vmatprep.subr.bf16.mxu1 %v4091_v55 }
 0x3f3   : > { %2573 = vadd.xlane.f32.xlu1 %v2572_v0  ;;  %v6924_v8 = vpop.permute.xlu1 %2299 }
 0x3f5   : > { %3872 = vmatpush3.bf16.msra.mxu1 %v4091_v55  ;;  %v2814_v55 = vsel %vm1507_vm4, %v6752_v27, 0.0  ;;  %v2113_v27 = vsel %vm1507_vm4, %v6680_v38, 0.0 }
 0x3f6   : > { %2570 = vadd.xlane.f32.xlu0 %v2569_v33  ;;  %v6908_v21 = vpop.permute.xlu0 %2489  ;;  %v2360_v33 = vsel %vm1507_vm4, %v6796_v37, 0.0  ;;  %v2581_v37 = vsel %vm1507_vm4, %v6830_v14, 0.0  ;;  %v2808_v14 = vsel %vm1507_vm4, %v6814_v42, 0.0  ;;  %v2811_v42 = vsel %vm1507_vm4, %v6804_v23, 0.0  ;;  %v4097_v23 = vld [vmem:[#allocation7 + $0x38] sm:$0xff]  }
 0x3f7   : > { %2797 = vadd.xlane.f32.xlu1 %v2796_v62  ;;  %v4092_v62 = vld [vmem:[#allocation7 + $0x10] sm:$0xff]   ;;  %v6932_v9 = vpop.permute.xlu1 %2523 }
 0x3f8   : > { %3873 = vmatprep.subr.bf16.mxu1 %v4092_v62 }
 0x3f9   : > { %3874 = vmatpush3.bf16.msra.mxu1 %v4092_v62  ;;  %v4096_v62 = vld [vmem:[#allocation7 + $0x30] sm:$0xff]  }
 0x3fa   : > { %2794 = vadd.xlane.f32.xlu0 %v2793_v20  ;;  %v6918_v0 = vpop.permute.xlu0 %2713  ;;  %v2584_v20 = vsel %vm1507_vm4, %v6806_v29, 0.0  ;;  %v2587_v29 = vsel %vm1507_vm4, %v6800_v53, 0.0 }
 0x3fb   : > { %2367 = vadd.xlane.f32.xlu1 %v2366_v22  ;;  %v4093_v22 = vld [vmem:[#allocation7 + $0x18] sm:$0xff]   ;;  %v6944_v53 = vpop.permute.xlu1 %2747 }
 0x3fc   : > { %3875 = vmatprep.subr.bf16.mxu1 %v4093_v22 }
 0x3fd   : > { %3876 = vmatpush3.bf16.msra.mxu1 %v4093_v22 }
 0x3fe   : > { %2349 = vadd.xlane.f32.xlu0 %v2348_v3  ;;  %v6928_v3 = vpop.permute.xlu0 %2297 }
 0x3ff   : > { %2361 = vadd.xlane.f32.xlu1 %v2360_v33 }
 0x402   : > { %2364 = vadd.xlane.f32.xlu0 %v2363_v28  ;;  %v4094_v28 = vld [vmem:[#allocation7 + $0x20] sm:$0xff]   ;;  %v6938_v33 = vpop.permute.xlu0 %2521 }
 0x403   : > { %2585 = vadd.xlane.f32.xlu1 %v2584_v20  ;;  %3877 = vmatprep.subr.bf16.mxu1 %v4094_v28 }
 0x404   : > { %3878 = vmatpush3.bf16.msra.mxu1 %v4094_v28 }
 0x406   : > { %2358 = vadd.xlane.f32.xlu0 %v2357_v25  ;;  %v4095_v25 = vld [vmem:[#allocation7 + $0x28] sm:$0xff]   ;;  %v6948_v20 = vpop.permute.xlu0 %2745 }
 0x407   : > { %2591 = vadd.xlane.f32.xlu1 %v2590_v1  ;;  %3879 = vmatprep.subr.bf16.mxu1 %v4095_v25  ;;  %v2372_v1 = vsel %vm1507_vm4, %v6892_v43, 0.0  ;;  %v2378_v43 = vsel %vm1507_vm4, %v6838_v6, 0.0  ;;  %v2599_v6 = vsel %vm1507_vm4, %v6854_v5, 0.0  ;;  %v2823_v5 = vsel %vm1507_vm4, %v6860_v57, 0.0 }
 0x408   : > { %3880 = vmatpush3.bf16.msra.mxu1 %v4095_v25  ;;  %v2134_v57 = vsel %vm1507_vm4, %v6611_v52, 0.0 }
 0x409   : > { %3881 = vmatprep.subr.bf16.mxu1 %v4096_v62 }
 0x40a   : > { %2582 = vadd.xlane.f32.xlu0 %v2581_v37  ;;  %v2280_v37 = vpop.permute.xlu1 %2279  ;;  %v2278_v22 = vpop.permute.xlu0 %2277 }
 0x40b   : > { %2809 = vadd.xlane.f32.xlu1 %v2808_v14  ;;  %v2122_v14 = vsel %vm1507_vm4, %v6460_v58, 0.0 }
 0x40c   : > { %3882 = vmatpush3.bf16.msra.mxu1 %v4096_v62  ;;  %v2593_v62 = vsel %vm1507_vm4, %v6908_v21, 0.0  ;;  %v2817_v21 = vsel %vm1507_vm4, %v6918_v0, 0.0 }
 0x40d   : > { %3883 = vmatprep.subr.bf16.mxu1 %v4097_v23 }
 0x40e   : > { %2588 = vadd.xlane.f32.xlu0 %v2587_v29  ;;  %v2369_v29 = vsel %vm1507_vm4, %v6898_v56, 0.0  ;;  %v2504_v28 = vpop.permute.xlu1 %2503  ;;  %v2375_v56 = vsel %vm1507_vm4, %v6848_v41, 0.0 }
 0x40f   : > { %2815 = vadd.xlane.f32.xlu1 %v2814_v55  ;;  %v2502_v55 = vpop.permute.xlu0 %2501 }
 0x410   : > { %3884 = vmatpush3.bf16.msra.mxu1 %v4097_v23 }
 0x412   : > { %2806 = vadd.xlane.f32.xlu0 %v2805_v12  ;;  %v2119_v12 = vsel %vm1507_vm4, %v6613_v46, 0.0  ;;  %v2728_v25 = vpop.permute.xlu1 %2727 }
 0x413   : > { %2117 = vadd.xlane.f32.xlu1 %v2116_v11  ;;  %v2726_v11 = vpop.permute.xlu0 %2725 }
 0x416   : > { %2812 = vadd.xlane.f32.xlu0 %v2811_v42  ;;  %v2596_v42 = vsel %vm1507_vm4, %v6904_v31, 0.0  ;;  %v2820_v31 = vsel %vm1507_vm4, %v6912_v60, 0.0  ;;  %v2128_v60 = vsel %vm1507_vm4, %v6670_v19, 0.0 }
 0x417   : > { %2373 = vadd.xlane.f32.xlu1 %v2372_v1  ;;  %v6972_v1 = vpop.permute.xlu1 %2311  ;;  %v6976_v41 = vpop.permute.xlu0 %2309 }
 0x41a   : > { %2114 = vadd.xlane.f32.xlu0 %v2113_v27  ;;  %v2602_v27 = vsel %vm1507_vm4, %v6844_v47, 0.0  ;;  %v2826_v47 = vsel %vm1507_vm4, %v6850_v44, 0.0 }
 0x41b   : > { %2123 = vadd.xlane.f32.xlu1 %v2122_v14  ;;  %v6980_v23 = vpop.permute.xlu1 %2535 }
 0x41e   : > { %2370 = vadd.xlane.f32.xlu0 %v2369_v29  ;;  %v6986_v29 = vpop.permute.xlu0 %2533 }
 0x41f   : > { %2379 = vadd.xlane.f32.xlu1 %v2378_v43  ;;  %v2276_v14 = vpop.permute.xlu1 %2275 }
 0x420   : > { %v2384_v43 = vsel %vm1507_vm4, %v2276_v14, 0.0  ;;  %v2611_v14 = vsel %vm1507_vm4, %v2502_v55, 0.0 }
 0x422   : > { %2120 = vadd.xlane.f32.xlu0 %v2119_v12  ;;  %v2125_v12 = vsel %vm1507_vm4, %v6778_v59, 0.0  ;;  %v2274_v0 = vpop.permute.xlu0 %2273 }
 0x423   : > { %2597 = vadd.xlane.f32.xlu1 %v2596_v42  ;;  %v2381_v44 = vsel %vm1507_vm4, %v2274_v0, 0.0  ;;  %v2390_v42 = vsel %vm1507_vm4, %v2280_v37, 0.0 }
 0x426   : > { %2376 = vadd.xlane.f32.xlu0 %v2375_v56  ;;  %v2131_v56 = vsel %vm1507_vm4, %v6740_v36, 0.0 }
 0x427   : > { %2603 = vadd.xlane.f32.xlu1 %v2602_v27  ;;  %v2498_v27 = vpop.permute.xlu0 %2497 }
 0x42a   : > { %2594 = vadd.xlane.f32.xlu0 %v2593_v62  ;;  %v2500_v62 = vpop.permute.xlu1 %2499 }
 0x42b   : > { %2821 = vadd.xlane.f32.xlu1 %v2820_v31  ;;  %v2608_v31 = vsel %vm1507_vm4, %v2500_v62, 0.0 }
 0x42e   : > { %2600 = vadd.xlane.f32.xlu0 %v2599_v6  ;;  %v2387_v6 = vsel %vm1507_vm4, %v2278_v22, 0.0 }
 0x42f   : > { %2827 = vadd.xlane.f32.xlu1 %v2826_v47  ;;  %v2614_v47 = vsel %vm1507_vm4, %v2504_v28, 0.0  ;;  %v2835_v28 = vsel %vm1507_vm4, %v2726_v11, 0.0  ;;  %v2393_v11 = vsel %vm1507_vm4, %v6754_v34, 0.0  ;;  %v2399_v34 = vsel %vm1507_vm4, %v6674_v50, 0.0 }
 0x430   : > { %v2623_v50 = vsel %vm1507_vm4, %v6693_v7, 0.0  ;;  %v2847_v7 = vsel %vm1507_vm4, %v6706_v24, 0.0  ;;  %v2405_v24 = vsel %vm1507_vm4, %v6836_v48, 0.0 }
 0x432   : > { %2818 = vadd.xlane.f32.xlu0 %v2817_v21  ;;  %v2605_v21 = vsel %vm1507_vm4, %v2498_v27, 0.0  ;;  %v2396_v27 = vsel %vm1507_vm4, %v6687_v32, 0.0  ;;  %v2402_v32 = vsel %vm1507_vm4, %v6605_v51, 0.0  ;;  %v2626_v51 = vsel %vm1507_vm4, %v6617_v13, 0.0 }
 0x433   : > { %2129 = vadd.xlane.f32.xlu1 %v2128_v60  ;;  %v2722_v60 = vpop.permute.xlu0 %2721  ;;  %v2850_v13 = vsel %vm1507_vm4, %v6624_v10, 0.0  ;;  %v2408_v10 = vsel %vm1507_vm4, %v6824_v61, 0.0 }
 0x434   : > { %v2829_v22 = vsel %vm1507_vm4, %v2722_v60, 0.0 }
 0x436   : > { %2824 = vadd.xlane.f32.xlu0 %v2823_v5  ;;  %v2724_v5 = vpop.permute.xlu1 %2723 }
 0x437   : > { %2385 = vadd.xlane.f32.xlu1 %v2384_v43  ;;  %v2832_v37 = vsel %vm1507_vm4, %v2724_v5, 0.0  ;;  %v2838_v43 = vsel %vm1507_vm4, %v2728_v25, 0.0 }
 0x43a   : > { %2126 = vadd.xlane.f32.xlu0 %v2125_v12  ;;  %v7007_v12 = vpop.permute.xlu0 %2305  ;;  %v7010_v0 = vpop.permute.xlu1 %2307 }
 0x43b   : > { %2135 = vadd.xlane.f32.xlu1 %v2134_v57 }
 0x43e   : > { %2382 = vadd.xlane.f32.xlu0 %v2381_v44  ;;  %v7639_v44 = vld [vmem:[#allocation17_spill] sm:$0xff]  ;;  %v7016_v57 = vpop.permute.xlu0 %2529 }
 0x43f   : > { %2391 = vadd.xlane.f32.xlu1 %v2390_v42  ;;  %v2140_v55 = vsel %vm1507_vm4, %v7639_v44, 0.0  ;;  %v7640_v42 = vld [vmem:[#allocation24_spill] sm:$0xff] }
 0x440   : > { %v2137_v62 = vsel %vm1507_vm4, %v7640_v42, 0.0 }
 0x442   : > { %2132 = vadd.xlane.f32.xlu0 %v2131_v56  ;;  %v7018_v56 = vpop.permute.xlu1 %2531  ;;  %v7024_v25 = vpop.permute.xlu0 %2753 }
 0x443   : > { %2609 = vadd.xlane.f32.xlu1 %v2608_v31  ;;  %v7641_v31 = vld [vmem:[#allocation18_spill] sm:$0xff] }
 0x446   : > { %2388 = vadd.xlane.f32.xlu0 %v2387_v6  ;;  %v7028_v6 = vpop.permute.xlu1 %2755 }
 0x447   : > { %2615 = vadd.xlane.f32.xlu1 %v2614_v47  ;;  %v7642_v47 = vld [vmem:[#allocation26_spill] sm:$0xff] }
 0x448   : > { %v2143_v5 = vsel %vm1507_vm4, %v7642_v47, 0.0 }
 0x44a   : > { %2606 = vadd.xlane.f32.xlu0 %v2605_v21  ;;  %v2146_v21 = vsel %vm1507_vm4, %v7641_v31, 0.0  ;;  %v2094_v60 = vpop.xlane.xlu1 %2093 }
 0x44b   : > { %2833 = vadd.xlane.f32.xlu1 %v2832_v37  ;;  %v2620_v37 = vsel %vm1507_vm4, %v6704_v39, 0.0  ;;  %v2844_v39 = vsel %vm1507_vm4, %v6719_v35, 0.0  ;;  %v2152_v35 = vsel %vm1507_vm4, %v6421_v18, 0.0  ;;  %4300 = vrcp.f32 %v2094_v60  ;;  %v7647_v60 = vld [vmem:[#allocation45_spill] sm:$0xff]  ;;  %v7654_v18 = vld [vmem:[#allocation34_spill] sm:$0xff] }
 0x44e   : > { %2612 = vadd.xlane.f32.xlu0 %v2611_v14  ;;  %v7036_v14 = vpop.permute.xlu0 %2757 }
 0x44f   : > { %2839 = vadd.xlane.f32.xlu1 %v2838_v43  ;;  %v7042_v43 = vpop.permute.xlu1 %2759 }
 0x452   : > { %2830 = vadd.xlane.f32.xlu0 %v2829_v22 }
 0x453   : > { %2141 = vadd.xlane.f32.xlu1 %v2140_v55 }
 0x456   : > { %2836 = vadd.xlane.f32.xlu0 %v2835_v28  ;;  %v2617_v28 = vsel %vm1507_vm4, %v6772_v17, 0.0  ;;  %v2841_v17 = vsel %vm1507_vm4, %v6780_v54, 0.0  ;;  %v2149_v54 = vsel %vm1507_vm4, %v6571_v63, 0.0 }
 0x457   : > { %2397 = vadd.xlane.f32.xlu1 %v2396_v27 }
 0x45a   : > { %2138 = vadd.xlane.f32.xlu0 %v2137_v62 }
 0x45b   : > { %2147 = vadd.xlane.f32.xlu1 %v2146_v21 }
 0x45e   : > { %2394 = vadd.xlane.f32.xlu0 %v2393_v11 }
 0x45f   : > { %2403 = vadd.xlane.f32.xlu1 %v2402_v32 }
 0x462   : > { %2144 = vadd.xlane.f32.xlu0 %v2143_v5 }
 0x463   : > { %2621 = vadd.xlane.f32.xlu1 %v2620_v37 }
 0x466   : > { %2400 = vadd.xlane.f32.xlu0 %v2399_v34 }
 0x467   : > { %v2100_v22 = vpop.xlane.xlu0 %2099  ;;  %2627 = vadd.xlane.f32.xlu1 %v2626_v51  ;;  %v7643_v51 = vld [vmem:[#allocation19_spill] sm:$0xff] }
 0x468   : > { %v2097_v62 = vpop.xlane.xlu1 %2096  ;;  %4302 = vrcp.f32 %v2100_v22  ;;  %v2632_v22 = vsel %vm1507_vm4, %v7647_v60, 0.0 }
 0x469   : > { %4304 = vrcp.f32 %v2097_v62 }
 0x46a   : > { %2618 = vadd.xlane.f32.xlu0 %v2617_v28 }
 0x46b   : > { %v7048_v55 = vpop.xlane.xlu0 %2102  ;;  %2845 = vadd.xlane.f32.xlu1 %v2844_v39 }
 0x46c   : > { %v7056_v11 = vpop.xlane.xlu1 %2105 }
 0x46e   : > { %2624 = vadd.xlane.f32.xlu0 %v2623_v50  ;;  %v2158_v50 = vsel %vm1507_vm4, %v7643_v51, 0.0 }
 0x46f   : > { %v7054_v27 = vpop.xlane.xlu0 %2108  ;;  %2851 = vadd.xlane.f32.xlu1 %v2850_v13  ;;  %v7644_v13 = vld [vmem:[#allocation32_spill] sm:$0xff] }
 0x470   : > { %v7062_v5 = vpop.xlane.xlu1 %2111  ;;  %v2155_v61 = vsel %vm1507_vm4, %v7644_v13, 0.0  ;;  %v7652_v13 = vld [vmem:[#allocation48_spill] sm:$0xff] }
 0x472   : > { %2842 = vadd.xlane.f32.xlu0 %v2841_v17 }
 0x473   : > { %v2353_v21 = vpop.xlane.xlu0 %2352  ;;  %2153 = vadd.xlane.f32.xlu1 %v2152_v35 }
 0x474   : > { %v2356_v34 = vpop.xlane.xlu1 %2355  ;;  %4306 = vrcp.f32 %v2353_v21  ;;  %v7648_v21 = vld [vmem:[#allocation47_spill] sm:$0xff] }
 0x476   : > { %2848 = vadd.xlane.f32.xlu0 %v2847_v7  ;;  %v7645_v7 = vld [vmem:[#allocation40_spill] sm:$0xff] }
 0x477   : > { %v2577_v32 = vpop.xlane.xlu0 %2576  ;;  %2409 = vadd.xlane.f32.xlu1 %v2408_v10  ;;  %v2414_v35 = vsel %vm1507_vm4, %v7645_v7, 0.0  ;;  %v2411_v10 = vsel %vm1507_vm4, %v7646_v26, 0.0 }
 0x478   : > { %v2580_v28 = vpop.xlane.xlu1 %2579  ;;  %4308 = vrcp.f32 %v2577_v32  ;;  %v2629_v32 = vsel %vm1507_vm4, %v7648_v21, 0.0 }
 0x479   : > { %4310 = vrcp.f32 %v2356_v34  ;;  %v7649_v34 = vld [vmem:[#allocation35_spill] sm:$0xff] }
 0x47a   : > { %2150 = vadd.xlane.f32.xlu0 %v2149_v54  ;;  %4312 = vrcp.f32 %v2580_v28  ;;  %v2638_v28 = vsel %vm1507_vm4, %v7649_v34, 0.0 }
 0x47b   : > { %v2801_v37 = vpop.xlane.xlu0 %2800  ;;  %2159 = vadd.xlane.f32.xlu1 %v2158_v50  ;;  %v4299_v50 = vpop.eup %4298 }
 0x47c   : > { %v2804_v17 = vpop.xlane.xlu1 %2803 }
 0x47e   : > { %2406 = vadd.xlane.f32.xlu0 %v2405_v24 }
 0x47f   : > { %v2347_v39 = vpop.xlane.xlu0 %2346  ;;  %2415 = vadd.xlane.f32.xlu1 %v2414_v35 }
 0x480   : > { %v2574_v54 = vpop.xlane.xlu1 %2573  ;;  %4314 = vrcp.f32 %v2347_v39 }
 0x481   : > { %4316 = vrcp.f32 %v2804_v17 }
 0x482   : > { %2156 = vadd.xlane.f32.xlu0 %v2155_v61  ;;  %v4301_v61 = vpop.eup %4300 }
 0x483   : > { %v2571_v48 = vpop.xlane.xlu0 %2570  ;;  %2633 = vadd.xlane.f32.xlu1 %v2632_v22  ;;  %v4303_v7 = vpop.eup %4302  ;;  %v7651_v22 = vld [vmem:[#allocation46_spill] sm:$0xff] }
 0x484   : > { %v2798_v24 = vpop.xlane.xlu1 %2797  ;;  %4318 = vrcp.f32 %v2571_v48  ;;  %v4305_v39 = vpop.eup %4304 }
 0x485   : > { %v4307_v17 = vpop.eup %4306 }
 0x486   : > { %2412 = vadd.xlane.f32.xlu0 %v2411_v10  ;;  %v7650_v10 = vld [vmem:[#allocation43_spill] sm:$0xff]  ;;  %v4309_v60 = vpop.eup %4308 }
 0x487   : > { %v2795_v62 = vpop.xlane.xlu0 %2794  ;;  %2639 = vadd.xlane.f32.xlu1 %v2638_v28  ;;  %v2635_v48 = vsel %vm1507_vm4, %v7650_v10, 0.0  ;;  %v4311_v21 = vpop.eup %4310 }
 0x488   : > { %4320 = vrcp.f32 %v2795_v62  ;;  %v2368_v26 = vpop.xlane.xlu1 %2367  ;;  %v2856_v62 = vsel %vm1507_vm4, %v7651_v22, 0.0  ;;  %v2924_v47 = vsel %vm1507_vm4, %v4303_v7, %v4311_v21 }
 0x489   : > { %4322 = vrcp.f32 %v2801_v37  ;;  %v4313_v37 = vpop.eup %4312 }
 0x48a   : > { %2630 = vadd.xlane.f32.xlu0 %v2629_v32  ;;  %v4315_v28 = vpop.eup %4314  ;;  %v2956_v42 = vsel %vm1927_vm14, %v2924_v47, %v4313_v37 }
 0x48b   : > { %v2350_v35 = vpop.xlane.xlu0 %2349  ;;  %2857 = vadd.xlane.f32.xlu1 %v2856_v62  ;;  %v4317_v51 = vpop.eup %4316  ;;  %v2164_v62 = vsel %vm1507_vm4, %v7654_v18, 0.0  ;;  %v2923_v18 = vsel %vm1507_vm4, %v4305_v39, %v4307_v17  ;;  %v7656_v39 = vld [vmem:[#allocation39_spill] sm:$0xff] }
 0x48c   : > { %4324 = vrcp.f32 %v2350_v35  ;;  %v2362_v34 = vpop.xlane.xlu1 %2361  ;;  %v2853_v35 = vsel %vm1507_vm4, %v7652_v13, 0.0  ;;  %v7655_v13 = vld [vmem:[#allocation44_spill] sm:$0xff]  ;;  %v2988_v7 = vsel %vm1960_vm15, %v2956_v42, %v4317_v51  ;;  %v2955_v47 = vsel %vm1927_vm14, %v2923_v18, %v4309_v60 }
 0x48d   : > { %4326 = vrcp.f32 %v2574_v54  ;;  %v7653_v54 = vld [vmem:[#allocation22_spill] sm:$0xff]  ;;  %v2161_v42 = vsel %vm1507_vm4, %v7656_v39, 0.0  ;;  %v2420_v18 = vsel %vm1507_vm4, %v6924_v8, 0.0  ;;  %v7661_v8 = vld [vmem:[#allocation15_spill] sm:$0xff] }
 0x48e   : > { %4328 = vrcp.f32 %v2798_v24  ;;  %2636 = vadd.xlane.f32.xlu0 %v2635_v48  ;;  %v2862_v10 = vsel %vm1507_vm4, %v7653_v54, 0.0  ;;  %v4319_v63 = vpop.eup %4318  ;;  %v2921_v54 = vsel %vm1507_vm4, %v4299_v50, %v4315_v28 }
 0x48f   : > { %v2365_v32 = vpop.xlane.xlu0 %2364  ;;  %2863 = vadd.xlane.f32.xlu1 %v2862_v10  ;;  %4330 = vrcp.f32 %v7048_v55  ;;  %v2953_v55 = vsel %vm1927_vm14, %v2921_v54, %v4319_v63 }
 0x490   : > { %v2586_v22 = vpop.xlane.xlu1 %2585  ;;  %4332 = vrcp.f32 %v7056_v11 }
 0x491   : > { %4334 = vrcp.f32 %v7062_v5 }
 0x492   : > { %2854 = vadd.xlane.f32.xlu0 %v2853_v35  ;;  %v4321_v48 = vpop.eup %4320  ;;  %v2859_v35 = vsel %vm1507_vm4, %v7655_v13, 0.0  ;;  %4336 = vrcp.f32 %v2368_v26  ;;  %v7657_v26 = vld [vmem:[#allocation20_spill] sm:$0xff] }
 0x493   : > { %v2359_v24 = vpop.xlane.xlu0 %2358  ;;  %v4323_v31 = vpop.eup %4322  ;;  %2165 = vadd.xlane.f32.xlu1 %v2164_v62  ;;  %v2985_v50 = vsel %vm1960_vm15, %v2953_v55, %v4321_v48  ;;  %4338 = vrcp.f32 %v2365_v32  ;;  %v3020_v17 = vmul.f32 %v7657_v26, %v2988_v7  ;;  %v7659_v32 = vld [vmem:[#allocation29_spill] sm:$0xff]  ;;  %v2170_v7 = vsel %vm1507_vm4, %v7661_v8, 0.0 }
 0x494   : > { %v2592_v5 = vpop.xlane.xlu1 %2591  ;;  %v2987_v63 = vsel %vm1960_vm15, %v2955_v47, %v4323_v31  ;;  %4340 = vrcp.f32 %v2362_v34  ;;  %v7660_v31 = vld [vmem:[#allocation27_spill] sm:$0xff]  ;;  %v7662_v47 = vld [vmem:[#allocation25_spill] sm:$0xff] }
 0x495   : > { %4342 = vrcp.f32 %v2586_v22  ;;  %v3019_v34 = vmul.f32 %v7660_v31, %v2987_v63 }
 0x496   : > { %v4325_v10 = vpop.eup %4324  ;;  %2860 = vadd.xlane.f32.xlu0 %v2859_v35  ;;  %4344 = vrcp.f32 %v2359_v24 }
 0x497   : > { %v4327_v21 = vpop.eup %4326  ;;  %v2583_v11 = vpop.xlane.xlu0 %2582  ;;  %v2922_v13 = vsel %vm1507_vm4, %v4301_v61, %v4325_v10  ;;  %v7658_v61 = vld [vmem:[#allocation23_spill] sm:$0xff]  ;;  %2421 = vadd.xlane.f32.xlu1 %v2420_v18  ;;  %v2417_v10 = vsel %vm1507_vm4, %v6928_v3, 0.0  ;;  %v3050_v22 = vpack.c.bf16 %v3020_v17, %v3019_v34  ;;  %v2167_v3 = vsel %vm1507_vm4, %v7662_v47, 0.0 }
 0x498   : > { %v4329_v37 = vpop.eup %4328  ;;  %v2954_v28 = vsel %vm1927_vm14, %v2922_v13, %v4327_v21  ;;  %v3017_v60 = vmul.f32 %v7658_v61, %v2985_v50  ;;  %4346 = vrcp.f32 %v2583_v11  ;;  %v2810_v54 = vpop.xlane.xlu1 %2809  ;;  %v2423_v17 = vsel %vm1507_vm4, %v6868_v30, 0.0 }
 0x499   : > { %v2986_v51 = vsel %vm1960_vm15, %v2954_v28, %v4329_v37  ;;  %4348 = vrcp.f32 %v2810_v54  ;;  %v4331_v55 = vpop.eup %4330  ;;  %v2644_v61 = vsel %vm1507_vm4, %v6932_v9, 0.0  ;;  %v2641_v30 = vsel %vm1507_vm4, %v6938_v33, 0.0 }
 0x49a   : > { %2162 = vadd.xlane.f32.xlu0 %v2161_v42  ;;  %v3018_v48 = vmul.f32 %v7659_v32, %v2986_v51  ;;  %4350 = vrcp.f32 %v2592_v5  ;;  %v4333_v24 = vpop.eup %4332  ;;  %v2426_v5 = vsel %vm1507_vm4, %v6864_v40, 0.0  ;;  %v2650_v9 = vsel %vm1507_vm4, %v6872_v49, 0.0 }
 0x49b   : > { %v2589_v62 = vpop.xlane.xlu0 %2588  ;;  %2171 = vadd.xlane.f32.xlu1 %v2170_v7  ;;  %v4335_v11 = vpop.eup %4334  ;;  %v2647_v49 = vsel %vm1507_vm4, %v6878_v16, 0.0 }
 0x49c   : > { %v3049_v35 = vpack.c.bf16 %v3018_v48, %v3017_v60  ;;  %4352 = vrcp.f32 %v2589_v62  ;;  %v2816_v13 = vpop.xlane.xlu1 %2815  ;;  %v4337_v50 = vpop.eup %4336 }
 0x49d   : > { %v4339_v37 = vpop.eup %4338 }
 0x49e   : > { %2418 = vadd.xlane.f32.xlu0 %v2417_v10  ;;  %3885 = vmatprep.mubr.bf16.mxu1 %v3049_v35  ;;  %v4341_v28 = vpop.eup %4340 }
 0x49f   : > { %v2807_v21 = vpop.xlane.xlu0 %2806  ;;  %3886 = vmatmul.mubr.bf16.vlgmr.msra.gmra.mrb[16].mxu1 %v3050_v22  ;;  %2427 = vadd.xlane.f32.xlu1 %v2426_v5  ;;  %v4343_v42 = vpop.eup %4342  ;;  %v7663_v22 = vld [vmem:[#allocation31_spill] sm:$0xff] }
 0x4a0   : > { %4354 = vrcp.f32 %v2807_v21  ;;  %v2118_v51 = vpop.xlane.xlu1 %2117  ;;  %v4345_v26 = vpop.eup %4344 }
 0x4a1   : > { %4356 = vrcp.f32 %v2816_v13  ;;  %v2925_v35 = vsel %vm1507_vm4, %v4331_v55, %v4345_v26 }
 0x4a2   : > { %4358 = vrcp.f32 %v7054_v27  ;;  %2168 = vadd.xlane.f32.xlu0 %v2167_v3  ;;  %v4347_v18 = vpop.eup %4346  ;;  %v2926_v27 = vsel %vm1507_vm4, %v4333_v24, %v4341_v28  ;;  %v2928_v24 = vsel %vm1507_vm4, %v4335_v11, %v4337_v50  ;;  %v7664_v28 = vld [vmem:[#allocation33_spill] sm:$0xff]  ;;  %v2868_v50 = vsel %vm1507_vm4, %v6944_v53, 0.0 }
 0x4a3   : > { %v2813_v63 = vpop.xlane.xlu0 %2812  ;;  %v4349_v60 = vpop.eup %4348  ;;  %2645 = vadd.xlane.f32.xlu1 %v2644_v61  ;;  %v2958_v40 = vsel %vm1927_vm14, %v2926_v27, %v4343_v42  ;;  %v2957_v10 = vsel %vm1927_vm14, %v2925_v35, %v4347_v18  ;;  %v2874_v53 = vsel %vm1507_vm4, %v6884_v4, 0.0  ;;  %v7666_v35 = vld [vmem:[#allocation21_spill] sm:$0xff] }
 0x4a4   : > { %4360 = vrcp.f32 %v2813_v63  ;;  %v4351_v48 = vpop.eup %4350  ;;  %v2374_v62 = vpop.xlane.xlu1 %2373  ;;  %v2990_v31 = vsel %vm1960_vm15, %v2958_v40, %v4349_v60  ;;  %v7667_v4 = vld [vmem:[#allocation41_spill] sm:$0xff] }
 0x4a5   : > { %v3022_v7 = vmul.f32 %v7663_v22, %v2990_v31  ;;  %v2960_v33 = vsel %vm1927_vm14, %v2928_v24, %v4351_v48  ;;  %v7665_v48 = vld [vmem:[#allocation38_spill] sm:$0xff]  ;;  %4362 = vrcp.f32 %v2118_v51  ;;  %v2173_v51 = vsel %vm1507_vm4, %v7667_v4, 0.0 }
 0x4a6   : > { %2424 = vadd.xlane.f32.xlu0 %v2423_v17  ;;  %v4353_v34 = vpop.eup %4352 }
 0x4a7   : > { %v2115_v32 = vpop.xlane.xlu0 %2114  ;;  %2651 = vadd.xlane.f32.xlu1 %v2650_v9 }
 0x4a8   : > { %v2124_v55 = vpop.xlane.xlu1 %2123  ;;  %4364 = vrcp.f32 %v2115_v32  ;;  %v2432_v32 = vsel %vm1507_vm4, %v7010_v0, 0.0 }
 0x4a9   : > { %4366 = vrcp.f32 %v2374_v62 }
 0x4aa   : > { %v4355_v54 = vpop.eup %4354  ;;  %2642 = vadd.xlane.f32.xlu0 %v2641_v30 }
 0x4ab   : > { %v4357_v21 = vpop.eup %4356  ;;  %v2371_v13 = vpop.xlane.xlu0 %2370  ;;  %v2989_v3 = vsel %vm1960_vm15, %v2957_v10, %v4355_v54  ;;  %2869 = vadd.xlane.f32.xlu1 %v2868_v50  ;;  %v2176_v54 = vsel %vm1507_vm4, %v7666_v35, 0.0  ;;  %v2429_v10 = vsel %vm1507_vm4, %v7007_v12, 0.0 }
 0x4ac   : > { %v4359_v5 = vpop.eup %4358  ;;  %v3021_v63 = vmul.f32 %v7664_v28, %v2989_v3  ;;  %v2992_v42 = vsel %vm1960_vm15, %v2960_v33, %v4357_v21  ;;  %v2380_v40 = vpop.xlane.xlu1 %2379  ;;  %4368 = vrcp.f32 %v2371_v13  ;;  %v2438_v28 = vsel %vm1507_vm4, %v6972_v1, 0.0 }
 0x4ad   : > { %v2927_v26 = vsel %vm1507_vm4, %v4359_v5, %v4339_v37  ;;  %v3024_v61 = vmul.f32 %v7638_v45, %v2992_v42  ;;  %v2865_v37 = vsel %vm1507_vm4, %v6948_v20, 0.0  ;;  %4370 = vrcp.f32 %v2124_v55  ;;  %v7669_v5 = vld [vmem:[#allocation30_spill] sm:$0xff] }
 0x4ae   : > { %v4361_v17 = vpop.eup %4360  ;;  %2648 = vadd.xlane.f32.xlu0 %v2647_v49  ;;  %v3051_v11 = vpack.c.bf16 %v3022_v7, %v3021_v63  ;;  %v2959_v18 = vsel %vm1927_vm14, %v2927_v26, %v4353_v34  ;;  %v2871_v34 = vsel %vm1507_vm4, %v6888_v2, 0.0  ;;  %4372 = vrcp.f32 %v2380_v40  ;;  %v7668_v7 = vld [vmem:[#allocation16_spill] sm:$0xff] }
 0x4af   : > { %v2121_v27 = vpop.xlane.xlu0 %2120  ;;  %v2991_v60 = vsel %vm1960_vm15, %v2959_v18, %v4361_v17  ;;  %2875 = vadd.xlane.f32.xlu1 %v2874_v53  ;;  %v4363_v22 = vpop.eup %4362  ;;  %v2182_v24 = vsel %vm1507_vm4, %v7668_v7, 0.0  ;;  %v2179_v55 = vsel %vm1507_vm4, %v7669_v5, 0.0  ;;  %v2656_v18 = vsel %vm1507_vm4, %v7018_v56, 0.0 }
 0x4b0   : > { %3889 = vmatprep.mubr.bf16.mxu1 %v3051_v11  ;;  %v3023_v16 = vmul.f32 %v7665_v48, %v2991_v60  ;;  %v2598_v45 = vpop.xlane.xlu1 %2597  ;;  %v2435_v11 = vsel %vm1507_vm4, %v6976_v41, 0.0  ;;  %v2653_v41 = vsel %vm1507_vm4, %v7016_v57, 0.0  ;;  %v2662_v56 = vsel %vm1507_vm4, %v6980_v23, 0.0 }
 0x4b1   : > { %4374 = vrcp.f32 %v2598_v45  ;;  %v2659_v23 = vsel %vm1507_vm4, %v6986_v29, 0.0 }
 0x4b2   : > { %2866 = vadd.xlane.f32.xlu0 %v2865_v37  ;;  %v3052_v31 = vpack.c.bf16 %v3024_v61, %v3023_v16  ;;  %v4365_v21 = vpop.eup %4364 }
 0x4b3   : > { %v2377_v30 = vpop.xlane.xlu0 %2376  ;;  %2177 = vadd.xlane.f32.xlu1 %v2176_v54  ;;  %v4367_v0 = vpop.eup %4366 }
 0x4b4   : > { %3890 = vmatmul.mubr.bf16.gmra.mrb[20].mxu1 %v3052_v31  ;;  %v2604_v9 = vpop.xlane.xlu1 %2603  ;;  %4376 = vrcp.f32 %v2377_v30  ;;  %v2930_v61 = vsel %vm1507_vm4, %v4363_v22, %v4367_v0 }
 0x4b6   : > { %2872 = vadd.xlane.f32.xlu0 %v2871_v34  ;;  %v4369_v33 = vpop.eup %4368 }
 0x4b7   : > { %v2595_v20 = vpop.xlane.xlu0 %2594  ;;  %2433 = vadd.xlane.f32.xlu1 %v2432_v32  ;;  %v4371_v12 = vpop.eup %4370  ;;  %v2929_v31 = vsel %vm1507_vm4, %v4365_v21, %v4369_v33  ;;  %v2877_v33 = vsel %vm1507_vm4, %v7024_v25, 0.0 }
 0x4b8   : > { %4378 = vrcp.f32 %v2595_v20  ;;  %v2822_v62 = vpop.xlane.xlu1 %2821  ;;  %v4373_v63 = vpop.eup %4372 }
 0x4b9   : > { %4380 = vrcp.f32 %v2822_v62  ;;  %v2932_v34 = vsel %vm1507_vm4, %v4371_v12, %v4373_v63  ;;  %v4098_v63 = vld [vmem:[#allocation8] sm:$0xff]  }
 0x4ba   : > { %2174 = vadd.xlane.f32.xlu0 %v2173_v51  ;;  %4382 = vrcp.f32 %v2604_v9  ;;  %3917 = vmatprep.subr.bf16.mxu0 %v4098_v63 }
 0x4bb   : > { %v2601_v2 = vpop.xlane.xlu0 %2600  ;;  %2183 = vadd.xlane.f32.xlu1 %v2182_v24  ;;  %v4375_v49 = vpop.eup %4374  ;;  %v2880_v24 = vsel %vm1507_vm4, %v7028_v6, 0.0  ;;  %v2886_v6 = vsel %vm1507_vm4, %v7042_v43, 0.0  ;;  %3918 = vmatpush3.bf16.msra.mxu0 %v4098_v63 }
 0x4bc   : > { %4384 = vrcp.f32 %v2601_v2  ;;  %v2828_v3 = vpop.xlane.xlu1 %2827  ;;  %v2962_v1 = vsel %vm1927_vm14, %v2930_v61, %v4375_v49  ;;  %v4099_v49 = vld [vmem:[#allocation8 + $0x8] sm:$0xff]  }
 0x4bd   : > { %3919 = vmatprep.subr.bf16.mxu0 %v4099_v49 }
 0x4be   : > { %2430 = vadd.xlane.f32.xlu0 %v2429_v10  ;;  %v4377_v17 = vpop.eup %4376 }
 0x4bf   : > { %v2819_v13 = vpop.xlane.xlu0 %2818  ;;  %2439 = vadd.xlane.f32.xlu1 %v2438_v28  ;;  %v2883_v28 = vsel %vm1507_vm4, %v7036_v14, 0.0  ;;  %3920 = vmatpush3.bf16.msra.mxu0 %v4099_v49 }
 0x4c0   : > { %4386 = vrcp.f32 %v2819_v13  ;;  %v2130_v26 = vpop.xlane.xlu1 %2129 }
 0x4c1   : > { %4388 = vrcp.f32 %v2828_v3 }
 0x4c2   : > { %4390 = vrcp.f32 %v2121_v27  ;;  %2180 = vadd.xlane.f32.xlu0 %v2179_v55  ;;  %v4379_v50 = vpop.eup %4378 }
 0x4c3   : > { %v2825_v42 = vpop.xlane.xlu0 %2824  ;;  %v4381_v27 = vpop.eup %4380  ;;  %2657 = vadd.xlane.f32.xlu1 %v2656_v18  ;;  %v2961_v30 = vsel %vm1927_vm14, %v2929_v31, %v4379_v50  ;;  %v4100_v18 = vld [vmem:[#allocation8 + $0x10] sm:$0xff]  }
 0x4c4   : > { %4392 = vrcp.f32 %v2825_v42  ;;  %v4383_v40 = vpop.eup %4382  ;;  %v2386_v48 = vpop.xlane.xlu1 %2385  ;;  %v2994_v16 = vsel %vm1960_vm15, %v2962_v1, %v4381_v27  ;;  %3921 = vmatprep.subr.bf16.mxu0 %v4100_v18 }
 0x4c5   : > { %v3026_v45 = vmul.f32 %v6534_v15, %v2994_v16  ;;  %v2964_v57 = vsel %vm1927_vm14, %v2932_v34, %v4383_v40  ;;  %4394 = vrcp.f32 %v2130_v26  ;;  %3922 = vmatpush3.bf16.msra.mxu0 %v4100_v18  ;;  %v4101_v16 = vld [vmem:[#allocation8 + $0x18] sm:$0xff]  }
 0x4c6   : > { %2436 = vadd.xlane.f32.xlu0 %v2435_v11  ;;  %v4385_v37 = vpop.eup %4384  ;;  %3923 = vmatprep.subr.bf16.mxu0 %v4101_v16 }
 0x4c7   : > { %v2127_v60 = vpop.xlane.xlu0 %2126  ;;  %2663 = vadd.xlane.f32.xlu1 %v2662_v56 }
 0x4c8   : > { %v2136_v32 = vpop.xlane.xlu1 %2135  ;;  %4396 = vrcp.f32 %v2127_v60 }
 0x4c9   : > { %4398 = vrcp.f32 %v2386_v48  ;;  %3924 = vmatpush3.bf16.msra.mxu0 %v4101_v16 }
 0x4ca   : > { %v4387_v53 = vpop.eup %4386  ;;  %2654 = vadd.xlane.f32.xlu0 %v2653_v41 }
 0x4cb   : > { %v4389_v54 = vpop.eup %4388  ;;  %v2383_v20 = vpop.xlane.xlu0 %2382  ;;  %v2993_v9 = vsel %vm1960_vm15, %v2961_v30, %v4387_v53  ;;  %2881 = vadd.xlane.f32.xlu1 %v2880_v24 }
 0x4cc   : > { %v4391_v51 = vpop.eup %4390  ;;  %v3025_v2 = vmul.f32 %v6680_v38, %v2993_v9  ;;  %v2996_v62 = vsel %vm1960_vm15, %v2964_v57, %v4389_v54  ;;  %v2392_v3 = vpop.xlane.xlu1 %2391  ;;  %4400 = vrcp.f32 %v2383_v20  ;;  %v4103_v9 = vld [vmem:[#allocation8 + $0x28] sm:$0xff]  }
 0x4cd   : > { %v2931_v15 = vsel %vm1507_vm4, %v4391_v51, %v4377_v17  ;;  %v3028_v13 = vmul.f32 %v6460_v58, %v2996_v62  ;;  %4402 = vrcp.f32 %v2136_v32 }
 0x4ce   : > { %v4393_v10 = vpop.eup %4392  ;;  %2660 = vadd.xlane.f32.xlu0 %v2659_v23  ;;  %v3053_v22 = vpack.c.bf16 %v3026_v45, %v3025_v2  ;;  %v2963_v21 = vsel %vm1927_vm14, %v2931_v15, %v4385_v37  ;;  %4404 = vrcp.f32 %v2392_v3  ;;  %v4102_v37 = vld [vmem:[#allocation8 + $0x20] sm:$0xff]  }
 0x4cf   : > { %v2133_v0 = vpop.xlane.xlu0 %2132  ;;  %v2995_v38 = vsel %vm1960_vm15, %v2963_v21, %v4393_v10  ;;  %2887 = vadd.xlane.f32.xlu1 %v2886_v6  ;;  %v4395_v26 = vpop.eup %4394  ;;  %3925 = vmatprep.subr.bf16.mxu0 %v4102_v37 }
 0x4d0   : > { %3893 = vmatprep.mubr.bf16.mxu1 %v3053_v22  ;;  %v3027_v29 = vmul.f32 %v6613_v46, %v2995_v38  ;;  %v2610_v58 = vpop.xlane.xlu1 %2609  ;;  %3926 = vmatpush3.bf16.msra.mxu0 %v4102_v37 }
 0x4d1   : > { %4406 = vrcp.f32 %v2610_v58  ;;  %3927 = vmatprep.subr.bf16.mxu0 %v4103_v9 }
 0x4d2   : > { %2878 = vadd.xlane.f32.xlu0 %v2877_v33  ;;  %v3054_v55 = vpack.c.bf16 %v3028_v13, %v3027_v29  ;;  %v4397_v14 = vpop.eup %4396 }
 0x4d3   : > { %v2389_v12 = vpop.xlane.xlu0 %2388  ;;  %v4399_v11 = vpop.eup %4398 }
 0x4d4   : > { %3894 = vmatmul.mubr.bf16.gmra.mrb[24].mxu1 %v3054_v55  ;;  %v2616_v25 = vpop.xlane.xlu1 %2615  ;;  %4408 = vrcp.f32 %v2389_v12  ;;  %v2934_v53 = vsel %vm1507_vm4, %v4395_v26, %v4399_v11  ;;  %3928 = vmatpush3.bf16.msra.mxu0 %v4103_v9 }
 0x4d6   : > { %2884 = vadd.xlane.f32.xlu0 %v2883_v28  ;;  %v4401_v61 = vpop.eup %4400 }
 0x4d7   : > { %v2607_v46 = vpop.xlane.xlu0 %2606  ;;  %v4403_v27 = vpop.eup %4402  ;;  %v2933_v51 = vsel %vm1507_vm4, %v4397_v14, %v4401_v61 }
 0x4d8   : > { %4410 = vrcp.f32 %v2607_v46  ;;  %v2834_v42 = vpop.xlane.xlu1 %2833  ;;  %v4405_v60 = vpop.eup %4404 }
 0x4d9   : > { %4412 = vrcp.f32 %v2834_v42  ;;  %v2936_v23 = vsel %vm1507_vm4, %v4403_v27, %v4405_v60 }
 0x4da   : > { %4414 = vrcp.f32 %v2616_v25 }
 0x4db   : > { %v2613_v43 = vpop.xlane.xlu0 %2612  ;;  %v4407_v40 = vpop.eup %4406 }
 0x4dc   : > { %4416 = vrcp.f32 %v2613_v43  ;;  %v2840_v50 = vpop.xlane.xlu1 %2839  ;;  %v2966_v45 = vsel %vm1927_vm14, %v2934_v53, %v4407_v40  ;;  %v4105_v43 = vld [vmem:[#allocation8 + $0x38] sm:$0xff]  }
 0x4de   : > { %v4409_v41 = vpop.eup %4408 }
 0x4df   : > { %v2831_v17 = vpop.xlane.xlu0 %2830 }
 0x4e0   : > { %4418 = vrcp.f32 %v2831_v17  ;;  %v2142_v48 = vpop.xlane.xlu1 %2141 }
 0x4e1   : > { %4420 = vrcp.f32 %v2840_v50 }
 0x4e2   : > { %4422 = vrcp.f32 %v2133_v0  ;;  %v4411_v31 = vpop.eup %4410 }
 0x4e3   : > { %v2837_v1 = vpop.xlane.xlu0 %2836  ;;  %v4413_v56 = vpop.eup %4412  ;;  %v2965_v2 = vsel %vm1927_vm14, %v2933_v51, %v4411_v31 }
 0x4e4   : > { %4424 = vrcp.f32 %v2837_v1  ;;  %v4415_v34 = vpop.eup %4414  ;;  %v2398_v54 = vpop.xlane.xlu1 %2397  ;;  %v2998_v20 = vsel %vm1960_vm15, %v2966_v45, %v4413_v56 }
 0x4e5   : > { %v3030_v62 = vmul.f32 %v6670_v19, %v2998_v20  ;;  %v2968_v24 = vsel %vm1927_vm14, %v2936_v23, %v4415_v34  ;;  %4426 = vrcp.f32 %v2142_v48 }
 0x4e6   : > { %v4417_v57 = vpop.eup %4416 }
 0x4e7   : > { %v2139_v30 = vpop.xlane.xlu0 %2138 }
 0x4e8   : > { %v2148_v13 = vpop.xlane.xlu1 %2147  ;;  %4428 = vrcp.f32 %v2139_v30 }
 0x4e9   : > { %4430 = vrcp.f32 %v2398_v54 }
 0x4ea   : > { %v4419_v32 = vpop.eup %4418 }
 0x4eb   : > { %v4421_v15 = vpop.eup %4420  ;;  %v2395_v10 = vpop.xlane.xlu0 %2394  ;;  %v2997_v22 = vsel %vm1960_vm15, %v2965_v2, %v4419_v32 }
 0x4ec   : > { %v4423_v21 = vpop.eup %4422  ;;  %v3029_v0 = vmul.f32 %v6778_v59, %v2997_v22  ;;  %v3000_v38 = vsel %vm1960_vm15, %v2968_v24, %v4421_v15  ;;  %v2404_v58 = vpop.xlane.xlu1 %2403  ;;  %v4104_v59 = vld [vmem:[#allocation8 + $0x30] sm:$0xff]   ;;  %4432 = vrcp.f32 %v2395_v10  ;;  %v7670_v22 = vld [vmem:[#allocation24_spill] sm:$0xff] }
 0x4ed   : > { %v2935_v3 = vsel %vm1507_vm4, %v4423_v21, %v4409_v41  ;;  %v3032_v55 = vmul.f32 %v6611_v52, %v3000_v38  ;;  %3929 = vmatprep.subr.bf16.mxu0 %v4104_v59  ;;  %4434 = vrcp.f32 %v2148_v13 }
 0x4ee   : > { %v4425_v29 = vpop.eup %4424  ;;  %v3055_v19 = vpack.c.bf16 %v3030_v62, %v3029_v0  ;;  %v2967_v33 = vsel %vm1927_vm14, %v2935_v3, %v4417_v57  ;;  %3930 = vmatpush3.bf16.msra.mxu0 %v4104_v59  ;;  %4436 = vrcp.f32 %v2404_v58  ;;  %v7671_v3 = vld [vmem:[#allocation18_spill] sm:$0xff] }
 0x4ef   : > { %v2145_v6 = vpop.xlane.xlu0 %2144  ;;  %v2999_v12 = vsel %vm1960_vm15, %v2967_v33, %v4425_v29  ;;  %3931 = vmatprep.subr.bf16.mxu0 %v4105_v43  ;;  %v4427_v26 = vpop.eup %4426 }
 0x4f0   : > { %3897 = vmatprep.mubr.bf16.mxu1 %v3055_v19  ;;  %v3031_v28 = vmul.f32 %v6740_v36, %v2999_v12  ;;  %v2622_v63 = vpop.xlane.xlu1 %2621 }
 0x4f1   : > { %4438 = vrcp.f32 %v2622_v63 }
 0x4f2   : > { %v3056_v46 = vpack.c.bf16 %v3032_v55, %v3031_v28  ;;  %3932 = vmatpush3.bf16.msra.mxu0 %v4105_v43  ;;  %v4429_v14 = vpop.eup %4428 }
 0x4f3   : > { %v2401_v25 = vpop.xlane.xlu0 %2400  ;;  %v4431_v11 = vpop.eup %4430 }
 0x4f4   : > { %3898 = vmatmul.mubr.bf16.gmra.mrb[28].mxu1 %v3056_v46  ;;  %v2628_v42 = vpop.xlane.xlu1 %2627  ;;  %4440 = vrcp.f32 %v2401_v25  ;;  %v2938_v37 = vsel %vm1507_vm4, %v4427_v26, %v4431_v11 }
 0x4f6   : > { %v4433_v18 = vpop.eup %4432 }
 0x4f7   : > { %v2619_v52 = vpop.xlane.xlu0 %2618  ;;  %v4435_v61 = vpop.eup %4434  ;;  %v2937_v54 = vsel %vm1507_vm4, %v4429_v14, %v4433_v18 }
 0x4f8   : > { %4442 = vrcp.f32 %v2619_v52  ;;  %v2846_v49 = vpop.xlane.xlu1 %2845  ;;  %v4437_v27 = vpop.eup %4436 }
 0x4f9   : > { %4444 = vrcp.f32 %v2846_v49  ;;  %v2940_v51 = vsel %vm1507_vm4, %v4435_v61, %v4437_v27 }
 0x4fa   : > { %4446 = vrcp.f32 %v2628_v42 }
 0x4fb   : > { %v2625_v36 = vpop.xlane.xlu0 %2624  ;;  %v4439_v1 = vpop.eup %4438 }
 0x4fc   : > { %4448 = vrcp.f32 %v2625_v36  ;;  %v2852_v50 = vpop.xlane.xlu1 %2851  ;;  %v2970_v53 = vsel %vm1927_vm14, %v2938_v37, %v4439_v1 }
 0x4fe   : > { %v4441_v48 = vpop.eup %4440 }
 0x4ff   : > { %v2843_v17 = vpop.xlane.xlu0 %2842 }
 0x500   : > { %4450 = vrcp.f32 %v2843_v17  ;;  %v2154_v40 = vpop.xlane.xlu1 %2153 }
 0x501   : > { %4452 = vrcp.f32 %v2852_v50 }
 0x502   : > { %4454 = vrcp.f32 %v2145_v6  ;;  %v4443_v16 = vpop.eup %4442  ;;  %v7672_v6 = vld [vmem:[#allocation26_spill] sm:$0xff] }
 0x503   : > { %v2849_v60 = vpop.xlane.xlu0 %2848  ;;  %v4445_v41 = vpop.eup %4444  ;;  %v2969_v9 = vsel %vm1927_vm14, %v2937_v54, %v4443_v16 }
 0x504   : > { %4456 = vrcp.f32 %v2849_v60  ;;  %v4447_v56 = vpop.eup %4446  ;;  %v2410_v30 = vpop.xlane.xlu1 %2409  ;;  %v3002_v45 = vsel %vm1960_vm15, %v2970_v53, %v4445_v41 }
 0x505   : > { %v3034_v57 = vmul.f32 %v7639_v44, %v3002_v45  ;;  %v2972_v23 = vsel %vm1927_vm14, %v2940_v51, %v4447_v56  ;;  %4458 = vrcp.f32 %v2154_v40 }
 0x506   : > { %v4449_v34 = vpop.eup %4448 }
 0x507   : > { %v2151_v31 = vpop.xlane.xlu0 %2150 }
 0x508   : > { %v2160_v10 = vpop.xlane.xlu1 %2159  ;;  %4460 = vrcp.f32 %v2151_v31 }
 0x509   : > { %4462 = vrcp.f32 %v2410_v30 }
 0x50a   : > { %v4451_v20 = vpop.eup %4450 }
 0x50b   : > { %v4453_v32 = vpop.eup %4452  ;;  %v2407_v2 = vpop.xlane.xlu0 %2406  ;;  %v3001_v62 = vsel %vm1960_vm15, %v2969_v9, %v4451_v20 }
 0x50c   : > { %v4455_v15 = vpop.eup %4454  ;;  %v3033_v24 = vmul.f32 %v7670_v22, %v3001_v62  ;;  %v3004_v21 = vsel %vm1960_vm15, %v2972_v23, %v4453_v32  ;;  %v2416_v55 = vpop.xlane.xlu1 %2415  ;;  %4464 = vrcp.f32 %v2407_v2  ;;  %v7674_v23 = vld [vmem:[#allocation36_spill] sm:$0xff] }
 0x50d   : > { %v2939_v13 = vsel %vm1507_vm4, %v4455_v15, %v4441_v48  ;;  %v3036_v29 = vmul.f32 %v7671_v3, %v3004_v21  ;;  %4466 = vrcp.f32 %v2160_v10 }
 0x50e   : > { %v4457_v0 = vpop.eup %4456  ;;  %v3057_v38 = vpack.c.bf16 %v3034_v57, %v3033_v24  ;;  %v2971_v44 = vsel %vm1927_vm14, %v2939_v13, %v4449_v34  ;;  %4468 = vrcp.f32 %v2416_v55  ;;  %v7673_v34 = vld [vmem:[#allocation37_spill] sm:$0xff] }
 0x50f   : > { %v2157_v19 = vpop.xlane.xlu0 %2156  ;;  %v3003_v33 = vsel %vm1960_vm15, %v2971_v44, %v4457_v0  ;;  %v4459_v52 = vpop.eup %4458  ;;  %v7675_v0 = vld [vmem:[#allocation19_spill] sm:$0xff] }
 0x510   : > { %3901 = vmatprep.mubr.bf16.mxu1 %v3057_v38  ;;  %v3035_v12 = vmul.f32 %v7672_v6, %v3003_v33  ;;  %v2634_v59 = vpop.xlane.xlu1 %2633 }
 0x511   : > { %4470 = vrcp.f32 %v2634_v59 }
 0x512   : > { %v3058_v58 = vpack.c.bf16 %v3036_v29, %v3035_v12  ;;  %v4461_v42 = vpop.eup %4460 }
 0x513   : > { %v2413_v28 = vpop.xlane.xlu0 %2412  ;;  %v4463_v49 = vpop.eup %4462 }
 0x514   : > { %3902 = vmatmul.mubr.bf16.gmra.mrb[32].mxu1 %v3058_v58  ;;  %v2640_v25 = vpop.xlane.xlu1 %2639  ;;  %4472 = vrcp.f32 %v2413_v28  ;;  %v2942_v1 = vsel %vm1507_vm4, %v4459_v52, %v4463_v49 }
 0x516   : > { %v4465_v14 = vpop.eup %4464 }
 0x517   : > { %v2631_v46 = vpop.xlane.xlu0 %2630  ;;  %v4467_v17 = vpop.eup %4466  ;;  %v2941_v56 = vsel %vm1507_vm4, %v4461_v42, %v4465_v14 }
 0x518   : > { %4474 = vrcp.f32 %v2631_v46  ;;  %v2858_v43 = vpop.xlane.xlu1 %2857  ;;  %v4469_v11 = vpop.eup %4468 }
 0x519   : > { %4476 = vrcp.f32 %v2858_v43  ;;  %v2944_v20 = vsel %vm1507_vm4, %v4467_v17, %v4469_v11 }
 0x51a   : > { %4478 = vrcp.f32 %v2640_v25 }
 0x51b   : > { %v2637_v63 = vpop.xlane.xlu0 %2636  ;;  %v4471_v18 = vpop.eup %4470 }
 0x51c   : > { %4480 = vrcp.f32 %v2637_v63  ;;  %v2864_v26 = vpop.xlane.xlu1 %2863  ;;  %v2974_v16 = vsel %vm1927_vm14, %v2942_v1, %v4471_v18 }
 0x51e   : > { %v4473_v27 = vpop.eup %4472 }
 0x51f   : > { %v2855_v36 = vpop.xlane.xlu0 %2854 }
 0x520   : > { %4482 = vrcp.f32 %v2855_v36  ;;  %v2166_v61 = vpop.xlane.xlu1 %2165 }
 0x521   : > { %4484 = vrcp.f32 %v2864_v26 }
 0x522   : > { %4486 = vrcp.f32 %v2157_v19  ;;  %v4475_v60 = vpop.eup %4474  ;;  %v7676_v19 = vld [vmem:[#allocation32_spill] sm:$0xff] }
 0x523   : > { %v2861_v50 = vpop.xlane.xlu0 %2860  ;;  %v4477_v40 = vpop.eup %4476  ;;  %v2973_v45 = vsel %vm1927_vm14, %v2941_v56, %v4475_v60  ;;  %v7677_v56 = vld [vmem:[#allocation34_spill] sm:$0xff] }
 0x524   : > { %4488 = vrcp.f32 %v2861_v50  ;;  %v4479_v37 = vpop.eup %4478  ;;  %v2422_v41 = vpop.xlane.xlu1 %2421  ;;  %v3006_v31 = vsel %vm1960_vm15, %v2974_v16, %v4477_v40 }
 0x525   : > { %v3038_v54 = vmul.f32 %v7673_v34, %v3006_v31  ;;  %v2976_v32 = vsel %vm1927_vm14, %v2944_v20, %v4479_v37  ;;  %4490 = vrcp.f32 %v2166_v61 }
 0x526   : > { %v4481_v53 = vpop.eup %4480 }
 0x527   : > { %v2163_v48 = vpop.xlane.xlu0 %2162 }
 0x528   : > { %v2172_v62 = vpop.xlane.xlu1 %2171  ;;  %4492 = vrcp.f32 %v2163_v48 }
 0x529   : > { %4494 = vrcp.f32 %v2422_v41 }
 0x52a   : > { %v4483_v30 = vpop.eup %4482 }
 0x52b   : > { %v4485_v9 = vpop.eup %4484  ;;  %v2419_v57 = vpop.xlane.xlu0 %2418  ;;  %v3005_v51 = vsel %vm1960_vm15, %v2973_v45, %v4483_v30 }
 0x52c   : > { %v4487_v2 = vpop.eup %4486  ;;  %v3037_v15 = vmul.f32 %v7674_v23, %v3005_v51  ;;  %v3008_v10 = vsel %vm1960_vm15, %v2976_v32, %v4485_v9  ;;  %v2428_v29 = vpop.xlane.xlu1 %2427  ;;  %4496 = vrcp.f32 %v2419_v57 }
 0x52d   : > { %v2943_v22 = vsel %vm1507_vm4, %v4487_v2, %v4473_v27  ;;  %v3040_v38 = vmul.f32 %v7675_v0, %v3008_v10  ;;  %4498 = vrcp.f32 %v2172_v62 }
 0x52e   : > { %v4489_v24 = vpop.eup %4488  ;;  %v3059_v21 = vpack.c.bf16 %v3038_v54, %v3037_v15  ;;  %v2975_v13 = vsel %vm1927_vm14, %v2943_v22, %v4481_v53  ;;  %4500 = vrcp.f32 %v2428_v29 }
 0x52f   : > { %v2169_v44 = vpop.xlane.xlu0 %2168  ;;  %v3007_v3 = vsel %vm1960_vm15, %v2975_v13, %v4489_v24  ;;  %v4491_v25 = vpop.eup %4490 }
 0x530   : > { %3905 = vmatprep.mubr.bf16.mxu1 %v3059_v21  ;;  %v3039_v33 = vmul.f32 %v7676_v19, %v3007_v3  ;;  %v2646_v12 = vpop.xlane.xlu1 %2645 }
 0x531   : > { %4502 = vrcp.f32 %v2646_v12 }
 0x532   : > { %v3060_v55 = vpack.c.bf16 %v3040_v38, %v3039_v33  ;;  %v4493_v63 = vpop.eup %4492 }
 0x533   : > { %v2425_v6 = vpop.xlane.xlu0 %2424  ;;  %v4495_v52 = vpop.eup %4494 }
 0x534   : > { %3906 = vmatmul.mubr.bf16.gmra.mrb[36].mxu1 %v3060_v55  ;;  %v2652_v28 = vpop.xlane.xlu1 %2651  ;;  %4504 = vrcp.f32 %v2425_v6  ;;  %v2946_v61 = vsel %vm1507_vm4, %v4491_v25, %v4495_v52 }
 0x536   : > { %v4497_v36 = vpop.eup %4496 }
 0x537   : > { %v2643_v58 = vpop.xlane.xlu0 %2642  ;;  %v4499_v49 = vpop.eup %4498  ;;  %v2945_v41 = vsel %vm1507_vm4, %v4493_v63, %v4497_v36 }
 0x538   : > { %4506 = vrcp.f32 %v2643_v58  ;;  %v2870_v46 = vpop.xlane.xlu1 %2869  ;;  %v4501_v26 = vpop.eup %4500 }
 0x539   : > { %4508 = vrcp.f32 %v2870_v46  ;;  %v2948_v45 = vsel %vm1507_vm4, %v4499_v49, %v4501_v26 }
 0x53a   : > { %4510 = vrcp.f32 %v2652_v28 }
 0x53b   : > { %v2649_v59 = vpop.xlane.xlu0 %2648  ;;  %v4503_v17 = vpop.eup %4502 }
 0x53c   : > { %4512 = vrcp.f32 %v2649_v59  ;;  %v2876_v42 = vpop.xlane.xlu1 %2875  ;;  %v2978_v1 = vsel %vm1927_vm14, %v2946_v61, %v4503_v17 }
 0x53e   : > { %v4505_v50 = vpop.eup %4504 }
 0x53f   : > { %v2867_v43 = vpop.xlane.xlu0 %2866 }
 0x540   : > { %4514 = vrcp.f32 %v2867_v43  ;;  %v2178_v11 = vpop.xlane.xlu1 %2177 }
 0x541   : > { %4516 = vrcp.f32 %v2876_v42 }
 0x542   : > { %4518 = vrcp.f32 %v2169_v44  ;;  %v4507_v18 = vpop.eup %4506 }
 0x543   : > { %v2873_v14 = vpop.xlane.xlu0 %2872  ;;  %v4509_v27 = vpop.eup %4508  ;;  %v2977_v53 = vsel %vm1927_vm14, %v2945_v41, %v4507_v18 }
 0x544   : > { %4520 = vrcp.f32 %v2873_v14  ;;  %v4511_v40 = vpop.eup %4510  ;;  %v2434_v48 = vpop.xlane.xlu1 %2433  ;;  %v3010_v16 = vsel %vm1960_vm15, %v2978_v1, %v4509_v27 }
 0x545   : > { %v3042_v30 = vmul.f32 %v7677_v56, %v3010_v16  ;;  %v2980_v9 = vsel %vm1927_vm14, %v2948_v45, %v4511_v40  ;;  %4522 = vrcp.f32 %v2178_v11 }
 0x546   : > { %v4513_v37 = vpop.eup %4512 }
 0x547   : > { %v2175_v60 = vpop.xlane.xlu0 %2174 }
 0x548   : > { %v2184_v51 = vpop.xlane.xlu1 %2183  ;;  %4524 = vrcp.f32 %v2175_v60 }
 0x549   : > { %4526 = vrcp.f32 %v2434_v48 }
 0x54a   : > { %v4515_v31 = vpop.eup %4514 }
 0x54b   : > { %v4517_v34 = vpop.eup %4516  ;;  %v2431_v54 = vpop.xlane.xlu0 %2430  ;;  %v3009_v20 = vsel %vm1960_vm15, %v2977_v53, %v4515_v31 }
 0x54c   : > { %v4519_v57 = vpop.eup %4518  ;;  %v3041_v32 = vmul.f32 %v7656_v39, %v3009_v20  ;;  %v3012_v2 = vsel %vm1960_vm15, %v2980_v9, %v4517_v34  ;;  %v2440_v13 = vpop.xlane.xlu1 %2439  ;;  %4528 = vrcp.f32 %v2431_v54 }
 0x54d   : > { %v2947_v62 = vsel %vm1507_vm4, %v4519_v57, %v4505_v50  ;;  %v3044_v22 = vmul.f32 %v7661_v8, %v3012_v2  ;;  %4530 = vrcp.f32 %v2184_v51 }
 0x54e   : > { %v4521_v23 = vpop.eup %4520  ;;  %v3061_v15 = vpack.c.bf16 %v3042_v30, %v3041_v32  ;;  %v2979_v10 = vsel %vm1927_vm14, %v2947_v62, %v4513_v37  ;;  %4532 = vrcp.f32 %v2440_v13 }
 0x54f   : > { %v2181_v24 = vpop.xlane.xlu0 %2180  ;;  %v3011_v21 = vsel %vm1960_vm15, %v2979_v10, %v4521_v23  ;;  %v4523_v33 = vpop.eup %4522 }
 0x550   : > { %3909 = vmatprep.mubr.bf16.mxu1 %v3061_v15  ;;  %v3043_v0 = vmul.f32 %v7662_v47, %v3011_v21  ;;  %v2658_v39 = vpop.xlane.xlu1 %2657 }
 0x551   : > { %4534 = vrcp.f32 %v2658_v39 }
 0x552   : > { %v3062_v38 = vpack.c.bf16 %v3044_v22, %v3043_v0  ;;  %v4525_v47 = vpop.eup %4524 }
 0x553   : > { %v2437_v44 = vpop.xlane.xlu0 %2436  ;;  %v4527_v6 = vpop.eup %4526 }
 0x554   : > { %3910 = vmatmul.mubr.bf16.gmra.mrb[40].mxu1 %v3062_v38  ;;  %v2664_v29 = vpop.xlane.xlu1 %2663  ;;  %4536 = vrcp.f32 %v2437_v44  ;;  %v2950_v52 = vsel %vm1507_vm4, %v4523_v33, %v4527_v6 }
 0x556   : > { %v4529_v58 = vpop.eup %4528 }
 0x557   : > { %v2655_v3 = vpop.xlane.xlu0 %2654  ;;  %v4531_v28 = vpop.eup %4530  ;;  %v2949_v17 = vsel %vm1507_vm4, %v4525_v47, %v4529_v58 }
 0x558   : > { %4538 = vrcp.f32 %v2655_v3  ;;  %v2882_v19 = vpop.xlane.xlu1 %2881  ;;  %v4533_v59 = vpop.eup %4532 }
 0x559   : > { %4540 = vrcp.f32 %v2882_v19  ;;  %v2952_v61 = vsel %vm1507_vm4, %v4531_v28, %v4533_v59 }
 0x55a   : > { %4542 = vrcp.f32 %v2664_v29 }
 0x55b   : > { %v2661_v8 = vpop.xlane.xlu0 %2660  ;;  %v4535_v25 = vpop.eup %4534 }
 0x55c   : > { %4544 = vrcp.f32 %v2661_v8  ;;  %v2888_v12 = vpop.xlane.xlu1 %2887  ;;  %v2982_v36 = vsel %vm1927_vm14, %v2950_v52, %v4535_v25 }
 0x55e   : > { %v4537_v63 = vpop.eup %4536 }
 0x55f   : > { %v2879_v55 = vpop.xlane.xlu0 %2878 }
 0x560   : > { %4546 = vrcp.f32 %v2879_v55 }
 0x561   : > { %4548 = vrcp.f32 %v2888_v12 }
 0x562   : > { %4550 = vrcp.f32 %v2181_v24  ;;  %v4539_v43 = vpop.eup %4538 }
 0x563   : > { %v2885_v46 = vpop.xlane.xlu0 %2884  ;;  %v4541_v42 = vpop.eup %4540  ;;  %v2981_v50 = vsel %vm1927_vm14, %v2949_v17, %v4539_v43 }
 0x564   : > { %4552 = vrcp.f32 %v2885_v46  ;;  %v4543_v49 = vpop.eup %4542  ;;  %v3014_v26 = vsel %vm1960_vm15, %v2982_v36, %v4541_v42 }
 0x565   : > { %v3046_v18 = vmul.f32 %v7666_v35, %v3014_v26  ;;  %v2984_v1 = vsel %vm1927_vm14, %v2952_v61, %v4543_v49 }
 0x566   : > { %v4545_v14 = vpop.eup %4544 }
 0x56a   : > { %v4547_v11 = vpop.eup %4546 }
 0x56b   : > { %v4549_v27 = vpop.eup %4548  ;;  %v3013_v60 = vsel %vm1960_vm15, %v2981_v50, %v4547_v11  ;;  %v7299_v50 = vld [vmem:[%s7422_s4] ss:$0 sm:$0xff] }
 0x56c   : > { %v4551_v40 = vpop.eup %4550  ;;  %v3045_v48 = vmul.f32 %v7667_v4, %v3013_v60  ;;  %v3016_v16 = vsel %vm1960_vm15, %v2984_v1, %v4549_v27 }
 0x56d   : > { %v2951_v37 = vsel %vm1507_vm4, %v4551_v40, %v4537_v63  ;;  %v3048_v35 = vmul.f32 %v7668_v7, %v3016_v16 }
 0x56e   : > { %v4553_v41 = vpop.eup %4552  ;;  %v3063_v31 = vpack.c.bf16 %v3046_v18, %v3045_v48  ;;  %v2983_v53 = vsel %vm1927_vm14, %v2951_v37, %v4545_v14 }
 0x56f   : > { %v3015_v56 = vsel %vm1960_vm15, %v2983_v53, %v4553_v41 }
 0x570   : > { %3913 = vmatprep.mubr.bf16.mxu1 %v3063_v31  ;;  %v3047_v30 = vmul.f32 %v7669_v5, %v3015_v56 }
 0x572   : > { %v3887_v45 = vpop.f32.mrb[16].mxu1  ;;  %v3064_v34 = vpack.c.bf16 %v3048_v35, %v3047_v30 }
 0x573   : > { %v3163_v54 = vpop.f32.mrb[17].mxu1 }
 0x574   : > { %v3888_v20 = vpop.f32.mrb[18].mxu1  ;;  %3914 = vmatmul.mubr.bf16.gmra.mrb[44].mxu1 %v3064_v34 }
 0x575   : > { %v3291_v4 = vpack.c.bf16 %v3888_v20, %v3887_v45  ;;  %v3166_v9 = vpop.f32.mrb[19].mxu1 }
 0x576   : > { %v3290_v57 = vpack.c.bf16 %v3166_v9, %v3163_v54 }
 0x578   : > { %3933 = vmatprep.mubr.bf16.mxu0 %v3290_v57 }
 0x579   : > { %3934 = vmatmul.mubr.bf16.vlgmr.msra.gmra.mrb[16].mxu0 %v3291_v4 }
 0x587   : > { %v3891_v51 = vpop.f32.mrb[20].mxu1 }
 0x588   : > { %v3179_v32 = vpop.f32.mrb[21].mxu1 }
 0x589   : > { %v3892_v2 = vpop.f32.mrb[22].mxu1 }
 0x58a   : > { %v3293_v62 = vpack.c.bf16 %v3892_v2, %v3891_v51  ;;  %v3182_v7 = vpop.f32.mrb[23].mxu1 }
 0x58b   : > { %v3292_v23 = vpack.c.bf16 %v3182_v7, %v3179_v32 }
 0x58d   : > { %3937 = vmatprep.mubr.bf16.mxu0 %v3292_v23 }
 0x58e   : > { %3938 = vmatmul.mubr.bf16.gmra.mrb[20].mxu0 %v3293_v62 }
 0x5a7   : > { %v3895_v15 = vpop.f32.mrb[24].mxu1 }
 0x5a8   : > { %v3195_v5 = vpop.f32.mrb[25].mxu1 }
 0x5a9   : > { %v3896_v10 = vpop.f32.mrb[26].mxu1 }
 0x5aa   : > { %v3295_v22 = vpack.c.bf16 %v3896_v10, %v3895_v15  ;;  %v3198_v24 = vpop.f32.mrb[27].mxu1 }
 0x5ab   : > { %v3294_v21 = vpack.c.bf16 %v3198_v24, %v3195_v5 }
 0x5ad   : > { %3941 = vmatprep.mubr.bf16.mxu0 %v3294_v21 }
 0x5ae   : > { %3942 = vmatmul.mubr.bf16.gmra.mrb[24].mxu0 %v3295_v22 }
 0x5c7   : > { %v3899_v13 = vpop.f32.mrb[28].mxu1 }
 0x5c8   : > { %v3211_v0 = vpop.f32.mrb[29].mxu1 }
 0x5c9   : > { %v3900_v38 = vpop.f32.mrb[30].mxu1 }
 0x5ca   : > { %v3297_v44 = vpack.c.bf16 %v3900_v38, %v3899_v13  ;;  %v3214_v39 = vpop.f32.mrb[31].mxu1 }
 0x5cb   : > { %v3296_v3 = vpack.c.bf16 %v3214_v39, %v3211_v0 }
 0x5cd   : > { %3945 = vmatprep.mubr.bf16.mxu0 %v3296_v3 }
 0x5ce   : > { %3946 = vmatmul.mubr.bf16.gmra.mrb[28].mxu0 %v3297_v44 }
 0x5e7   : > { %v3903_v29 = vpop.f32.mrb[32].mxu1 }
 0x5e8   : > { %v3227_v8 = vpop.f32.mrb[33].mxu1 }
 0x5e9   : > { %v3904_v19 = vpop.f32.mrb[34].mxu1 }
 0x5ea   : > { %v3299_v33 = vpack.c.bf16 %v3904_v19, %v3903_v29  ;;  %v3230_v47 = vpop.f32.mrb[35].mxu1 }
 0x5eb   : > { %v3298_v55 = vpack.c.bf16 %v3230_v47, %v3227_v8 }
 0x5ed   : > { %3949 = vmatprep.mubr.bf16.mxu0 %v3298_v55 }
 0x5ee   : > { %3950 = vmatmul.mubr.bf16.gmra.mrb[32].mxu0 %v3299_v33 }
 0x607   : > { %v3907_v6 = vpop.f32.mrb[36].mxu1 }
 0x608   : > { %v3243_v12 = vpop.f32.mrb[37].mxu1 }
 0x609   : > { %v3908_v58 = vpop.f32.mrb[38].mxu1 }
 0x60a   : > { %v3301_v28 = vpack.c.bf16 %v3908_v58, %v3907_v6  ;;  %v3246_v59 = vpop.f32.mrb[39].mxu1 }
 0x60b   : > { %v3300_v46 = vpack.c.bf16 %v3246_v59, %v3243_v12 }
 0x60d   : > { %3953 = vmatprep.mubr.bf16.mxu0 %v3300_v46 }
 0x60e   : > { %3954 = vmatmul.mubr.bf16.gmra.mrb[36].mxu0 %v3301_v28 }
 0x627   : > { %v3911_v25 = vpop.f32.mrb[40].mxu1 }
 0x628   : > { %v3259_v63 = vpop.f32.mrb[41].mxu1 }
 0x629   : > { %v3912_v43 = vpop.f32.mrb[42].mxu1 }
 0x62a   : > { %v3303_v52 = vpack.c.bf16 %v3912_v43, %v3911_v25  ;;  %v3262_v42 = vpop.f32.mrb[43].mxu1 }
 0x62b   : > { %v3302_v36 = vpack.c.bf16 %v3262_v42, %v3259_v63 }
 0x62d   : > { %3957 = vmatprep.mubr.bf16.mxu0 %v3302_v36 }
 0x62e   : > { %3958 = vmatmul.mubr.bf16.gmra.mrb[40].mxu0 %v3303_v52 }
 0x647   : > { %v3915_v49 = vpop.f32.mrb[44].mxu1 }
 0x648   : > { %v3275_v26 = vpop.f32.mrb[45].mxu1 }
 0x649   : > { %v3916_v14 = vpop.f32.mrb[46].mxu1 }
 0x64a   : > { %v3305_v17 = vpack.c.bf16 %v3916_v14, %v3915_v49  ;;  %v3278_v11 = vpop.f32.mrb[47].mxu1 }
 0x64b   : > { %v3304_v18 = vpack.c.bf16 %v3278_v11, %v3275_v26 }
 0x64c   : > { %v3935_v61 = vpop.f32.mrb[16].mxu0 }
 0x64d   : > { %v3420_v27 = vadd.f32 %v3935_v61, %v7299_v50  ;;  %v3411_v60 = vpop.f32.mrb[17].mxu0  ;;  %3961 = vmatprep.mubr.bf16.mxu0 %v3304_v18 }
 0x64e   : > { %v3412_v1 = vadd.f32 %v7299_v50, %v3411_v60  ;;  %v3936_v40 = vpop.f32.mrb[18].mxu0  ;;  %3962 = vmatmul.mubr.bf16.gmra.mrb[44].mxu0 %v3305_v17 }
 0x64f   : > { %3540 = vst [vmem:[%s7303_s6 + $0x10] sm:$0xff] %v3420_v27  ;;  %v3423_v48 = vadd.f32 %v3936_v40, %v7299_v50  ;;  %v3414_v16 = vpop.f32.mrb[19].mxu0 }
 0x650   : > { %3538 = vst [vmem:[%s7303_s6] sm:$0xff] %v3412_v1  ;;  %v3415_v37 = vadd.f32 %v7299_v50, %v3414_v16 }
 0x651   : > { %3541 = vst [vmem:[%s7303_s6 + $0x18] sm:$0xff] %v3423_v48 }
 0x652   : > { %3539 = vst [vmem:[%s7303_s6 + $0x8] sm:$0xff] %v3415_v37 }
 0x661   : > { %v3939_v41 = vpop.f32.mrb[20].mxu0 }
 0x662   : > { %v3436_v31 = vadd.f32 %v3939_v41, %v7299_v50  ;;  %v3427_v53 = vpop.f32.mrb[21].mxu0 }
 0x663   : > { %v3428_v35 = vadd.f32 %v7299_v50, %v3427_v53  ;;  %v3940_v56 = vpop.f32.mrb[22].mxu0 }
 0x664   : > { %3544 = vst [vmem:[%s7303_s6 + $0x30] sm:$0xff] %v3436_v31  ;;  %v3439_v30 = vadd.f32 %v3940_v56, %v7299_v50  ;;  %v3430_v45 = vpop.f32.mrb[23].mxu0 }
 0x665   : > { %3542 = vst [vmem:[%s7303_s6 + $0x20] sm:$0xff] %v3428_v35  ;;  %v3431_v34 = vadd.f32 %v7299_v50, %v3430_v45 }
 0x666   : > { %3545 = vst [vmem:[%s7303_s6 + $0x38] sm:$0xff] %v3439_v30 }
 0x667   : > { %3543 = vst [vmem:[%s7303_s6 + $0x28] sm:$0xff] %v3431_v34 }
 0x681   : > { %v3943_v54 = vpop.f32.mrb[24].mxu0 }
 0x682   : > { %v3452_v20 = vadd.f32 %v3943_v54, %v7299_v50  ;;  %v3443_v4 = vpop.f32.mrb[25].mxu0 }
 0x683   : > { %v3444_v9 = vadd.f32 %v7299_v50, %v3443_v4  ;;  %v3944_v57 = vpop.f32.mrb[26].mxu0 }
 0x684   : > { %3548 = vst [vmem:[%s7303_s6 + $0x50] sm:$0xff] %v3452_v20  ;;  %v3455_v51 = vadd.f32 %v3944_v57, %v7299_v50  ;;  %v3446_v32 = vpop.f32.mrb[27].mxu0 }
 0x685   : > { %3546 = vst [vmem:[%s7303_s6 + $0x40] sm:$0xff] %v3444_v9  ;;  %v3447_v2 = vadd.f32 %v7299_v50, %v3446_v32 }
 0x686   : > { %3549 = vst [vmem:[%s7303_s6 + $0x58] sm:$0xff] %v3455_v51 }
 0x687   : > { %3547 = vst [vmem:[%s7303_s6 + $0x48] sm:$0xff] %v3447_v2 }
 0x6a1   : > { %v3947_v62 = vpop.f32.mrb[28].mxu0 }
 0x6a2   : > { %v3468_v7 = vadd.f32 %v3947_v62, %v7299_v50  ;;  %v3459_v23 = vpop.f32.mrb[29].mxu0 }
 0x6a3   : > { %v3460_v15 = vadd.f32 %v7299_v50, %v3459_v23  ;;  %v3948_v5 = vpop.f32.mrb[30].mxu0 }
 0x6a4   : > { %3552 = vst [vmem:[%s7303_s6 + $0x70] sm:$0xff] %v3468_v7  ;;  %v3471_v10 = vadd.f32 %v3948_v5, %v7299_v50  ;;  %v3462_v22 = vpop.f32.mrb[31].mxu0 }
 0x6a5   : > { %3550 = vst [vmem:[%s7303_s6 + $0x60] sm:$0xff] %v3460_v15  ;;  %v3463_v24 = vadd.f32 %v7299_v50, %v3462_v22 }
 0x6a6   : > { %3553 = vst [vmem:[%s7303_s6 + $0x78] sm:$0xff] %v3471_v10 }
 0x6a7   : > { %3551 = vst [vmem:[%s7303_s6 + $0x68] sm:$0xff] %v3463_v24 }
 0x6c1   : > { %v3951_v21 = vpop.f32.mrb[32].mxu0 }
 0x6c2   : > { %v3484_v13 = vadd.f32 %v3951_v21, %v7299_v50  ;;  %v3475_v0 = vpop.f32.mrb[33].mxu0 }
 0x6c3   : > { %v3476_v38 = vadd.f32 %v7299_v50, %v3475_v0  ;;  %v3952_v44 = vpop.f32.mrb[34].mxu0 }
 0x6c4   : > { %3556 = vst [vmem:[%s7303_s6 + $0x90] sm:$0xff] %v3484_v13  ;;  %v3487_v39 = vadd.f32 %v3952_v44, %v7299_v50  ;;  %v3478_v3 = vpop.f32.mrb[35].mxu0 }
 0x6c5   : > { %3554 = vst [vmem:[%s7303_s6 + $0x80] sm:$0xff] %v3476_v38  ;;  %v3479_v29 = vadd.f32 %v7299_v50, %v3478_v3 }
 0x6c6   : > { %3557 = vst [vmem:[%s7303_s6 + $0x98] sm:$0xff] %v3487_v39 }
 0x6c7   : > { %3555 = vst [vmem:[%s7303_s6 + $0x88] sm:$0xff] %v3479_v29 }
 0x6e1   : > { %v3955_v8 = vpop.f32.mrb[36].mxu0 }
 0x6e2   : > { %v3500_v19 = vadd.f32 %v3955_v8, %v7299_v50  ;;  %v3491_v33 = vpop.f32.mrb[37].mxu0 }
 0x6e3   : > { %v3492_v47 = vadd.f32 %v7299_v50, %v3491_v33  ;;  %v3956_v55 = vpop.f32.mrb[38].mxu0 }
 0x6e4   : > { %3560 = vst [vmem:[%s7303_s6 + $0xb0] sm:$0xff] %v3500_v19  ;;  %v3503_v6 = vadd.f32 %v3956_v55, %v7299_v50  ;;  %v3494_v12 = vpop.f32.mrb[39].mxu0 }
 0x6e5   : > { %3558 = vst [vmem:[%s7303_s6 + $0xa0] sm:$0xff] %v3492_v47  ;;  %v3495_v58 = vadd.f32 %v7299_v50, %v3494_v12 }
 0x6e6   : > { %3561 = vst [vmem:[%s7303_s6 + $0xb8] sm:$0xff] %v3503_v6 }
 0x6e7   : > { %3559 = vst [vmem:[%s7303_s6 + $0xa8] sm:$0xff] %v3495_v58 }
 0x701   : > { %v3959_v28 = vpop.f32.mrb[40].mxu0 }
 0x702   : > { %v3516_v59 = vadd.f32 %v3959_v28, %v7299_v50  ;;  %v3507_v46 = vpop.f32.mrb[41].mxu0 }
 0x703   : > { %v3508_v25 = vadd.f32 %v7299_v50, %v3507_v46  ;;  %v3960_v63 = vpop.f32.mrb[42].mxu0 }
 0x704   : > { %3564 = vst [vmem:[%s7303_s6 + $0xd0] sm:$0xff] %v3516_v59  ;;  %v3519_v43 = vadd.f32 %v3960_v63, %v7299_v50  ;;  %v3510_v52 = vpop.f32.mrb[43].mxu0 }
 0x705   : > { %3562 = vst [vmem:[%s7303_s6 + $0xc0] sm:$0xff] %v3508_v25  ;;  %v3511_v42 = vadd.f32 %v7299_v50, %v3510_v52 }
 0x706   : > { %3565 = vst [vmem:[%s7303_s6 + $0xd8] sm:$0xff] %v3519_v43 }
 0x707   : > { %3563 = vst [vmem:[%s7303_s6 + $0xc8] sm:$0xff] %v3511_v42 }
 0x721   : > { %v3963_v36 = vpop.f32.mrb[44].mxu0 }
 0x722   : > { %v3532_v49 = vadd.f32 %v3963_v36, %v7299_v50  ;;  %v3523_v26 = vpop.f32.mrb[45].mxu0 }
 0x723   : > { %v3524_v14 = vadd.f32 %v7299_v50, %v3523_v26  ;;  %v3964_v17 = vpop.f32.mrb[46].mxu0 }
 0x724   : > { %3568 = vst [vmem:[%s7303_s6 + $0xf0] sm:$0xff] %v3532_v49  ;;  %v3535_v11 = vadd.f32 %v3964_v17, %v7299_v50  ;;  %v3526_v18 = vpop.f32.mrb[47].mxu0 }
 0x725   : > { %3566 = vst [vmem:[%s7303_s6 + $0xe0] sm:$0xff] %v3524_v14  ;;  %v3527_v61 = vadd.f32 %v7299_v50, %v3526_v18 }
 0x726   : > { %3569 = vst [vmem:[%s7303_s6 + $0xf8] sm:$0xff] %v3535_v11 }
 0x727   : > { %3567 = vst [vmem:[%s7303_s6 + $0xe8] sm:$0xff] %v3527_v61 }
 0x728   : > { %4681 = shalt.err (!%p4678_p4)
}
 0x729   : > { %s4682_s26 = scalar_lea.hbm %s7368_s10, 4096  ;;  %s4686_s13 = scalar_lea.hbm %s7423_s5, 8192 }
 0x72a   : > { %p4683_p9 = scmp.ne.s32.totalorder %s7368_s10, %s4682_s26  ;;  %p4687_p8 = scmp.lt.u32.totalorder %s7368_s10, %s7423_s5 }
 0x72b   : > { %p4688_p13 = scmp.lt.u32.totalorder %s4686_s13, %s4682_s26  ;;  %p4690_p10 = scmp.lt.u32.totalorder %s4682_s26, %s7368_s10 }
 0x72c   : > { %p4684_p0 = pnand %p4683_p9, %p4941_p5 }
 0x72d   : > { %p4689_p6 = por %p4688_p13, %p4687_p8 }
 0x72e   : > { %p4685_p11 = pneg %p4684_p0 }
 0x72f   : > { %p4691_p3 = por %p4690_p10, %p4689_p6 }
 0x731   : > { %p4692_p7 = pnand %p4691_p3, %p4685_p11 }
 0x733   : > { %4695 = shalt.err (!%p4692_p7)
}
 0x734   : > { %s4755_s28 = smov 128   ;;  %s4756_s15 = smov 8  }
 0x735   : > { %3995 = dma.vmem_to_hbm [thread:$0]  (%p4941_p5), %s7370_s9, 4096, %s7368_s10, %s3571_s22, %s4755_s28, %s4755_s28, %s4756_s15  }
 0x736 PF: > { %s3599_s17 = sand.u32 1, %s4730_s18   ;;  %p7678_p12 = scmp.ne.s32.totalorder %s7505_s25, 0 }
 0x737   : > { %p7679_p1 = scmp.ge.s32.totalorder %s4742_s21, 2  ;;  %s3600_s8 = scalar_lea.sflag [#allocation4], %s3599_s17 }
 0x739   : > { %p4012_p2 = pnand %p7679_p1, %p7678_p12 }
 0x73b   : > { %4725 = dma.done.wait (!%p4012_p2), %s3600_s8, 4096  }
 0x73c   : > { %4727 = vsyncadd (!%p4012_p2), %s3600_s8, 4294963200  ;;  %p20_p4 = scmp.ge.s32.totalorder %s4927_s14, 4   ;;  %s7680_s18 = smov %s4734_s19 }
 0x73d   : > { %s7681_s19 = smov %s4738_s20  ;;  %s7682_s20 = smov %s4937_s30 }
 0x73e   : > { %s7683_s21 = smov %s4927_s14  ;;  %22 = sbr.rel (!%p20_p4) target bundleno = 7 (0x7), region = 97 }
 0x745   :  { %3605 = vsyncpa [#allocation3], 1 }
 0x746   :  { %3607 = vsyncpa [#allocation3 + $0x1], 1 }
 0x747   :  { %3608 = vsyncpa [#allocation6], 1 }
 0x748   :  { %3609 = vsyncpa [#allocation9], 1 }
 0x749   :  { %3610 = vsyncpa [#allocation4], 1 }
 0x74a   :  { %3612 = vsyncpa [#allocation4 + $0x1], 1 }

</bundles_post_ra>
